<compile_context>
chip_gen: v7x
topology: tpu7x:2x2x1
jax: 0.10.0
libtpu: 0.0.40
codegen_flags: <defaults>
</compile_context>

<pallas_src>
import functools

import jax
import jax.numpy as jnp
from jax.experimental import pallas as pl
from jax.experimental.pallas import tpu as pltpu

LANE = 128


def _round_up(x, m):
    return (x + m - 1) // m * m


# ---------------------------------------------------------------------------
# Kernel 1: im2col matmul (bf16 operands, f32 accumulate) + bias, and per-tile
#           BatchNorm partial statistics (sum, sum-of-squares).
# ---------------------------------------------------------------------------
def conv_stats_kernel(p_ref, w_ref, b_ref, y_ref, stat_ref, *, m_real, tm):
    # p_ref   : (tm, Kp)      bf16  im2col patch tile
    # w_ref   : (Kp, Cpad)    bf16  weights (full, resident)
    # b_ref   : (1, Cpad)     f32   bias
    # y_ref   : (tm, Cpad)    f32   conv output tile (lane-dense)
    # stat_ref: (1, 2, Cpad)  f32   per-tile [sum; sumsq] over valid rows
    i = pl.program_id(0)

    y = jnp.dot(p_ref[...], w_ref[...], preferred_element_type=jnp.float32)
    y = y + b_ref[...]
    y_ref[...] = y

    # Rows beyond the real M (tile padding) must not pollute the BN statistics.
    row = i * tm + jax.lax.broadcasted_iota(jnp.int32, (tm, 1), 0)
    valid = (row < m_real).astype(jnp.float32)
    yv = y * valid
    s = jnp.sum(yv, axis=0, keepdims=True)        # (1, Cpad)
    ss = jnp.sum(yv * y, axis=0, keepdims=True)   # yv*y == y*y*valid
    stat_ref[0] = jnp.concatenate([s, ss], axis=0)


# ---------------------------------------------------------------------------
# Kernel 2: fused BatchNorm(affine) + ReLU, lane-dense elementwise pass.
# ---------------------------------------------------------------------------
def bn_relu_kernel(y_ref, scale_ref, shift_ref, o_ref):
    y = y_ref[...] * scale_ref[...] + shift_ref[...]
    o_ref[...] = jnp.maximum(y, 0.0).astype(o_ref.dtype)


# ---------------------------------------------------------------------------
# pallas_call wrappers
# ---------------------------------------------------------------------------
def _conv_pass(patches, w, b, m_real, tm):
    m_pad, kp = patches.shape
    cpad = w.shape[1]
    n_tiles = m_pad // tm
    kernel = functools.partial(conv_stats_kernel, m_real=m_real, tm=tm)
    return pl.pallas_call(
        kernel,
        out_shape=(
            jax.ShapeDtypeStruct((m_pad, cpad), jnp.float32),
            jax.ShapeDtypeStruct((n_tiles, 2, cpad), jnp.float32),
        ),
        grid=(n_tiles,),
        in_specs=[
            pl.BlockSpec((tm, kp), lambda i: (i, 0)),
            pl.BlockSpec((kp, cpad), lambda i: (0, 0)),
            pl.BlockSpec((1, cpad), lambda i: (0, 0)),
        ],
        out_specs=(
            pl.BlockSpec((tm, cpad), lambda i: (i, 0)),
            pl.BlockSpec((1, 2, cpad), lambda i: (i, 0, 0)),
        ),
        compiler_params=pltpu.CompilerParams(
            dimension_semantics=("parallel",)),
    )(patches, w, b)


def _bn_relu_pass(y, scale, shift, out_dtype, tm):
    m_pad, cpad = y.shape
    n_tiles = m_pad // tm
    return pl.pallas_call(
        bn_relu_kernel,
        out_shape=jax.ShapeDtypeStruct((m_pad, cpad), out_dtype),
        grid=(n_tiles,),
        in_specs=[
            pl.BlockSpec((tm, cpad), lambda i: (i, 0)),
            pl.BlockSpec((1, cpad), lambda i: (0, 0)),
            pl.BlockSpec((1, cpad), lambda i: (0, 0)),
        ],
        out_specs=pl.BlockSpec((tm, cpad), lambda i: (i, 0)),
        compiler_params=pltpu.CompilerParams(
            dimension_semantics=("parallel",)),
    )(y, scale, shift)


# ---------------------------------------------------------------------------
# Wrapper glue: im2col layout + BN stat reduction (tiny) + reshapes.
# ---------------------------------------------------------------------------
def _im2col(x_ndhwc, kp, m_pad, dtype):
    # TODO(synk): for very large volumes, do the halo via overlapping BlockSpec
    # index_maps inside the kernel instead of a wrapper-side gather.
    n, d, h, w, c = x_ndhwc.shape
    xp = jnp.pad(x_ndhwc, ((0, 0), (1, 1), (1, 1), (1, 1), (0, 0)))
    taps = [xp[:, kd:kd + d, kh:kh + h, kw:kw + w, :]
            for kd in range(3) for kh in range(3) for kw in range(3)]
    p = jnp.concatenate(taps, axis=-1).reshape(n * d * h * w, 27 * c)
    p = jnp.pad(p, ((0, m_pad - p.shape[0]), (0, kp - p.shape[1])))
    return p.astype(dtype)


def conv_bn_relu_layer(x_ndhwc, w_mat, b, gamma, beta, *,
                       out_dtype, tm_max=512, eps=1e-5):
    n, d, h, w, _ = x_ndhwc.shape
    k, cout = w_mat.shape                    # k = 27 * Cin
    m = n * d * h * w
    kp = _round_up(k, LANE)
    cpad = _round_up(cout, LANE)
    tm = tm_max if m >= tm_max else _round_up(m, 8)
    m_pad = _round_up(m, tm)

    patches = _im2col(x_ndhwc, kp, m_pad, jnp.bfloat16)
    w_p = jnp.pad(w_mat, ((0, kp - k), (0, cpad - cout))).astype(jnp.bfloat16)
    b_p = jnp.pad(b, (0, cpad - cout)).astype(jnp.float32).reshape(1, cpad)

    y, stats = _conv_pass(patches, w_p, b_p, m, tm)

    # Per-channel BN statistics from the per-tile partials (tiny reduction).
    s = jnp.sum(stats[:, 0, :], axis=0)
    ss = jnp.sum(stats[:, 1, :], axis=0)
    mean = s / m
    var = jnp.maximum(ss / m - mean * mean, 0.0)   # biased var, guarded
    inv = jax.lax.rsqrt(var + eps)
    g_p = jnp.pad(gamma, (0, cpad - cout))
    be_p = jnp.pad(beta, (0, cpad - cout))
    scale = (g_p * inv).astype(jnp.float32).reshape(1, cpad)
    shift = (be_p - mean * g_p * inv).astype(jnp.float32).reshape(1, cpad)

    out = _bn_relu_pass(y, scale, shift, out_dtype, tm)
    return out[:m, :cout].reshape(n, d, h, w, cout)


def in_conv_forward(x_ncdhw, params):
    """InConv.forward: x is NCDHW (PyTorch convention)."""
    (w1, b1, g1, be1), (w2, b2, g2, be2) = params
    x = jnp.transpose(x_ncdhw, (0, 2, 3, 4, 1))                 # -> NDHWC
    h1 = conv_bn_relu_layer(x, w1, b1, g1, be1, out_dtype=jnp.bfloat16)
    h2 = conv_bn_relu_layer(h1, w2, b2, g2, be2, out_dtype=jnp.float32)
    return jnp.transpose(h2, (0, 4, 1, 2, 3))                   # -> NCDHW


# ---------------------------------------------------------------------------
# Deterministic parameter initialization (PyTorch-shaped).
# ---------------------------------------------------------------------------
def init_params(key, in_ch, out_ch):
    def conv_layer(k, cin, cout):
        kw_, kb_ = jax.random.split(k)
        fan_in = cin * 27
        bound = 1.0 / jnp.sqrt(fan_in)
        w_oidhw = jax.random.uniform(kw_, (cout, cin, 3, 3, 3),
                                     jnp.float32, -bound, bound)
        b = jax.random.uniform(kb_, (cout,), jnp.float32, -bound, bound)
        # im2col weight layout: rows ordered (kd, kh, kw, cin) -> (27*Cin, Cout)
        w_mat = jnp.transpose(w_oidhw, (2, 3, 4, 1, 0)).reshape(27 * cin, cout)
        gamma = jnp.ones((cout,), jnp.float32)   # BN default init
        beta = jnp.zeros((cout,), jnp.float32)
        return (w_mat, b, gamma, beta), (w_oidhw, b)

    k1, k2 = jax.random.split(key)
    p1, raw1 = conv_layer(k1, in_ch, out_ch)
    p2, raw2 = conv_layer(k2, out_ch, out_ch)
    return (p1, p2), (raw1, raw2)


# ---------------------------------------------------------------------------
# Pure-JAX reference (correctness only).
# ---------------------------------------------------------------------------
def ref_in_conv(x_ncdhw, raw_params):
    def conv(x, w_oidhw, b):
        y = jax.lax.conv_general_dilated(
            x, w_oidhw, window_strides=(1, 1, 1),
            padding=((1, 1), (1, 1), (1, 1)),
            dimension_numbers=("NCDHW", "OIDHW", "NCDHW"))
        return y + b[None, :, None, None, None]

    def bn_relu(y):
        mean = jnp.mean(y, axis=(0, 2, 3, 4), keepdims=True)
        var = jnp.mean((y - mean) ** 2, axis=(0, 2, 3, 4), keepdims=True)
        y = (y - mean) / jnp.sqrt(var + 1e-5)    # gamma=1, beta=0
        return jnp.maximum(y, 0.0)

    (w1, b1), (w2, b2) = raw_params
    y = bn_relu(conv(x_ncdhw, w1, b1))
    y = bn_relu(conv(y, w2, b2))
    return y


if __name__ == "__main__":
    key = jax.random.PRNGKey(0)
    kx, kparam = jax.random.split(key)

    N, in_ch, out_ch, D, H, W = 2, 4, 8, 8, 8, 8
    x = jax.random.normal(kx, (N, in_ch, D, H, W), jnp.float32)   # NCDHW

    params, raw_params = init_params(kparam, in_ch, out_ch)

    fwd = jax.jit(in_conv_forward)
    out = jax.block_until_ready(fwd(x, params))
    assert out.shape == (N, out_ch, D, H, W), out.shape

    ref = jax.block_until_ready(ref_in_conv(x, raw_params))
    max_err = float(jnp.max(jnp.abs(out - ref)))
    assert jnp.allclose(out, ref, rtol=5e-2, atol=5e-2), max_err

    print("KERNEL_OK")
</pallas_src>

<mosaic_0001>
module attributes {stable_mosaic.version = 11 : i64} {
  func.func @conv_stats_kernel(%arg0: i32, %arg1: memref<512x128xbf16, #tpu.memory_space<vmem>>, %arg2: memref<128x128xbf16, #tpu.memory_space<vmem>>, %arg3: memref<1x128xf32, #tpu.memory_space<vmem>>, %arg4: memref<512x128xf32, #tpu.memory_space<vmem>>, %arg5: memref<1x2x128xf32, #tpu.memory_space<vmem>>) attributes {dimension_semantics = [#tpu.dimension_semantics<parallel>], iteration_bounds = array<i64: 2>, scalar_prefetch = 0 : i64, scratch_operands = 0 : i64, tpu.core_type = #tpu.core_type<tc>, window_params = [{transform_indices = @transform_0, window_bounds = array<i64: 512, 128>}, {pipeline_mode = #tpu.pipeline_mode<synchronous>, transform_indices = @transform_1, window_bounds = array<i64: 128, 128>}, {pipeline_mode = #tpu.pipeline_mode<synchronous>, transform_indices = @transform_2, window_bounds = array<i64: 1, 128>}, {transform_indices = @transform_3, window_bounds = array<i64: 512, 128>}, {transform_indices = @transform_4, window_bounds = array<i64: 1, 2, 128>}]} {
    %c0 = arith.constant 0 : index
    %c0_0 = arith.constant 0 : index
    %0 = vector.load %arg1[%c0, %c0_0] : memref<512x128xbf16, #tpu.memory_space<vmem>>, vector<512x128xbf16>
    %c0_1 = arith.constant 0 : index
    %c0_2 = arith.constant 0 : index
    %1 = vector.load %arg2[%c0_1, %c0_2] : memref<128x128xbf16, #tpu.memory_space<vmem>>, vector<128x128xbf16>
    %cst = arith.constant dense<0.000000e+00> : vector<512x128xf32>
    %2 = tpu.matmul %0, %1, %cst {dimension_numbers = #tpu.dot_dimension_numbers<[1], [0], [0], [1], [0, 0, 1, 1], [], []>} : vector<512x128xbf16>, vector<128x128xbf16>, vector<512x128xf32> -> vector<512x128xf32>
    %c0_3 = arith.constant 0 : index
    %c0_4 = arith.constant 0 : index
    %3 = vector.load %arg3[%c0_3, %c0_4] : memref<1x128xf32, #tpu.memory_space<vmem>>, vector<1x128xf32>
    %4 = vector.broadcast %3 : vector<1x128xf32> to vector<512x128xf32>
    %5 = arith.addf %2, %4 : vector<512x128xf32>
    %c0_5 = arith.constant 0 : index
    %c0_6 = arith.constant 0 : index
    %6 = vector.load %arg4[%c0_5, %c0_6] : memref<512x128xf32, #tpu.memory_space<vmem>>, vector<512x128xf32>
    tpu.vector_store %arg4[%c0_5, %c0_6], %5 {strides = array<i32>} : memref<512x128xf32, #tpu.memory_space<vmem>>, vector<512x128xf32>,
    %c512_i32 = arith.constant 512 : i32
    %7 = arith.muli %arg0, %c512_i32 : i32
    %8 = tpu.iota {dimensions = array<i32: 0>} : vector<512x1xi32>
    %9 = vector.broadcast %7 : i32 to vector<512x1xi32>
    %10 = arith.addi %9, %8 : vector<512x1xi32>
    %c1024_i32 = arith.constant 1024 : i32
    %11 = vector.broadcast %c1024_i32 : i32 to vector<512x1xi32>
    %12 = arith.cmpi slt, %10, %11 : vector<512x1xi32>
    %13 = arith.extui %12 : vector<512x1xi1> to vector<512x1xi32>
    %14 = arith.sitofp %13 : vector<512x1xi32> to vector<512x1xf32>
    %15 = vector.broadcast %14 : vector<512x1xf32> to vector<512x128xf32>
    %16 = arith.mulf %5, %15 : vector<512x128xf32>
    %cst_7 = arith.constant dense<0.000000e+00> : vector<128xf32>
    %17 = vector.multi_reduction <add>, %16, %cst_7 [0] : vector<512x128xf32> to vector<128xf32>
    %18 = vector.shape_cast %17 : vector<128xf32> to vector<1x128xf32>
    %19 = arith.mulf %16, %5 : vector<512x128xf32>
    %cst_8 = arith.constant dense<0.000000e+00> : vector<128xf32>
    %20 = vector.multi_reduction <add>, %19, %cst_8 [0] : vector<512x128xf32> to vector<128xf32>
    %21 = vector.shape_cast %20 : vector<128xf32> to vector<1x128xf32>
    %22 = tpu.concatenate %18, %21 in 0 : vector<1x128xf32>, vector<1x128xf32> -> vector<2x128xf32>
    %c0_9 = arith.constant 0 : index
    %c0_10 = arith.constant 0 : index
    %c0_11 = arith.constant 0 : index
    %23 = vector.load %arg5[%c0_9, %c0_10, %c0_11] : memref<1x2x128xf32, #tpu.memory_space<vmem>>, vector<1x2x128xf32>
    %24 = vector.shape_cast %23 : vector<1x2x128xf32> to vector<2x128xf32>
    %25 = vector.shape_cast %22 : vector<2x128xf32> to vector<1x2x128xf32>
    tpu.vector_store %arg5[%c0_9, %c0_10, %c0_11], %25 {strides = array<i32>} : memref<1x2x128xf32, #tpu.memory_space<vmem>>, vector<1x2x128xf32>,
    return
  }
  func.func @transform_0(%arg0: i32) -> (i32, i32) {
    %c0_i32 = arith.constant 0 : i32
    %c0_i32_0 = arith.constant 0 : i32
    return %arg0, %c0_i32 : i32, i32
  }
  func.func @transform_1(%arg0: i32) -> (i32, i32) {
    %c0_i32 = arith.constant 0 : i32
    %c0_i32_0 = arith.constant 0 : i32
    %c0_i32_1 = arith.constant 0 : i32
    return %c0_i32, %c0_i32_0 : i32, i32
  }
  func.func @transform_2(%arg0: i32) -> (i32, i32) {
    %c0_i32 = arith.constant 0 : i32
    %c0_i32_0 = arith.constant 0 : i32
    %c0_i32_1 = arith.constant 0 : i32
    return %c0_i32, %c0_i32_0 : i32, i32
  }
  func.func @transform_3(%arg0: i32) -> (i32, i32) {
    %c0_i32 = arith.constant 0 : i32
    %c0_i32_0 = arith.constant 0 : i32
    return %arg0, %c0_i32 : i32, i32
  }
  func.func @transform_4(%arg0: i32) -> (i32, i32, i32) {
    %c0_i32 = arith.constant 0 : i32
    %c0_i32_0 = arith.constant 0 : i32
    %c0_i32_1 = arith.constant 0 : i32
    return %arg0, %c0_i32, %c0_i32_0 : i32, i32, i32
  }
}

module attributes {stable_mosaic.version = 11 : i64} {
  func.func @bn_relu_kernel(%arg0: i32, %arg1: memref<512x128xf32, #tpu.memory_space<vmem>>, %arg2: memref<1x128xf32, #tpu.memory_space<vmem>>, %arg3: memref<1x128xf32, #tpu.memory_space<vmem>>, %arg4: memref<512x128xbf16, #tpu.memory_space<vmem>>) attributes {dimension_semantics = [#tpu.dimension_semantics<parallel>], iteration_bounds = array<i64: 2>, scalar_prefetch = 0 : i64, scratch_operands = 0 : i64, tpu.core_type = #tpu.core_type<tc>, window_params = [{transform_indices = @transform_0, window_bounds = array<i64: 512, 128>}, {pipeline_mode = #tpu.pipeline_mode<synchronous>, transform_indices = @transform_1, window_bounds = array<i64: 1, 128>}, {pipeline_mode = #tpu.pipeline_mode<synchronous>, transform_indices = @transform_2, window_bounds = array<i64: 1, 128>}, {transform_indices = @transform_3, window_bounds = array<i64: 512, 128>}]} {
    %c0 = arith.constant 0 : index
    %c0_0 = arith.constant 0 : index
    %0 = vector.load %arg1[%c0, %c0_0] : memref<512x128xf32, #tpu.memory_space<vmem>>, vector<512x128xf32>
    %c0_1 = arith.constant 0 : index
    %c0_2 = arith.constant 0 : index
    %1 = vector.load %arg2[%c0_1, %c0_2] : memref<1x128xf32, #tpu.memory_space<vmem>>, vector<1x128xf32>
    %2 = vector.broadcast %1 : vector<1x128xf32> to vector<512x128xf32>
    %3 = arith.mulf %0, %2 : vector<512x128xf32>
    %c0_3 = arith.constant 0 : index
    %c0_4 = arith.constant 0 : index
    %4 = vector.load %arg3[%c0_3, %c0_4] : memref<1x128xf32, #tpu.memory_space<vmem>>, vector<1x128xf32>
    %5 = vector.broadcast %4 : vector<1x128xf32> to vector<512x128xf32>
    %6 = arith.addf %3, %5 : vector<512x128xf32>
    %cst = arith.constant 0.000000e+00 : f32
    %7 = vector.broadcast %cst : f32 to vector<512x128xf32>
    %8 = arith.maximumf %6, %7 : vector<512x128xf32>
    %9 = arith.truncf %8 : vector<512x128xf32> to vector<512x128xbf16>
    %c0_5 = arith.constant 0 : index
    %c0_6 = arith.constant 0 : index
    %10 = vector.load %arg4[%c0_5, %c0_6] : memref<512x128xbf16, #tpu.memory_space<vmem>>, vector<512x128xbf16>
    tpu.vector_store %arg4[%c0_5, %c0_6], %9 {strides = array<i32>} : memref<512x128xbf16, #tpu.memory_space<vmem>>, vector<512x128xbf16>,
    return
  }
  func.func @transform_0(%arg0: i32) -> (i32, i32) {
    %c0_i32 = arith.constant 0 : i32
    %c0_i32_0 = arith.constant 0 : i32
    return %arg0, %c0_i32 : i32, i32
  }
  func.func @transform_1(%arg0: i32) -> (i32, i32) {
    %c0_i32 = arith.constant 0 : i32
    %c0_i32_0 = arith.constant 0 : i32
    %c0_i32_1 = arith.constant 0 : i32
    return %c0_i32, %c0_i32_0 : i32, i32
  }
  func.func @transform_2(%arg0: i32) -> (i32, i32) {
    %c0_i32 = arith.constant 0 : i32
    %c0_i32_0 = arith.constant 0 : i32
    %c0_i32_1 = arith.constant 0 : i32
    return %c0_i32, %c0_i32_0 : i32, i32
  }
  func.func @transform_3(%arg0: i32) -> (i32, i32) {
    %c0_i32 = arith.constant 0 : i32
    %c0_i32_0 = arith.constant 0 : i32
    return %arg0, %c0_i32 : i32, i32
  }
}

module attributes {stable_mosaic.version = 11 : i64} {
  func.func @conv_stats_kernel(%arg0: i32, %arg1: memref<512x256xbf16, #tpu.memory_space<vmem>>, %arg2: memref<256x128xbf16, #tpu.memory_space<vmem>>, %arg3: memref<1x128xf32, #tpu.memory_space<vmem>>, %arg4: memref<512x128xf32, #tpu.memory_space<vmem>>, %arg5: memref<1x2x128xf32, #tpu.memory_space<vmem>>) attributes {dimension_semantics = [#tpu.dimension_semantics<parallel>], iteration_bounds = array<i64: 2>, scalar_prefetch = 0 : i64, scratch_operands = 0 : i64, tpu.core_type = #tpu.core_type<tc>, window_params = [{transform_indices = @transform_0, window_bounds = array<i64: 512, 256>}, {pipeline_mode = #tpu.pipeline_mode<synchronous>, transform_indices = @transform_1, window_bounds = array<i64: 256, 128>}, {pipeline_mode = #tpu.pipeline_mode<synchronous>, transform_indices = @transform_2, window_bounds = array<i64: 1, 128>}, {transform_indices = @transform_3, window_bounds = array<i64: 512, 128>}, {transform_indices = @transform_4, window_bounds = array<i64: 1, 2, 128>}]} {
    %c0 = arith.constant 0 : index
    %c0_0 = arith.constant 0 : index
    %0 = vector.load %arg1[%c0, %c0_0] : memref<512x256xbf16, #tpu.memory_space<vmem>>, vector<512x256xbf16>
    %c0_1 = arith.constant 0 : index
    %c0_2 = arith.constant 0 : index
    %1 = vector.load %arg2[%c0_1, %c0_2] : memref<256x128xbf16, #tpu.memory_space<vmem>>, vector<256x128xbf16>
    %cst = arith.constant dense<0.000000e+00> : vector<512x128xf32>
    %2 = tpu.matmul %0, %1, %cst {dimension_numbers = #tpu.dot_dimension_numbers<[1], [0], [0], [1], [0, 0, 1, 1], [], []>} : vector<512x256xbf16>, vector<256x128xbf16>, vector<512x128xf32> -> vector<512x128xf32>
    %c0_3 = arith.constant 0 : index
    %c0_4 = arith.constant 0 : index
    %3 = vector.load %arg3[%c0_3, %c0_4] : memref<1x128xf32, #tpu.memory_space<vmem>>, vector<1x128xf32>
    %4 = vector.broadcast %3 : vector<1x128xf32> to vector<512x128xf32>
    %5 = arith.addf %2, %4 : vector<512x128xf32>
    %c0_5 = arith.constant 0 : index
    %c0_6 = arith.constant 0 : index
    %6 = vector.load %arg4[%c0_5, %c0_6] : memref<512x128xf32, #tpu.memory_space<vmem>>, vector<512x128xf32>
    tpu.vector_store %arg4[%c0_5, %c0_6], %5 {strides = array<i32>} : memref<512x128xf32, #tpu.memory_space<vmem>>, vector<512x128xf32>,
    %c512_i32 = arith.constant 512 : i32
    %7 = arith.muli %arg0, %c512_i32 : i32
    %8 = tpu.iota {dimensions = array<i32: 0>} : vector<512x1xi32>
    %9 = vector.broadcast %7 : i32 to vector<512x1xi32>
    %10 = arith.addi %9, %8 : vector<512x1xi32>
    %c1024_i32 = arith.constant 1024 : i32
    %11 = vector.broadcast %c1024_i32 : i32 to vector<512x1xi32>
    %12 = arith.cmpi slt, %10, %11 : vector<512x1xi32>
    %13 = arith.extui %12 : vector<512x1xi1> to vector<512x1xi32>
    %14 = arith.sitofp %13 : vector<512x1xi32> to vector<512x1xf32>
    %15 = vector.broadcast %14 : vector<512x1xf32> to vector<512x128xf32>
    %16 = arith.mulf %5, %15 : vector<512x128xf32>
    %cst_7 = arith.constant dense<0.000000e+00> : vector<128xf32>
    %17 = vector.multi_reduction <add>, %16, %cst_7 [0] : vector<512x128xf32> to vector<128xf32>
    %18 = vector.shape_cast %17 : vector<128xf32> to vector<1x128xf32>
    %19 = arith.mulf %16, %5 : vector<512x128xf32>
    %cst_8 = arith.constant dense<0.000000e+00> : vector<128xf32>
    %20 = vector.multi_reduction <add>, %19, %cst_8 [0] : vector<512x128xf32> to vector<128xf32>
    %21 = vector.shape_cast %20 : vector<128xf32> to vector<1x128xf32>
    %22 = tpu.concatenate %18, %21 in 0 : vector<1x128xf32>, vector<1x128xf32> -> vector<2x128xf32>
    %c0_9 = arith.constant 0 : index
    %c0_10 = arith.constant 0 : index
    %c0_11 = arith.constant 0 : index
    %23 = vector.load %arg5[%c0_9, %c0_10, %c0_11] : memref<1x2x128xf32, #tpu.memory_space<vmem>>, vector<1x2x128xf32>
    %24 = vector.shape_cast %23 : vector<1x2x128xf32> to vector<2x128xf32>
    %25 = vector.shape_cast %22 : vector<2x128xf32> to vector<1x2x128xf32>
    tpu.vector_store %arg5[%c0_9, %c0_10, %c0_11], %25 {strides = array<i32>} : memref<1x2x128xf32, #tpu.memory_space<vmem>>, vector<1x2x128xf32>,
    return
  }
  func.func @transform_0(%arg0: i32) -> (i32, i32) {
    %c0_i32 = arith.constant 0 : i32
    %c0_i32_0 = arith.constant 0 : i32
    return %arg0, %c0_i32 : i32, i32
  }
  func.func @transform_1(%arg0: i32) -> (i32, i32) {
    %c0_i32 = arith.constant 0 : i32
    %c0_i32_0 = arith.constant 0 : i32
    %c0_i32_1 = arith.constant 0 : i32
    return %c0_i32, %c0_i32_0 : i32, i32
  }
  func.func @transform_2(%arg0: i32) -> (i32, i32) {
    %c0_i32 = arith.constant 0 : i32
    %c0_i32_0 = arith.constant 0 : i32
    %c0_i32_1 = arith.constant 0 : i32
    return %c0_i32, %c0_i32_0 : i32, i32
  }
  func.func @transform_3(%arg0: i32) -> (i32, i32) {
    %c0_i32 = arith.constant 0 : i32
    %c0_i32_0 = arith.constant 0 : i32
    return %arg0, %c0_i32 : i32, i32
  }
  func.func @transform_4(%arg0: i32) -> (i32, i32, i32) {
    %c0_i32 = arith.constant 0 : i32
    %c0_i32_0 = arith.constant 0 : i32
    %c0_i32_1 = arith.constant 0 : i32
    return %arg0, %c0_i32, %c0_i32_0 : i32, i32, i32
  }
}

module attributes {stable_mosaic.version = 11 : i64} {
  func.func @bn_relu_kernel(%arg0: i32, %arg1: memref<512x128xf32, #tpu.memory_space<vmem>>, %arg2: memref<1x128xf32, #tpu.memory_space<vmem>>, %arg3: memref<1x128xf32, #tpu.memory_space<vmem>>, %arg4: memref<512x128xf32, #tpu.memory_space<vmem>>) attributes {dimension_semantics = [#tpu.dimension_semantics<parallel>], iteration_bounds = array<i64: 2>, scalar_prefetch = 0 : i64, scratch_operands = 0 : i64, tpu.core_type = #tpu.core_type<tc>, window_params = [{transform_indices = @transform_0, window_bounds = array<i64: 512, 128>}, {pipeline_mode = #tpu.pipeline_mode<synchronous>, transform_indices = @transform_1, window_bounds = array<i64: 1, 128>}, {pipeline_mode = #tpu.pipeline_mode<synchronous>, transform_indices = @transform_2, window_bounds = array<i64: 1, 128>}, {transform_indices = @transform_3, window_bounds = array<i64: 512, 128>}]} {
    %c0 = arith.constant 0 : index
    %c0_0 = arith.constant 0 : index
    %0 = vector.load %arg1[%c0, %c0_0] : memref<512x128xf32, #tpu.memory_space<vmem>>, vector<512x128xf32>
    %c0_1 = arith.constant 0 : index
    %c0_2 = arith.constant 0 : index
    %1 = vector.load %arg2[%c0_1, %c0_2] : memref<1x128xf32, #tpu.memory_space<vmem>>, vector<1x128xf32>
    %2 = vector.broadcast %1 : vector<1x128xf32> to vector<512x128xf32>
    %3 = arith.mulf %0, %2 : vector<512x128xf32>
    %c0_3 = arith.constant 0 : index
    %c0_4 = arith.constant 0 : index
    %4 = vector.load %arg3[%c0_3, %c0_4] : memref<1x128xf32, #tpu.memory_space<vmem>>, vector<1x128xf32>
    %5 = vector.broadcast %4 : vector<1x128xf32> to vector<512x128xf32>
    %6 = arith.addf %3, %5 : vector<512x128xf32>
    %cst = arith.constant 0.000000e+00 : f32
    %7 = vector.broadcast %cst : f32 to vector<512x128xf32>
    %8 = arith.maximumf %6, %7 : vector<512x128xf32>
    %c0_5 = arith.constant 0 : index
    %c0_6 = arith.constant 0 : index
    %9 = vector.load %arg4[%c0_5, %c0_6] : memref<512x128xf32, #tpu.memory_space<vmem>>, vector<512x128xf32>
    tpu.vector_store %arg4[%c0_5, %c0_6], %8 {strides = array<i32>} : memref<512x128xf32, #tpu.memory_space<vmem>>, vector<512x128xf32>,
    return
  }
  func.func @transform_0(%arg0: i32) -> (i32, i32) {
    %c0_i32 = arith.constant 0 : i32
    %c0_i32_0 = arith.constant 0 : i32
    return %arg0, %c0_i32 : i32, i32
  }
  func.func @transform_1(%arg0: i32) -> (i32, i32) {
    %c0_i32 = arith.constant 0 : i32
    %c0_i32_0 = arith.constant 0 : i32
    %c0_i32_1 = arith.constant 0 : i32
    return %c0_i32, %c0_i32_0 : i32, i32
  }
  func.func @transform_2(%arg0: i32) -> (i32, i32) {
    %c0_i32 = arith.constant 0 : i32
    %c0_i32_0 = arith.constant 0 : i32
    %c0_i32_1 = arith.constant 0 : i32
    return %c0_i32, %c0_i32_0 : i32, i32
  }
  func.func @transform_3(%arg0: i32) -> (i32, i32) {
    %c0_i32 = arith.constant 0 : i32
    %c0_i32_0 = arith.constant 0 : i32
    return %arg0, %c0_i32 : i32, i32
  }
}

</mosaic_0001>

<bundles_post_ra>
// kernel: in_conv_forward.4
= control target key start
LH: loop header
LB: loop body
LE: loop exit
PB: predicated region body
PF: predicated region fallthrough
CT: control target
= control target key end

     0   :  { %s1909_s15 = smov 0   ;;  %s2635_s0 = inlined_call_operand.vmem [shape: bf16[1024,128], index: 0, kind: input, shape index: {}]   ;;  %s2636_s1 = inlined_call_operand.vmem [shape: bf16[128,128], index: 1, kind: input, shape index: {}]   ;;  %s2637_s2 = inlined_call_operand.vmem [shape: f32[1,128], index: 2, kind: input, shape index: {}]   ;;  %s2638_s3 = inlined_call_operand.vmem [shape: f32[1024,128], index: 3, kind: output, shape index: {0}]   ;;  %s2639_s4 = inlined_call_operand.vmem [shape: f32[2,2,128], index: 4, kind: output, shape index: {1}]  }
   0x1 LB: > { %s1915_s16 = sadd.s32 4294967295, %s1881_s15   ;;  %p1576_p0 = scmp.ge.s32.totalorder %s1881_s15, 1  ;;  %s1881_s15 = sphi %s1909_s15, %s15_s15  }
   0x2   : > { %p166_p1 = scmp.lt.s32.totalorder %s1881_s15, 3 }
   0x4   : > { %p167_p2 = pnand %p1576_p0, %p166_p1 }
   0x6   : > { %170 = sbr.rel (%p167_p2) target bundleno = 408 (0x198), region = 32 }
   0xd   : > { %v1835_v0 = vld [vmem:[%s2636_s1] sm:$0xff]   ;;  %s1577_s19 = sshll.u32 %s1915_s16, 6  ;;  %v1836_v1 = vld [vmem:[%s2636_s1 + $0x8] sm:$0xff]   ;;  %v1837_v2 = vld [vmem:[%s2636_s1 + $0x10] sm:$0xff]   ;;  %v894_v40 = vlaneseq  ;;  %s1623_s12 = sshll.u32 %s1915_s16, 9  ;;  %v1883_v61 = vmov 0.0  }
   0xe   : > { %p197_p3 = scmp.lt.s32.totalorder %s1577_s19, 127  ;;  %1730 = vmatprep.subr.bf16.mxu0 %v1835_v0  ;;  %1810 = vmatprep.subr.bf16.mxu1 %v1835_v0  ;;  %v1838_v3 = vld [vmem:[%s2636_s1 + $0x18] sm:$0xff]   ;;  %v1839_v5 = vld [vmem:[%s2636_s1 + $0x20] sm:$0xff]   ;;  %v1840_v6 = vld [vmem:[%s2636_s1 + $0x28] sm:$0xff]   ;;  %v1988_v43 = vstv %s1623_s12  ;;  %p208_p4 = scmp.lt.s32.totalorder %s1915_s16, 1 }
   0xf   : > { %1731 = vmatpush3.bf16.msra.mxu0 %v1835_v0  ;;  %1818 = vmatpush3.bf16.msra.mxu1 %v1835_v0  ;;  %v1841_v7 = vld [vmem:[%s2636_s1 + $0x30] sm:$0xff]   ;;  %v1842_v8 = vld [vmem:[%s2636_s1 + $0x38] sm:$0xff]   ;;  %v1984_v41 = vshrl.u32 %v894_v40, 7 }
  0x10   : > { %s2649_s19 = smov (!%p197_p3, %s1577_s19), 127  ;;  %1732 = vmatprep.subr.bf16.mxu0 %v1836_v1  ;;  %1811 = vmatprep.subr.bf16.mxu1 %v1836_v1  ;;  %s2651_s16 = smov (!%p208_p4, %s1915_s16), 1 }
  0x11   : > { %s1578_s24 = sshll.u32 %s2649_s19, 2  ;;  %v897_v42 = vadd.s32 16, %v1984_v41  ;;  %v898_v44 = vadd.s32 24, %v1984_v41  ;;  %v960_v46 = vadd.s32 %v1988_v43, %v1984_v41  ;;  %v896_v47 = vadd.s32 8, %v1984_v41  ;;  %s1580_s13 = sshll.u32 %s2649_s19, 3 }
  0x12   : > { %s1935_s27 = scalar_lea.vmem %s2635_s0, %s1578_s24  ;;  %v901_v48 = vadd.s32 48, %v1984_v41  ;;  %v899_v49 = vadd.s32 32, %v1984_v41  ;;  %v902_v51 = vadd.s32 56, %v1984_v41  ;;  %v900_v52 = vadd.s32 40, %v1984_v41  ;;  %s2099_s20 = scalar_lea.vmem %s2638_s3, %s1580_s13 }
  0x13   : > { %1733 = vmatpush3.bf16.msra.mxu0 %v1836_v1  ;;  %1819 = vmatpush3.bf16.msra.mxu1 %v1836_v1  ;;  %v1843_v4 = vld [vmem:[%s1935_s27] sm:$0xff]   ;;  %v1844_v10 = vld [vmem:[%s1935_s27 + $0x8] sm:$0xff]   ;;  %v1845_v11 = vld [vmem:[%s1935_s27 + $0x10] sm:$0xff]   ;;  %v962_v45 = vadd.s32 %v1988_v43, %v897_v42  ;;  %v963_v50 = vadd.s32 %v1988_v43, %v898_v44  ;;  %vm1024_vm1 = vcmp.lt.s32.totalorder %v960_v46, 1024  ;;  %v961_v53 = vadd.s32 %v1988_v43, %v896_v47  ;;  %s1581_s21 = sshll.u32 %s2651_s16, 1 }
  0x14   : > { %1734 = vmatprep.subr.bf16.mxu0 %v1837_v2  ;;  %1812 = vmatprep.subr.bf16.mxu1 %v1837_v2  ;;  %v1859_v9 = vld [vmem:[%s1935_s27 + $0x80] sm:$0xff]   ;;  %v1860_v12 = vld [vmem:[%s1935_s27 + $0x88] sm:$0xff]   ;;  %v1861_v13 = vld [vmem:[%s1935_s27 + $0x90] sm:$0xff]   ;;  %v966_v54 = vadd.s32 %v1988_v43, %v901_v48  ;;  %v964_v55 = vadd.s32 %v1988_v43, %v899_v49  ;;  %v967_v56 = vadd.s32 %v1988_v43, %v902_v51  ;;  %v905_v58 = vadd.s32 80, %v1984_v41  ;;  %s211_s24 = scalar_lea.vmem %s2639_s4, %s1581_s21 }
  0x15   : > { %1746 = vmatprep.mubr.bf16.mxu0 %v1843_v4  ;;  %1778 = vmatprep.mubr.bf16.mxu1 %v1859_v9  ;;  %v1846_v14 = vld [vmem:[%s1935_s27 + $0x18] sm:$0xff]   ;;  %v1847_v15 = vld [vmem:[%s1935_s27 + $0x20] sm:$0xff]   ;;  %v1848_v18 = vld [vmem:[%s1935_s27 + $0x28] sm:$0xff]   ;;  %vm1026_vm0 = vcmp.lt.s32.totalorder %v962_v45, 1024  ;;  %vm1027_vm2 = vcmp.lt.s32.totalorder %v963_v50, 1024  ;;  %v965_v57 = vadd.s32 %v1988_v43, %v900_v52  ;;  %v903_v59 = vadd.s32 64, %v1984_v41 }
  0x16   : > { %v1862_v16 = vld [vmem:[%s1935_s27 + $0x98] sm:$0xff]   ;;  %v1863_v17 = vld [vmem:[%s1935_s27 + $0xa0] sm:$0xff]   ;;  %v1864_v19 = vld [vmem:[%s1935_s27 + $0xa8] sm:$0xff]   ;;  %v906_v60 = vadd.s32 88, %v1984_v41  ;;  %v2009_v62 = vsel %vm1026_vm0, 1.0, %v1883_v61  ;;  %v2012_v63 = vsel %vm1024_vm1, 1.0, %v1883_v61  ;;  %v970_v1 = vadd.s32 %v1988_v43, %v905_v58 }
  0x17   : > { %1735 = vmatpush3.bf16.msra.mxu0 %v1837_v2  ;;  %1820 = vmatpush3.bf16.msra.mxu1 %v1837_v2  ;;  %v1849_v20 = vld [vmem:[%s1935_s27 + $0x30] sm:$0xff]   ;;  %v1850_v22 = vld [vmem:[%s1935_s27 + $0x38] sm:$0xff]   ;;  %v1851_v24 = vld [vmem:[%s1935_s27 + $0x40] sm:$0xff]   ;;  %v2015_v0 = vsel %vm1027_vm2, 1.0, %v1883_v61  ;;  %vm1025_vm3 = vcmp.lt.s32.totalorder %v961_v53, 1024  ;;  %vm1030_vm4 = vcmp.lt.s32.totalorder %v966_v54, 1024 }
  0x18   : > { %1736 = vmatprep.subr.bf16.mxu0 %v1838_v3  ;;  %1813 = vmatprep.subr.bf16.mxu1 %v1838_v3  ;;  %v1865_v21 = vld [vmem:[%s1935_s27 + $0xb0] sm:$0xff]   ;;  %v1866_v23 = vld [vmem:[%s1935_s27 + $0xb8] sm:$0xff]   ;;  %v1867_v25 = vld [vmem:[%s1935_s27 + $0xc0] sm:$0xff]   ;;  %vm1028_vm5 = vcmp.lt.s32.totalorder %v964_v55, 1024  ;;  %vm1031_vm6 = vcmp.lt.s32.totalorder %v967_v56, 1024  ;;  %vm1029_vm7 = vcmp.lt.s32.totalorder %v965_v57, 1024  ;;  %v971_v4 = vadd.s32 %v1988_v43, %v906_v60 }
  0x19   : > { %v1852_v26 = vld [vmem:[%s1935_s27 + $0x48] sm:$0xff]   ;;  %v1853_v28 = vld [vmem:[%s1935_s27 + $0x50] sm:$0xff]   ;;  %v1854_v30 = vld [vmem:[%s1935_s27 + $0x58] sm:$0xff]   ;;  %v904_v2 = vadd.s32 72, %v1984_v41  ;;  %v908_v9 = vadd.s32 104, %v1984_v41  ;;  %vm1034_vm8 = vcmp.lt.s32.totalorder %v970_v1, 1024 }
  0x1a   : > { %v1868_v27 = vld [vmem:[%s1935_s27 + $0xc8] sm:$0xff]   ;;  %v1869_v29 = vld [vmem:[%s1935_s27 + $0xd0] sm:$0xff]   ;;  %v1870_v31 = vld [vmem:[%s1935_s27 + $0xd8] sm:$0xff]   ;;  %vm1035_vm10 = vcmp.lt.s32.totalorder %v971_v4, 1024  ;;  %v921_v50 = vadd.s32 208, %v1984_v41  ;;  %v932_v56 = vadd.s32 296, %v1984_v41 }
  0x1b   : > { %1737 = vmatpush3.bf16.msra.mxu0 %v1838_v3  ;;  %1821 = vmatpush3.bf16.msra.mxu1 %v1838_v3  ;;  %v1855_v32 = vld [vmem:[%s1935_s27 + $0x60] sm:$0xff]   ;;  %v1856_v34 = vld [vmem:[%s1935_s27 + $0x68] sm:$0xff]   ;;  %v1857_v36 = vld [vmem:[%s1935_s27 + $0x70] sm:$0xff]   ;;  %v968_v3 = vadd.s32 %v1988_v43, %v903_v59 }
  0x1c   : > { %1738 = vmatprep.subr.bf16.mxu0 %v1839_v5  ;;  %1814 = vmatprep.subr.bf16.mxu1 %v1839_v5  ;;  %v1871_v33 = vld [vmem:[%s1935_s27 + $0xe0] sm:$0xff]   ;;  %v1872_v35 = vld [vmem:[%s1935_s27 + $0xe8] sm:$0xff]   ;;  %v1873_v37 = vld [vmem:[%s1935_s27 + $0xf0] sm:$0xff]  }
  0x1d   : > { %v1858_v38 = vld [vmem:[%s1935_s27 + $0x78] sm:$0xff]   ;;  %vm1032_vm9 = vcmp.lt.s32.totalorder %v968_v3, 1024  ;;  %v919_v3 = vadd.s32 192, %v1984_v41 }
  0x1e   : > { %v1874_v39 = vld [vmem:[%s1935_s27 + $0xf8] sm:$0xff]  }
  0x1f   : > { %1739 = vmatpush3.bf16.msra.mxu0 %v1839_v5  ;;  %1822 = vmatpush3.bf16.msra.mxu1 %v1839_v5  ;;  %v909_v5 = vadd.s32 112, %v1984_v41 }
  0x20   : > { %1740 = vmatprep.subr.bf16.mxu0 %v1840_v6  ;;  %1815 = vmatprep.subr.bf16.mxu1 %v1840_v6 }
  0x23   : > { %1741 = vmatpush3.bf16.msra.mxu0 %v1840_v6  ;;  %1823 = vmatpush3.bf16.msra.mxu1 %v1840_v6  ;;  %v907_v6 = vadd.s32 96, %v1984_v41 }
  0x24   : > { %1742 = vmatprep.subr.bf16.mxu0 %v1841_v7  ;;  %1816 = vmatprep.subr.bf16.mxu1 %v1841_v7 }
  0x27   : > { %1743 = vmatpush3.bf16.msra.mxu0 %v1841_v7  ;;  %1824 = vmatpush3.bf16.msra.mxu1 %v1841_v7  ;;  %v2024_v7 = vsel %vm1025_vm3, 1.0, %v1883_v61 }
  0x28   : > { %1744 = vmatprep.subr.bf16.mxu0 %v1842_v8  ;;  %1817 = vmatprep.subr.bf16.mxu1 %v1842_v8 }
  0x2b   : > { %1745 = vmatpush3.bf16.msra.mxu0 %v1842_v8  ;;  %1825 = vmatpush3.bf16.msra.mxu1 %v1842_v8  ;;  %v910_v8 = vadd.s32 120, %v1984_v41 }
  0x2e   : > { %1747 = vmatmul.mubr.bf16.vlgmr.msra.gmra.mrb[0].mxu0 %v1844_v10  ;;  %1779 = vmatmul.mubr.bf16.vlgmr.msra.gmra.mrb[0].mxu1 %v1860_v12  ;;  %v913_v10 = vadd.s32 144, %v1984_v41  ;;  %v2033_v12 = vsel %vm1028_vm5, 1.0, %v1883_v61 }
  0x2f   : > { %1750 = vmatprep.mubr.bf16.mxu0 %v1845_v11  ;;  %1782 = vmatprep.mubr.bf16.mxu1 %v1861_v13  ;;  %v2030_v11 = vsel %vm1030_vm4, 1.0, %v1883_v61  ;;  %v911_v13 = vadd.s32 128, %v1984_v41 }
  0x36   : > { %1751 = vmatmul.mubr.bf16.gmra.mrb[4].mxu0 %v1846_v14  ;;  %1783 = vmatmul.mubr.bf16.gmra.mrb[4].mxu1 %v1862_v16  ;;  %v914_v14 = vadd.s32 152, %v1984_v41  ;;  %v2043_v16 = vsel %vm1029_vm7, 1.0, %v1883_v61 }
  0x37   : > { %1754 = vmatprep.mubr.bf16.mxu0 %v1847_v15  ;;  %1786 = vmatprep.mubr.bf16.mxu1 %v1863_v17  ;;  %v2039_v15 = vsel %vm1031_vm6, 1.0, %v1883_v61  ;;  %v969_v17 = vadd.s32 %v1988_v43, %v904_v2 }
  0x39   : > { %vm1033_vm11 = vcmp.lt.s32.totalorder %v969_v17, 1024  ;;  %v997_v17 = vadd.s32 %v1988_v43, %v932_v56 }
  0x3e   : > { %1755 = vmatmul.mubr.bf16.gmra.mrb[8].mxu0 %v1848_v18  ;;  %1787 = vmatmul.mubr.bf16.gmra.mrb[8].mxu1 %v1864_v19  ;;  %v974_v18 = vadd.s32 %v1988_v43, %v909_v5  ;;  %v972_v19 = vadd.s32 %v1988_v43, %v907_v6 }
  0x3f   : > { %1758 = vmatprep.mubr.bf16.mxu0 %v1849_v20  ;;  %1790 = vmatprep.mubr.bf16.mxu1 %v1865_v21  ;;  %v975_v20 = vadd.s32 %v1988_v43, %v910_v8  ;;  %v973_v21 = vadd.s32 %v1988_v43, %v908_v9  ;;  %v2129_v9 = vadd.s32 %v1988_v43, %v921_v50 }
  0x40   : > { %vm1038_vm12 = vcmp.lt.s32.totalorder %v974_v18, 1024  ;;  %vm1036_vm13 = vcmp.lt.s32.totalorder %v972_v19, 1024 }
  0x41   : > { %vm1039_vm14 = vcmp.lt.s32.totalorder %v975_v20, 1024  ;;  %vm1037_vm15 = vcmp.lt.s32.totalorder %v973_v21, 1024 }
  0x42   : > { %v2087_v42 = vsel %vm1039_vm14, 1.0, %v1883_v61  ;;  %v2090_v44 = vsel %vm1037_vm15, 1.0, %v1883_v61 }
  0x46   : > { %1759 = vmatmul.mubr.bf16.gmra.mrb[12].mxu0 %v1850_v22  ;;  %1791 = vmatmul.mubr.bf16.gmra.mrb[12].mxu1 %v1866_v23  ;;  %v978_v22 = vadd.s32 %v1988_v43, %v913_v10  ;;  %v912_v23 = vadd.s32 136, %v1984_v41 }
  0x47   : > { %1762 = vmatprep.mubr.bf16.mxu0 %v1851_v24  ;;  %1794 = vmatprep.mubr.bf16.mxu1 %v1867_v25  ;;  %v2053_v24 = vsel %vm1034_vm8, 1.0, %v1883_v61  ;;  %v976_v25 = vadd.s32 %v1988_v43, %v911_v13  ;;  %vm1050_vm8 = vcmp.lt.s32.totalorder %v2129_v9, 1024 }
  0x48   : > { %vm1042_vm0 = vcmp.lt.s32.totalorder %v978_v22, 1024  ;;  %v2167_v22 = vadd.s32 %v1988_v43, %v919_v3 }
  0x49   : > { %vm1040_vm1 = vcmp.lt.s32.totalorder %v976_v25, 1024  ;;  %v2093_v45 = vsel %vm1042_vm0, 1.0, %v1883_v61 }
  0x4a   : > { %v2102_v48 = vsel %vm1040_vm1, 1.0, %v1883_v61 }
  0x4e   : > { %1763 = vmatmul.mubr.bf16.gmra.mrb[16].mxu0 %v1852_v26  ;;  %1795 = vmatmul.mubr.bf16.gmra.mrb[16].mxu1 %v1868_v27  ;;  %v979_v26 = vadd.s32 %v1988_v43, %v914_v14  ;;  %v917_v27 = vadd.s32 176, %v1984_v41 }
  0x4f   : > { %1766 = vmatprep.mubr.bf16.mxu0 %v1853_v28  ;;  %1798 = vmatprep.mubr.bf16.mxu1 %v1869_v29  ;;  %v2059_v28 = vsel %vm1032_vm9, 1.0, %v1883_v61  ;;  %v915_v29 = vadd.s32 160, %v1984_v41  ;;  %vm1061_vm9 = vcmp.lt.s32.totalorder %v997_v17, 1024 }
  0x50   : > { %vm1043_vm2 = vcmp.lt.s32.totalorder %v979_v26, 1024 }
  0x51   : > { %v2105_v49 = vsel %vm1043_vm2, 1.0, %v1883_v61 }
  0x56   : > { %1767 = vmatmul.mubr.bf16.gmra.mrb[20].mxu0 %v1854_v30  ;;  %1799 = vmatmul.mubr.bf16.gmra.mrb[20].mxu1 %v1870_v31  ;;  %v918_v30 = vadd.s32 184, %v1984_v41  ;;  %v2064_v31 = vsel %vm1035_vm10, 1.0, %v1883_v61  ;;  %vm1048_vm10 = vcmp.lt.s32.totalorder %v2167_v22, 1024 }
  0x57   : > { %1770 = vmatprep.mubr.bf16.mxu0 %v1855_v32  ;;  %1802 = vmatprep.mubr.bf16.mxu1 %v1871_v33  ;;  %v916_v32 = vadd.s32 168, %v1984_v41  ;;  %v977_v33 = vadd.s32 %v1988_v43, %v912_v23  ;;  %v936_v23 = vadd.s32 328, %v1984_v41 }
  0x58   : > { %v983_v40 = vadd.s32 %v1988_v43, %v918_v30 }
  0x59   : > { %v981_v46 = vadd.s32 %v1988_v43, %v916_v32  ;;  %vm1041_vm3 = vcmp.lt.s32.totalorder %v977_v33, 1024 }
  0x5a   : > { %vm1047_vm6 = vcmp.lt.s32.totalorder %v983_v40, 1024  ;;  %v2140_v14 = vsel %vm1041_vm3, 1.0, %v1883_v61 }
  0x5b   : > { %vm1045_vm7 = vcmp.lt.s32.totalorder %v981_v46, 1024 }
  0x5c   : > { %v2161_v20 = vsel %vm1045_vm7, 1.0, %v1883_v61 }
  0x5e   : > { %1771 = vmatmul.mubr.bf16.gmra.mrb[24].mxu0 %v1856_v34  ;;  %1803 = vmatmul.mubr.bf16.gmra.mrb[24].mxu1 %v1872_v35  ;;  %v2070_v34 = vsel %vm1033_vm11, 1.0, %v1883_v61  ;;  %v982_v35 = vadd.s32 %v1988_v43, %v917_v27 }
  0x5f   : > { %1774 = vmatprep.mubr.bf16.mxu0 %v1857_v36  ;;  %1806 = vmatprep.mubr.bf16.mxu1 %v1873_v37  ;;  %v2076_v36 = vld [vmem:[%s2637_s2] ss:$0 sm:$0xff]  ;;  %v2079_v37 = vsel %vm1038_vm12, 1.0, %v1883_v61 }
  0x60   : > { %vm1046_vm4 = vcmp.lt.s32.totalorder %v982_v35, 1024 }
  0x66   : > { %1775 = vmatmul.mubr.bf16.gmra.mrb[28].mxu0 %v1858_v38  ;;  %1807 = vmatmul.mubr.bf16.gmra.mrb[28].mxu1 %v1874_v39  ;;  %v2082_v38 = vsel %vm1036_vm13, 1.0, %v1883_v61  ;;  %v980_v39 = vadd.s32 %v1988_v43, %v915_v29 }
  0x68   : > { %vm1044_vm5 = vcmp.lt.s32.totalorder %v980_v39, 1024 }
  0x69   : > { %v2153_v19 = vsel %vm1044_vm5, 1.0, %v1883_v61 }
 0x101   : > { %v1748_v47 = vpop.f32.mrb[0].mxu0  ;;  %v1780_v51 = vpop.f32.mrb[0].mxu1 }
 0x102   : > { %v583_v52 = vadd.f32 %v1748_v47, %v2076_v36  ;;  %v574_v53 = vpop.f32.mrb[1].mxu0  ;;  %v2110_v54 = vadd.f32 %v1780_v51, %v2076_v36  ;;  %v702_v55 = vpop.f32.mrb[1].mxu1 }
 0x103   : > { %v575_v57 = vadd.f32 %v2076_v36, %v574_v53  ;;  %v1749_v58 = vpop.f32.mrb[2].mxu0  ;;  %v2115_v59 = vadd.f32 %v2076_v36, %v702_v55  ;;  %v1781_v60 = vpop.f32.mrb[2].mxu1 }
 0x104   : > { %831 = vst [vmem:[%s2099_s20 + $0x10] sm:$0xff] %v583_v52  ;;  %v586_v1 = vadd.f32 %v1749_v58, %v2076_v36  ;;  %v577_v2 = vpop.f32.mrb[3].mxu0  ;;  %863 = vst [vmem:[%s2099_s20 + $0x110] sm:$0xff] %v2110_v54  ;;  %v2123_v4 = vadd.f32 %v1781_v60, %v2076_v36  ;;  %v705_v5 = vpop.f32.mrb[3].mxu1  ;;  %v1218_v13 = vmul.f32 %v2009_v62, %v583_v52  ;;  %v2157_v62 = vsel %vm1047_vm6, 1.0, %v1883_v61 }
 0x105   : > { %829 = vst [vmem:[%s2099_s20] sm:$0xff] %v575_v57  ;;  %v1216_v6 = vmul.f32 %v2012_v63, %v575_v57  ;;  %v578_v8 = vadd.f32 %v2076_v36, %v577_v2  ;;  %861 = vst [vmem:[%s2099_s20 + $0x100] sm:$0xff] %v2115_v59  ;;  %v2134_v10 = vadd.f32 %v2076_v36, %v705_v5  ;;  %v2144_v63 = vsel %vm1046_vm4, 1.0, %v1883_v61 }
 0x106   : > { %832 = vst [vmem:[%s2099_s20 + $0x18] sm:$0xff] %v586_v1  ;;  %864 = vst [vmem:[%s2099_s20 + $0x118] sm:$0xff] %v2123_v4  ;;  %v1219_v21 = vmul.f32 %v2015_v0, %v586_v1  ;;  %v1351_v32 = vmul.f32 %v1218_v13, %v583_v52  ;;  %v1001_v60 = vadd.s32 %v1988_v43, %v936_v23 }
 0x107   : > { %830 = vst [vmem:[%s2099_s20 + $0x8] sm:$0xff] %v578_v8  ;;  %v1217_v18 = vmul.f32 %v2024_v7, %v578_v8  ;;  %862 = vst [vmem:[%s2099_s20 + $0x108] sm:$0xff] %v2134_v10  ;;  %v922_v7 = vadd.s32 216, %v1984_v41  ;;  %v1349_v25 = vmul.f32 %v1216_v6, %v575_v57 }
 0x108   : > { %v1352_v53 = vmul.f32 %v1219_v21, %v586_v1  ;;  %vm1065_vm11 = vcmp.lt.s32.totalorder %v1001_v60, 1024 }
 0x109   : > { %v1280_v26 = vadd.f32 %v1217_v18, %v1216_v6  ;;  %v1350_v27 = vmul.f32 %v1217_v18, %v578_v8  ;;  %v1752_v29 = vpop.f32.mrb[4].mxu0  ;;  %v1784_v30 = vpop.f32.mrb[4].mxu1  ;;  %v2196_v8 = vadd.s32 %v1988_v43, %v922_v7  ;;  %v1661_v18 = vsel %vm1061_vm9, 1.0, %v1883_v61 }
 0x10a   : > { %v599_v33 = vadd.f32 %v1752_v29, %v2076_v36  ;;  %v590_v0 = vpop.f32.mrb[5].mxu0  ;;  %v2174_v35 = vadd.f32 %v1784_v30, %v2076_v36  ;;  %v718_v39 = vpop.f32.mrb[5].mxu1  ;;  %v2209_v7 = vsel %vm1050_vm8, 1.0, %v1883_v61 }
 0x10b   : > { %v1281_v40 = vadd.f32 %v1280_v26, %v1218_v13  ;;  %v1413_v46 = vadd.f32 %v1350_v27, %v1349_v25  ;;  %v591_v47 = vadd.f32 %v2076_v36, %v590_v0  ;;  %v1753_v50 = vpop.f32.mrb[6].mxu0  ;;  %v2178_v51 = vadd.f32 %v2076_v36, %v718_v39  ;;  %v1785_v52 = vpop.f32.mrb[6].mxu1 }
 0x10c   : > { %835 = vst [vmem:[%s2099_s20 + $0x30] sm:$0xff] %v599_v33  ;;  %v602_v55 = vadd.f32 %v1753_v50, %v2076_v36  ;;  %v593_v56 = vpop.f32.mrb[7].mxu0  ;;  %867 = vst [vmem:[%s2099_s20 + $0x130] sm:$0xff] %v2174_v35  ;;  %v2185_v57 = vadd.f32 %v1785_v52, %v2076_v36  ;;  %v721_v58 = vpop.f32.mrb[7].mxu1  ;;  %v1222_v6 = vmul.f32 %v2030_v11, %v599_v33  ;;  %v920_v13 = vadd.s32 200, %v1984_v41 }
 0x10d   : > { %v1414_v2 = vadd.f32 %v1413_v46, %v1351_v32  ;;  %833 = vst [vmem:[%s2099_s20 + $0x20] sm:$0xff] %v591_v47  ;;  %v1220_v3 = vmul.f32 %v2033_v12, %v591_v47  ;;  %v1282_v5 = vadd.f32 %v1281_v40, %v1219_v21  ;;  %v594_v1 = vadd.f32 %v2076_v36, %v593_v56 }
 0x10e   : > { %865 = vst [vmem:[%s2099_s20 + $0x120] sm:$0xff] %v2178_v51  ;;  %836 = vst [vmem:[%s2099_s20 + $0x38] sm:$0xff] %v602_v55  ;;  %v1223_v11 = vmul.f32 %v2039_v15, %v602_v55  ;;  %v722_v26 = vadd.f32 %v2076_v36, %v721_v58  ;;  %v1355_v0 = vmul.f32 %v1222_v6, %v599_v33  ;;  %vm1051_vm12 = vcmp.lt.s32.totalorder %v2196_v8, 1024 }
 0x10f   : > { %868 = vst [vmem:[%s2099_s20 + $0x138] sm:$0xff] %v2185_v57  ;;  %v1283_v23 = vadd.f32 %v1282_v5, %v1220_v3  ;;  %v1353_v12 = vmul.f32 %v1220_v3, %v591_v47  ;;  %v1415_v21 = vadd.f32 %v1414_v2, %v1352_v53  ;;  %834 = vst [vmem:[%s2099_s20 + $0x28] sm:$0xff] %v594_v1  ;;  %v923_v8 = vadd.s32 224, %v1984_v41 }
 0x110   : > { %v1221_v25 = vmul.f32 %v2043_v16, %v594_v1  ;;  %866 = vst [vmem:[%s2099_s20 + $0x128] sm:$0xff] %v722_v26  ;;  %v2215_v9 = vmul.f32 %v1661_v18, %v722_v26  ;;  %v1356_v56 = vmul.f32 %v1223_v11, %v602_v55  ;;  %v985_v3 = vadd.s32 %v1988_v43, %v920_v13 }
 0x111   : > { %v1416_v17 = vadd.f32 %v1415_v21, %v1353_v12  ;;  %v1756_v30 = vpop.f32.mrb[8].mxu0  ;;  %v1788_v32 = vpop.f32.mrb[8].mxu1  ;;  %v2242_v13 = vsel %vm1048_vm10, 1.0, %v1883_v61  ;;  %v1665_v21 = vsel %vm1065_vm11, 1.0, %v1883_v61 }
 0x112   : > { %v1284_v27 = vadd.f32 %v1283_v23, %v1221_v25  ;;  %v1354_v29 = vmul.f32 %v1221_v25, %v594_v1  ;;  %v615_v16 = vadd.f32 %v1756_v30, %v2076_v36  ;;  %v606_v15 = vpop.f32.mrb[9].mxu0  ;;  %v2218_v39 = vadd.f32 %v1788_v32, %v2076_v36  ;;  %v734_v40 = vpop.f32.mrb[9].mxu1 }
 0x113   : > { %v607_v50 = vadd.f32 %v2076_v36, %v606_v15  ;;  %v1757_v52 = vpop.f32.mrb[10].mxu0  ;;  %v2222_v33 = vadd.f32 %v2076_v36, %v734_v40  ;;  %v1789_v53 = vpop.f32.mrb[10].mxu1  ;;  %v2228_v5 = vmul.f32 %v2215_v9, %v722_v26  ;;  %vm1049_vm13 = vcmp.lt.s32.totalorder %v985_v3, 1024 }
 0x114   : > { %v1285_v46 = vadd.f32 %v1284_v27, %v1222_v6  ;;  %v1417_v47 = vadd.f32 %v1416_v17, %v1354_v29  ;;  %839 = vst [vmem:[%s2099_s20 + $0x50] sm:$0xff] %v615_v16  ;;  %v618_v58 = vadd.f32 %v1757_v52, %v2076_v36  ;;  %v609_v2 = vpop.f32.mrb[11].mxu0  ;;  %871 = vst [vmem:[%s2099_s20 + $0x150] sm:$0xff] %v2218_v39  ;;  %v737_v1 = vpop.f32.mrb[11].mxu1 }
 0x115   : > { %837 = vst [vmem:[%s2099_s20 + $0x40] sm:$0xff] %v607_v50  ;;  %v1224_v18 = vmul.f32 %v2059_v28, %v607_v50  ;;  %v610_v55 = vadd.f32 %v2076_v36, %v609_v2  ;;  %869 = vst [vmem:[%s2099_s20 + $0x140] sm:$0xff] %v2222_v33  ;;  %v1226_v12 = vmul.f32 %v2053_v24, %v615_v16 }
 0x116   : > { %v1418_v6 = vadd.f32 %v1417_v47, %v1355_v0  ;;  %v1286_v23 = vadd.f32 %v1285_v46, %v1223_v11  ;;  %840 = vst [vmem:[%s2099_s20 + $0x58] sm:$0xff] %v618_v58  ;;  %v1227_v24 = vmul.f32 %v2064_v31, %v618_v58  ;;  %v2251_v22 = vadd.f32 %v1789_v53, %v2076_v36 }
 0x117   : > { %v1357_v28 = vmul.f32 %v1224_v18, %v607_v50  ;;  %838 = vst [vmem:[%s2099_s20 + $0x48] sm:$0xff] %v610_v55  ;;  %v1225_v26 = vmul.f32 %v2070_v34, %v610_v55  ;;  %v738_v17 = vadd.f32 %v2076_v36, %v737_v1  ;;  %v944_v0 = vadd.s32 392, %v1984_v41 }
 0x118   : > { %v1287_v25 = vadd.f32 %v1286_v23, %v1224_v18  ;;  %v1419_v11 = vadd.f32 %v1418_v6, %v1356_v56  ;;  %v1359_v15 = vmul.f32 %v1226_v12, %v615_v16  ;;  %872 = vst [vmem:[%s2099_s20 + $0x158] sm:$0xff] %v2251_v22  ;;  %v1360_v1 = vmul.f32 %v1227_v24, %v618_v58 }
 0x119   : > { %v1358_v60 = vmul.f32 %v1225_v26, %v610_v55  ;;  %v1760_v30 = vpop.f32.mrb[12].mxu0  ;;  %v1792_v32 = vpop.f32.mrb[12].mxu1  ;;  %870 = vst [vmem:[%s2099_s20 + $0x148] sm:$0xff] %v738_v17  ;;  %v2259_v31 = vmul.f32 %v1665_v21, %v738_v17  ;;  %v925_v23 = vadd.s32 240, %v1984_v41 }
 0x11a   : > { %v1420_v27 = vadd.f32 %v1419_v11, %v1357_v28  ;;  %v1288_v29 = vadd.f32 %v1287_v25, %v1225_v26  ;;  %v631_v40 = vadd.f32 %v1760_v30, %v2076_v36  ;;  %v622_v34 = vpop.f32.mrb[13].mxu0  ;;  %v2262_v46 = vadd.f32 %v1792_v32, %v2076_v36  ;;  %v750_v47 = vpop.f32.mrb[13].mxu1 }
 0x11b   : > { %v623_v53 = vadd.f32 %v2076_v36, %v622_v34  ;;  %v1761_v56 = vpop.f32.mrb[14].mxu0  ;;  %v2266_v16 = vadd.f32 %v2076_v36, %v750_v47  ;;  %v1793_v2 = vpop.f32.mrb[14].mxu1  ;;  %v2272_v55 = vmul.f32 %v2259_v31, %v738_v17  ;;  %v2286_v26 = vsel %vm1051_vm12, 1.0, %v1883_v61 }
 0x11c   : > { %v1289_v50 = vadd.f32 %v1288_v29, %v1226_v12  ;;  %v1421_v52 = vadd.f32 %v1420_v27, %v1358_v60  ;;  %843 = vst [vmem:[%s2099_s20 + $0x70] sm:$0xff] %v631_v40  ;;  %v634_v6 = vadd.f32 %v1761_v56, %v2076_v36  ;;  %v625_v18 = vpop.f32.mrb[15].mxu0  ;;  %875 = vst [vmem:[%s2099_s20 + $0x170] sm:$0xff] %v2262_v46  ;;  %v753_v12 = vpop.f32.mrb[15].mxu1  ;;  %v2290_v17 = vsel %vm1049_vm13, 1.0, %v1883_v61 }
 0x11d   : > { %841 = vst [vmem:[%s2099_s20 + $0x60] sm:$0xff] %v623_v53  ;;  %v1228_v25 = vmul.f32 %v2082_v38, %v623_v53  ;;  %v626_v58 = vadd.f32 %v2076_v36, %v625_v18  ;;  %873 = vst [vmem:[%s2099_s20 + $0x160] sm:$0xff] %v2266_v16  ;;  %v1230_v11 = vmul.f32 %v2079_v37, %v631_v40 }
 0x11e   : > { %v1422_v21 = vadd.f32 %v1421_v52, %v1359_v15  ;;  %v1290_v28 = vadd.f32 %v1289_v50, %v1227_v24  ;;  %844 = vst [vmem:[%s2099_s20 + $0x78] sm:$0xff] %v634_v6  ;;  %v1009_v27 = vadd.s32 %v1988_v43, %v944_v0  ;;  %v1231_v37 = vmul.f32 %v2087_v42, %v634_v6 }
 0x11f   : > { %v1361_v24 = vmul.f32 %v1228_v25, %v623_v53  ;;  %842 = vst [vmem:[%s2099_s20 + $0x68] sm:$0xff] %v626_v58  ;;  %v1229_v60 = vmul.f32 %v2090_v44, %v626_v58  ;;  %v990_v30 = vadd.s32 %v1988_v43, %v925_v23  ;;  %v2299_v32 = vadd.f32 %v1793_v2, %v2076_v36 }
 0x120   : > { %v1291_v38 = vadd.f32 %v1290_v28, %v1228_v25  ;;  %v1423_v29 = vadd.f32 %v1422_v21, %v1360_v1  ;;  %v2302_v47 = vadd.f32 %v2076_v36, %v753_v12  ;;  %v926_v52 = vadd.s32 248, %v1984_v41 }
 0x121   : > { %v1362_v34 = vmul.f32 %v1229_v60, %v626_v58  ;;  %v1764_v0 = vpop.f32.mrb[16].mxu0  ;;  %v1796_v50 = vpop.f32.mrb[16].mxu1  ;;  %876 = vst [vmem:[%s2099_s20 + $0x178] sm:$0xff] %v2299_v32  ;;  %vm1073_vm14 = vcmp.lt.s32.totalorder %v1009_v27, 1024  ;;  %v1363_v2 = vmul.f32 %v1230_v11, %v631_v40  ;;  %v1364_v25 = vmul.f32 %v1231_v37, %v634_v6 }
 0x122   : > { %v1424_v3 = vadd.f32 %v1423_v29, %v1361_v24  ;;  %v1292_v15 = vadd.f32 %v1291_v38, %v1229_v60  ;;  %v647_v44 = vadd.f32 %v1764_v0, %v2076_v36  ;;  %v638_v42 = vpop.f32.mrb[17].mxu0  ;;  %v2309_v53 = vadd.f32 %v1796_v50, %v2076_v36  ;;  %v766_v56 = vpop.f32.mrb[17].mxu1  ;;  %874 = vst [vmem:[%s2099_s20 + $0x168] sm:$0xff] %v2302_v47 }
 0x123   : > { %v639_v23 = vadd.f32 %v2076_v36, %v638_v42  ;;  %v1765_v12 = vpop.f32.mrb[18].mxu0  ;;  %v1797_v21 = vpop.f32.mrb[18].mxu1  ;;  %v988_v38 = vadd.s32 %v1988_v43, %v923_v8  ;;  %v924_v24 = vadd.s32 232, %v1984_v41  ;;  %vm1054_vm15 = vcmp.lt.s32.totalorder %v990_v30, 1024 }
 0x124   : > { %v1293_v1 = vadd.f32 %v1292_v15, %v1230_v11  ;;  %v1425_v18 = vadd.f32 %v1424_v3, %v1362_v34  ;;  %847 = vst [vmem:[%s2099_s20 + $0x90] sm:$0xff] %v647_v44  ;;  %v650_v28 = vadd.f32 %v1765_v12, %v2076_v36  ;;  %v641_v58 = vpop.f32.mrb[19].mxu0  ;;  %879 = vst [vmem:[%s2099_s20 + $0x190] sm:$0xff] %v2309_v53  ;;  %v769_v40 = vpop.f32.mrb[19].mxu1  ;;  %v1673_v8 = vsel %vm1073_vm14, 1.0, %v1883_v61 }
 0x125   : > { %845 = vst [vmem:[%s2099_s20 + $0x80] sm:$0xff] %v639_v23  ;;  %v1232_v29 = vmul.f32 %v2102_v48, %v639_v23  ;;  %v642_v3 = vadd.f32 %v2076_v36, %v641_v58  ;;  %v1234_v6 = vmul.f32 %v2093_v45, %v647_v44  ;;  %v2326_v15 = vadd.s32 %v1988_v43, %v926_v52 }
 0x126   : > { %v1426_v11 = vadd.f32 %v1425_v18, %v1363_v2  ;;  %v1294_v60 = vadd.f32 %v1293_v1, %v1231_v37  ;;  %848 = vst [vmem:[%s2099_s20 + $0x98] sm:$0xff] %v650_v28  ;;  %v1235_v37 = vmul.f32 %v2105_v49, %v650_v28  ;;  %v2334_v45 = vadd.f32 %v2076_v36, %v766_v56 }
 0x127   : > { %v1365_v0 = vmul.f32 %v1232_v29, %v639_v23  ;;  %846 = vst [vmem:[%s2099_s20 + $0x88] sm:$0xff] %v642_v3  ;;  %v1233_v48 = vmul.f32 %v2140_v14, %v642_v3  ;;  %v2337_v42 = vadd.f32 %v1797_v21, %v2076_v36  ;;  %v770_v27 = vadd.f32 %v2076_v36, %v769_v40 }
 0x128   : > { %v1295_v34 = vadd.f32 %v1294_v60, %v1232_v29  ;;  %v1427_v50 = vadd.f32 %v1426_v11, %v1364_v25  ;;  %vm1052_vm0 = vcmp.lt.s32.totalorder %v988_v38, 1024  ;;  %v1367_v12 = vmul.f32 %v1234_v6, %v647_v44  ;;  %877 = vst [vmem:[%s2099_s20 + $0x180] sm:$0xff] %v2334_v45 }
 0x129   : > { %v1366_v1 = vmul.f32 %v1233_v48, %v642_v3  ;;  %v1768_v18 = vpop.f32.mrb[20].mxu0  ;;  %v1800_v23 = vpop.f32.mrb[20].mxu1  ;;  %v2343_v56 = vsel %vm1054_vm15, 1.0, %v1883_v61  ;;  %880 = vst [vmem:[%s2099_s20 + $0x198] sm:$0xff] %v2337_v42  ;;  %878 = vst [vmem:[%s2099_s20 + $0x188] sm:$0xff] %v770_v27  ;;  %v2350_v21 = vmul.f32 %v1673_v8, %v770_v27  ;;  %v1368_v60 = vmul.f32 %v1235_v37, %v650_v28 }
 0x12a   : > { %v1428_v52 = vadd.f32 %v1427_v50, %v1365_v0  ;;  %v1296_v2 = vadd.f32 %v1295_v34, %v1233_v48  ;;  %v663_v14 = vadd.f32 %v1768_v18, %v2076_v36  ;;  %v654_v49 = vpop.f32.mrb[21].mxu0  ;;  %v782_v25 = vpop.f32.mrb[21].mxu1  ;;  %v2354_v29 = vadd.f32 %v1800_v23, %v2076_v36 }
 0x12b   : > { %v655_v44 = vadd.f32 %v2076_v36, %v654_v49  ;;  %v1769_v11 = vpop.f32.mrb[22].mxu0  ;;  %v1801_v30 = vpop.f32.mrb[22].mxu1  ;;  %v2360_v8 = vsel %vm1052_vm0, 1.0, %v1883_v61  ;;  %vm1055_vm1 = vcmp.lt.s32.totalorder %v2326_v15, 1024  ;;  %v929_v38 = vadd.s32 272, %v1984_v41 }
 0x12c   : > { %v1297_v58 = vadd.f32 %v1296_v2, %v1234_v6  ;;  %v1429_v40 = vadd.f32 %v1428_v52, %v1366_v1  ;;  %851 = vst [vmem:[%s2099_s20 + $0xb0] sm:$0xff] %v663_v14  ;;  %v666_v3 = vadd.f32 %v1769_v11, %v2076_v36  ;;  %v657_v34 = vpop.f32.mrb[23].mxu0  ;;  %v989_v6 = vadd.s32 %v1988_v43, %v924_v24  ;;  %v785_v0 = vpop.f32.mrb[23].mxu1 }
 0x12d   : > { %849 = vst [vmem:[%s2099_s20 + $0xa0] sm:$0xff] %v655_v44  ;;  %v1236_v48 = vmul.f32 %v2153_v19, %v655_v44  ;;  %v658_v2 = vadd.f32 %v2076_v36, %v657_v34  ;;  %883 = vst [vmem:[%s2099_s20 + $0x1b0] sm:$0xff] %v2354_v29  ;;  %v1238_v28 = vmul.f32 %v2144_v63, %v663_v14  ;;  %v927_v63 = vadd.s32 256, %v1984_v41 }
 0x12e   : > { %v1430_v50 = vadd.f32 %v1429_v40, %v1367_v12  ;;  %v1298_v52 = vadd.f32 %v1297_v58, %v1235_v37  ;;  %852 = vst [vmem:[%s2099_s20 + $0xb8] sm:$0xff] %v666_v3  ;;  %v2373_v24 = vmul.f32 %v2350_v21, %v770_v27  ;;  %v1239_v37 = vmul.f32 %v2157_v62, %v666_v3 }
 0x12f   : > { %v1369_v18 = vmul.f32 %v1236_v48, %v655_v44  ;;  %850 = vst [vmem:[%s2099_s20 + $0xa8] sm:$0xff] %v658_v2  ;;  %v1237_v19 = vmul.f32 %v2161_v20, %v658_v2  ;;  %v2380_v12 = vadd.f32 %v2076_v36, %v782_v25  ;;  %v2383_v49 = vadd.f32 %v1801_v30, %v2076_v36 }
 0x130   : > { %v1299_v1 = vadd.f32 %v1298_v52, %v1236_v48  ;;  %v1431_v23 = vadd.f32 %v1430_v50, %v1368_v60  ;;  %v2386_v11 = vadd.f32 %v2076_v36, %v785_v0  ;;  %v2392_v25 = vsel %vm1055_vm1, 1.0, %v1883_v61 }
 0x131   : > { %2644 = vst [vmem:[#allocation2_spill] sm:$0xff] %v2383_v49  ;;  %v1370_v40 = vmul.f32 %v1237_v19, %v658_v2  ;;  %v1772_v44 = vpop.f32.mrb[24].mxu0  ;;  %v1804_v20 = vpop.f32.mrb[24].mxu1  ;;  %vm1053_vm2 = vcmp.lt.s32.totalorder %v989_v6, 1024  ;;  %881 = vst [vmem:[%s2099_s20 + $0x1a0] sm:$0xff] %v2380_v12  ;;  %v1371_v0 = vmul.f32 %v1238_v28, %v663_v14 }
 0x132   : > { %v1432_v27 = vadd.f32 %v1431_v23, %v1369_v18  ;;  %v1300_v58 = vadd.f32 %v1299_v1, %v1237_v19  ;;  %v679_v60 = vadd.f32 %v1772_v44, %v2076_v36  ;;  %v670_v62 = vpop.f32.mrb[25].mxu0  ;;  %884 = vst [vmem:[%s2099_s20 + $0x1b8] sm:$0xff] %v2383_v49  ;;  %v2399_v30 = vadd.f32 %v1804_v20, %v2076_v36  ;;  %v798_v34 = vpop.f32.mrb[25].mxu1 }
 0x133   : > { %v671_v52 = vadd.f32 %v2076_v36, %v670_v62  ;;  %v1773_v2 = vpop.f32.mrb[26].mxu0  ;;  %882 = vst [vmem:[%s2099_s20 + $0x1a8] sm:$0xff] %v2386_v11  ;;  %v1805_v15 = vpop.f32.mrb[26].mxu1  ;;  %v1372_v1 = vmul.f32 %v1239_v37, %v666_v3  ;;  %v930_v19 = vadd.s32 280, %v1984_v41  ;;  %v928_v44 = vadd.s32 264, %v1984_v41 }
 0x134   : > { %2645 = vst [vmem:[#allocation3_spill] sm:$0xff] %v2399_v30  ;;  %v1301_v50 = vadd.f32 %v1300_v58, %v1238_v28  ;;  %v1433_v48 = vadd.f32 %v1432_v27, %v1370_v40  ;;  %855 = vst [vmem:[%s2099_s20 + $0xd0] sm:$0xff] %v679_v60  ;;  %v682_v18 = vadd.f32 %v1773_v2, %v2076_v36  ;;  %v673_v23 = vpop.f32.mrb[27].mxu0  ;;  %v801_v14 = vpop.f32.mrb[27].mxu1  ;;  %v1653_v20 = vsel %vm1053_vm2, 1.0, %v1883_v61 }
 0x135   : > { %887 = vst [vmem:[%s2099_s20 + $0x1d0] sm:$0xff] %v2399_v30  ;;  %853 = vst [vmem:[%s2099_s20 + $0xc0] sm:$0xff] %v671_v52  ;;  %v1240_v27 = vmul.f32 %v2242_v13, %v671_v52  ;;  %v674_v40 = vadd.f32 %v2076_v36, %v673_v23  ;;  %v1242_v3 = vmul.f32 %v2209_v7, %v679_v60 }
 0x136   : > { %v1434_v28 = vadd.f32 %v1433_v48, %v1371_v0  ;;  %v1302_v58 = vadd.f32 %v1301_v50, %v1239_v37  ;;  %856 = vst [vmem:[%s2099_s20 + $0xd8] sm:$0xff] %v682_v18  ;;  %v2418_v62 = vadd.s32 %v1988_v43, %v929_v38  ;;  %v992_v2 = vadd.s32 %v1988_v43, %v927_v63 }
 0x137   : > { %v1373_v49 = vmul.f32 %v1240_v27, %v671_v52  ;;  %854 = vst [vmem:[%s2099_s20 + $0xc8] sm:$0xff] %v674_v40  ;;  %v1241_v13 = vmul.f32 %v2290_v17, %v674_v40  ;;  %v1243_v37 = vmul.f32 %v2286_v26, %v682_v18  ;;  %v2425_v7 = vadd.s32 %v1988_v43, %v930_v19 }
 0x138   : > { %v1303_v30 = vadd.f32 %v1302_v58, %v1240_v27  ;;  %v1435_v0 = vadd.f32 %v1434_v28, %v1372_v1  ;;  %v2428_v6 = vadd.f32 %v2076_v36, %v798_v34  ;;  %v2431_v38 = vadd.f32 %v1805_v15, %v2076_v36 }
 0x139   : > { %v1374_v48 = vmul.f32 %v1241_v13, %v674_v40  ;;  %v1776_v52 = vpop.f32.mrb[28].mxu0  ;;  %v2434_v1 = vadd.f32 %v2076_v36, %v801_v14  ;;  %v1808_v17 = vpop.f32.mrb[28].mxu1  ;;  %vm1056_vm3 = vcmp.lt.s32.totalorder %v992_v2, 1024  ;;  %v993_v34 = vadd.s32 %v1988_v43, %v928_v44 }
 0x13a   : > { %v1436_v63 = vadd.f32 %v1435_v0, %v1373_v49  ;;  %v1304_v50 = vadd.f32 %v1303_v30, %v1241_v13  ;;  %v695_v26 = vadd.f32 %v1776_v52, %v2076_v36  ;;  %v686_v23 = vpop.f32.mrb[29].mxu0  ;;  %885 = vst [vmem:[%s2099_s20 + $0x1c0] sm:$0xff] %v2428_v6  ;;  %888 = vst [vmem:[%s2099_s20 + $0x1d8] sm:$0xff] %v2431_v38  ;;  %v814_v30 = vpop.f32.mrb[29].mxu1  ;;  %vm1058_vm4 = vcmp.lt.s32.totalorder %v2418_v62, 1024 }
 0x13b   : > { %v2443_v49 = vadd.f32 %v1808_v17, %v2076_v36  ;;  %v1375_v15 = vmul.f32 %v1242_v3, %v679_v60  ;;  %v687_v28 = vadd.f32 %v2076_v36, %v686_v23  ;;  %v1777_v27 = vpop.f32.mrb[30].mxu0  ;;  %886 = vst [vmem:[%s2099_s20 + $0x1c8] sm:$0xff] %v2434_v1  ;;  %v1809_v44 = vpop.f32.mrb[30].mxu1  ;;  %v1376_v58 = vmul.f32 %v1243_v37, %v682_v18 }
 0x13c   : > { %v1305_v19 = vadd.f32 %v1304_v50, %v1242_v3  ;;  %v1437_v14 = vadd.f32 %v1436_v63, %v1374_v48  ;;  %859 = vst [vmem:[%s2099_s20 + $0xf0] sm:$0xff] %v695_v26  ;;  %v698_v40 = vadd.f32 %v1777_v27, %v2076_v36  ;;  %v689_v0 = vpop.f32.mrb[31].mxu0  ;;  %v931_v13 = vadd.s32 288, %v1984_v41  ;;  %v817_v60 = vpop.f32.mrb[31].mxu1 }
 0x13d   : > { %891 = vst [vmem:[%s2099_s20 + $0x1f0] sm:$0xff] %v2443_v49  ;;  %857 = vst [vmem:[%s2099_s20 + $0xe0] sm:$0xff] %v687_v28  ;;  %v1244_v63 = vmul.f32 %v2360_v8, %v687_v28  ;;  %v690_v48 = vadd.f32 %v2076_v36, %v689_v0  ;;  %v1246_v18 = vmul.f32 %v2343_v56, %v695_v26  ;;  %v1656_v52 = vsel %vm1056_vm3, 1.0, %v1883_v61 }
 0x13e   : > { %v1438_v3 = vadd.f32 %v1437_v14, %v1375_v15  ;;  %v1306_v50 = vadd.f32 %v1305_v19, %v1243_v37  ;;  %860 = vst [vmem:[%s2099_s20 + $0xf8] sm:$0xff] %v698_v40  ;;  %vm1057_vm5 = vcmp.lt.s32.totalorder %v993_v34, 1024  ;;  %v933_v17 = vadd.s32 304, %v1984_v41 }
 0x13f   : > { %v1377_v27 = vmul.f32 %v1244_v63, %v687_v28  ;;  %858 = vst [vmem:[%s2099_s20 + $0xe8] sm:$0xff] %v690_v48  ;;  %v1245_v14 = vmul.f32 %v1653_v20, %v690_v48  ;;  %v1247_v8 = vmul.f32 %v2392_v25, %v698_v40  ;;  %v996_v37 = vadd.s32 %v1988_v43, %v931_v13 }
 0x140   : > { %v1307_v23 = vadd.f32 %v1306_v50, %v1244_v63  ;;  %v1439_v15 = vadd.f32 %v1438_v3, %v1376_v58  ;;  %v2466_v56 = vadd.f32 %v2076_v36, %v814_v30  ;;  %v2469_v2 = vadd.f32 %v1809_v44, %v2076_v36 }
 0x141   : > { %v1378_v50 = vmul.f32 %v1245_v14, %v690_v48  ;;  %v2472_v28 = vadd.f32 %v2076_v36, %v817_v60  ;;  %vm1059_vm6 = vcmp.lt.s32.totalorder %v2425_v7, 1024  ;;  %v1657_v25 = vsel %vm1057_vm5, 1.0, %v1883_v61 }
 0x142   : > { %v1440_v19 = vadd.f32 %v1439_v15, %v1377_v27  ;;  %v1308_v0 = vadd.f32 %v1307_v23, %v1245_v14  ;;  %v934_v20 = vadd.s32 312, %v1984_v41  ;;  %889 = vst [vmem:[%s2099_s20 + $0x1e0] sm:$0xff] %v2466_v56  ;;  %892 = vst [vmem:[%s2099_s20 + $0x1f8] sm:$0xff] %v2469_v2  ;;  %v1379_v30 = vmul.f32 %v1246_v18, %v695_v26 }
 0x143   : > { %v1248_v13 = vmul.f32 %v1656_v52, %v2115_v59  ;;  %890 = vst [vmem:[%s2099_s20 + $0x1e8] sm:$0xff] %v2472_v28  ;;  %v1658_v36 = vsel %vm1058_vm4, 1.0, %v1883_v61  ;;  %v998_v34 = vadd.s32 %v1988_v43, %v933_v17  ;;  %vm1060_vm7 = vcmp.lt.s32.totalorder %v996_v37, 1024 }
 0x144   : > { %v1309_v44 = vadd.f32 %v1308_v0, %v1246_v18  ;;  %v1441_v58 = vadd.f32 %v1440_v19, %v1378_v50  ;;  %v935_v60 = vadd.s32 320, %v1984_v41  ;;  %v1380_v3 = vmul.f32 %v1247_v8, %v698_v40 }
 0x145   : > { %v1249_v26 = vmul.f32 %v1657_v25, %v2134_v10  ;;  %v1659_v18 = vsel %vm1059_vm6, 1.0, %v1883_v61  ;;  %v999_v52 = vadd.s32 %v1988_v43, %v934_v20  ;;  %v1250_v23 = vmul.f32 %v1658_v36, %v2110_v54 }
 0x146   : > { %v1442_v63 = vadd.f32 %v1441_v58, %v1379_v30  ;;  %v1310_v48 = vadd.f32 %v1309_v44, %v1247_v8  ;;  %v1381_v27 = vmul.f32 %v1248_v13, %v2115_v59  ;;  %vm1062_vm8 = vcmp.lt.s32.totalorder %v998_v34, 1024 }
 0x147   : > { %v1660_v15 = vsel %vm1060_vm7, 1.0, %v1883_v61  ;;  %v937_v40 = vadd.s32 336, %v1984_v41  ;;  %v1000_v14 = vadd.s32 %v1988_v43, %v935_v60  ;;  %v1251_v37 = vmul.f32 %v1659_v18, %v2123_v4 }
 0x148   : > { %v1311_v62 = vadd.f32 %v1310_v48, %v1248_v13  ;;  %v1443_v17 = vadd.f32 %v1442_v63, %v1380_v3  ;;  %v1382_v19 = vmul.f32 %v1249_v26, %v2134_v10  ;;  %vm1063_vm9 = vcmp.lt.s32.totalorder %v999_v52, 1024 }
 0x149   : > { %v938_v0 = vadd.s32 344, %v1984_v41  ;;  %v1383_v50 = vmul.f32 %v1250_v23, %v2110_v54  ;;  %v1252_v20 = vmul.f32 %v1660_v15, %v2178_v51  ;;  %v1662_v30 = vsel %vm1062_vm8, 1.0, %v1883_v61 }
 0x14a   : > { %v1444_v8 = vadd.f32 %v1443_v17, %v1381_v27  ;;  %v1312_v7 = vadd.f32 %v1311_v62, %v1249_v26  ;;  %v1002_v44 = vadd.s32 %v1988_v43, %v937_v40  ;;  %vm1064_vm10 = vcmp.lt.s32.totalorder %v1000_v14, 1024 }
 0x14b   : > { %v1384_v58 = vmul.f32 %v1251_v37, %v2123_v4  ;;  %v939_v10 = vadd.s32 352, %v1984_v41  ;;  %v1663_v34 = vsel %vm1063_vm9, 1.0, %v1883_v61  ;;  %v1003_v60 = vadd.s32 %v1988_v43, %v938_v0 }
 0x14c   : > { %v1313_v59 = vadd.f32 %v1312_v7, %v1250_v23  ;;  %v1445_v25 = vadd.f32 %v1444_v8, %v1382_v19  ;;  %v940_v54 = vadd.s32 360, %v1984_v41  ;;  %v1254_v3 = vmul.f32 %v1662_v30, %v2174_v35 }
 0x14d   : > { %v1385_v48 = vmul.f32 %v1252_v20, %v2178_v51  ;;  %vm1066_vm11 = vcmp.lt.s32.totalorder %v1002_v44, 1024  ;;  %v1664_v18 = vsel %vm1064_vm10, 1.0, %v1883_v61  ;;  %v941_v4 = vadd.s32 368, %v1984_v41 }
 0x14e   : > { %v1446_v13 = vadd.f32 %v1445_v25, %v1383_v50  ;;  %v1314_v36 = vadd.f32 %v1313_v59, %v1251_v37  ;;  %v1255_v23 = vmul.f32 %v1663_v34, %v2185_v57  ;;  %v1004_v27 = vadd.s32 %v1988_v43, %v939_v10 }
 0x14f   : > { %vm1067_vm12 = vcmp.lt.s32.totalorder %v1003_v60, 1024  ;;  %v942_v17 = vadd.s32 376, %v1984_v41  ;;  %v1005_v15 = vadd.s32 %v1988_v43, %v940_v54  ;;  %v1387_v51 = vmul.f32 %v1254_v3, %v2174_v35 }
 0x150   : > { %v1315_v63 = vadd.f32 %v1314_v36, %v1252_v20  ;;  %v1447_v26 = vadd.f32 %v1446_v13, %v1384_v58  ;;  %v1256_v8 = vmul.f32 %v1664_v18, %v2222_v33  ;;  %v1666_v37 = vsel %vm1066_vm11, 1.0, %v1883_v61 }
 0x151   : > { %v1006_v7 = vadd.s32 %v1988_v43, %v941_v4  ;;  %v1388_v19 = vmul.f32 %v1255_v23, %v2185_v57  ;;  %vm1068_vm13 = vcmp.lt.s32.totalorder %v1004_v27, 1024  ;;  %v1667_v59 = vsel %vm1067_vm12, 1.0, %v1883_v61 }
 0x152   : > { %v1448_v52 = vadd.f32 %v1447_v26, %v1385_v48  ;;  %v1316_v62 = vadd.f32 %v1315_v63, %v2215_v9  ;;  %v943_v9 = vadd.s32 384, %v1984_v41  ;;  %v1007_v35 = vadd.s32 %v1988_v43, %v942_v17 }
 0x153   : > { %vm1069_vm14 = vcmp.lt.s32.totalorder %v1005_v15, 1024  ;;  %v1389_v20 = vmul.f32 %v1256_v8, %v2222_v33  ;;  %v1668_v44 = vsel %vm1068_vm13, 1.0, %v1883_v61  ;;  %v945_v58 = vadd.s32 400, %v1984_v41 }
 0x154   : > { %v1317_v40 = vadd.f32 %v1316_v62, %v1254_v3  ;;  %v1449_v14 = vadd.f32 %v1448_v52, %v2228_v5  ;;  %v1258_v5 = vmul.f32 %v1666_v37, %v2218_v39  ;;  %v1008_v57 = vadd.s32 %v1988_v43, %v943_v9 }
 0x155   : > { %v1259_v36 = vmul.f32 %v1667_v59, %v2251_v22  ;;  %vm1070_vm15 = vcmp.lt.s32.totalorder %v1006_v7, 1024  ;;  %vm1071_vm0 = vcmp.lt.s32.totalorder %v1007_v35, 1024  ;;  %v1669_v34 = vsel %vm1069_vm14, 1.0, %v1883_v61 }
 0x156   : > { %v1450_v0 = vadd.f32 %v1449_v14, %v1387_v51  ;;  %v1318_v50 = vadd.f32 %v1317_v40, %v1255_v23  ;;  %v946_v60 = vadd.s32 408, %v1984_v41  ;;  %v1391_v33 = vmul.f32 %v1258_v5, %v2218_v39 }
 0x157   : > { %v1260_v63 = vmul.f32 %v1668_v44, %v2266_v16  ;;  %v1670_v48 = vsel %vm1070_vm15, 1.0, %v1883_v61  ;;  %v1010_v26 = vadd.s32 %v1988_v43, %v945_v58  ;;  %vm1072_vm1 = vcmp.lt.s32.totalorder %v1008_v57, 1024 }
 0x158   : > { %v1319_v25 = vadd.f32 %v1318_v50, %v1256_v8  ;;  %v1451_v30 = vadd.f32 %v1450_v0, %v1388_v19  ;;  %v1392_v18 = vmul.f32 %v1259_v36, %v2251_v22  ;;  %v1261_v23 = vmul.f32 %v1669_v34, %v2302_v47 }
 0x159   : > { %v1671_v39 = vsel %vm1071_vm0, 1.0, %v1883_v61  ;;  %v1011_v62 = vadd.s32 %v1988_v43, %v946_v60  ;;  %v1262_v27 = vmul.f32 %v1670_v48, %v2262_v46  ;;  %v1393_v15 = vmul.f32 %v1260_v63, %v2266_v16 }
 0x15a   : > { %v1452_v13 = vadd.f32 %v1451_v30, %v1389_v20  ;;  %v1320_v10 = vadd.f32 %v1319_v25, %v2259_v31  ;;  %v947_v31 = vadd.s32 416, %v1984_v41  ;;  %vm1074_vm2 = vcmp.lt.s32.totalorder %v1010_v26, 1024 }
 0x15b   : > { %v1672_v40 = vsel %vm1072_vm1, 1.0, %v1883_v61  ;;  %v949_v22 = vadd.s32 432, %v1984_v41  ;;  %v1263_v37 = vmul.f32 %v1671_v39, %v2299_v32  ;;  %v1394_v9 = vmul.f32 %v1261_v23, %v2302_v47 }
 0x15c   : > { %v1321_v54 = vadd.f32 %v1320_v10, %v1258_v5  ;;  %v1453_v3 = vadd.f32 %v1452_v13, %v2272_v55  ;;  %v948_v55 = vadd.s32 424, %v1984_v41  ;;  %v1012_v14 = vadd.s32 %v1988_v43, %v947_v31 }
 0x15d   : > { %vm1075_vm3 = vcmp.lt.s32.totalorder %v1011_v62, 1024  ;;  %v950_v19 = vadd.s32 440, %v1984_v41  ;;  %v1395_v16 = vmul.f32 %v1262_v27, %v2262_v46  ;;  %v1264_v35 = vmul.f32 %v1672_v40, %v2334_v45 }
 0x15e   : > { %v1454_v4 = vadd.f32 %v1453_v3, %v1391_v33  ;;  %v1322_v52 = vadd.f32 %v1321_v54, %v1259_v36  ;;  %v1013_v0 = vadd.s32 %v1988_v43, %v948_v55  ;;  %v1674_v5 = vsel %vm1074_vm2, 1.0, %v1883_v61 }
 0x15f   : > { %v1014_v25 = vadd.s32 %v1988_v43, %v949_v22  ;;  %v951_v20 = vadd.s32 448, %v1984_v41  ;;  %v1396_v30 = vmul.f32 %v1263_v37, %v2299_v32  ;;  %vm1076_vm4 = vcmp.lt.s32.totalorder %v1012_v14, 1024 }
 0x160   : > { %v1323_v17 = vadd.f32 %v1322_v52, %v1260_v63  ;;  %v1455_v51 = vadd.f32 %v1454_v4, %v1392_v18  ;;  %v1675_v58 = vsel %vm1075_vm3, 1.0, %v1883_v61  ;;  %v1015_v57 = vadd.s32 %v1988_v43, %v950_v19 }
 0x161   : > { %vm1077_vm5 = vcmp.lt.s32.totalorder %v1013_v0, 1024  ;;  %v952_v46 = vadd.s32 456, %v1984_v41  ;;  %v1266_v13 = vmul.f32 %v1674_v5, %v2309_v53  ;;  %v1397_v10 = vmul.f32 %v1264_v35, %v2334_v45 }
 0x162   : > { %v1456_v8 = vadd.f32 %v1455_v51, %v1393_v15  ;;  %v1324_v7 = vadd.f32 %v1323_v17, %v1261_v23  ;;  %v1676_v60 = vsel %vm1076_vm4, 1.0, %v1883_v61  ;;  %v953_v32 = vadd.s32 464, %v1984_v41 }
 0x163   : > { %v1016_v33 = vadd.s32 %v1988_v43, %v951_v20  ;;  %v1267_v3 = vmul.f32 %v1675_v58, %v2337_v42  ;;  %vm1078_vm6 = vcmp.lt.s32.totalorder %v1014_v25, 1024  ;;  %vm1079_vm7 = vcmp.lt.s32.totalorder %v1015_v57, 1024 }
 0x164   : > { %v1325_v50 = vadd.f32 %v1324_v7, %v1262_v27  ;;  %v1457_v59 = vadd.f32 %v1456_v8, %v1394_v9  ;;  %v1677_v48 = vsel %vm1077_vm5, 1.0, %v1883_v61  ;;  %v954_v26 = vadd.s32 472, %v1984_v41  ;;  %v2646_v9 = vld [vmem:[#allocation2_spill] sm:$0xff] }
 0x165   : > { %v1017_v45 = vadd.s32 %v1988_v43, %v952_v46  ;;  %v1399_v31 = vmul.f32 %v1266_v13, %v2309_v53  ;;  %v1268_v52 = vmul.f32 %v1676_v60, %v2380_v12  ;;  %v1678_v23 = vsel %vm1078_vm6, 1.0, %v1883_v61  ;;  %v2647_v46 = vld [vmem:[#allocation3_spill] sm:$0xff] }
 0x166   : > { %v1458_v47 = vadd.f32 %v1457_v59, %v1395_v16  ;;  %v1326_v44 = vadd.f32 %v1325_v50, %v1263_v37  ;;  %v1018_v39 = vadd.s32 %v1988_v43, %v953_v32  ;;  %vm1080_vm8 = vcmp.lt.s32.totalorder %v1016_v33, 1024 }
 0x167   : > { %v1400_v62 = vmul.f32 %v1267_v3, %v2337_v42  ;;  %v1269_v17 = vmul.f32 %v1677_v48, %v2386_v11  ;;  %v1679_v53 = vsel %vm1079_vm7, 1.0, %v1883_v61  ;;  %vm1081_vm9 = vcmp.lt.s32.totalorder %v1017_v45, 1024 }
 0x168   : > { %v1327_v36 = vadd.f32 %v1326_v44, %v1264_v35  ;;  %v1459_v34 = vadd.f32 %v1458_v47, %v1396_v30  ;;  %v956_v15 = vadd.s32 488, %v1984_v41  ;;  %v1270_v51 = vmul.f32 %v1678_v23, %v2354_v29 }
 0x169   : > { %v1401_v22 = vmul.f32 %v1268_v52, %v2380_v12  ;;  %vm1082_vm10 = vcmp.lt.s32.totalorder %v1018_v39, 1024  ;;  %v1680_v42 = vsel %vm1080_vm8, 1.0, %v1883_v61  ;;  %v957_v8 = vadd.s32 496, %v1984_v41 }
 0x16a   : > { %v1460_v54 = vadd.f32 %v1459_v34, %v1397_v10  ;;  %v1328_v63 = vadd.f32 %v1327_v36, %v2350_v21  ;;  %v955_v21 = vadd.s32 480, %v1984_v41  ;;  %v1271_v19 = vmul.f32 %v1679_v53, %v2646_v9 }
 0x16b   : > { %v1402_v16 = vmul.f32 %v1269_v17, %v2386_v11  ;;  %v1681_v50 = vsel %vm1081_vm9, 1.0, %v1883_v61  ;;  %v958_v59 = vadd.s32 504, %v1984_v41  ;;  %v1021_v12 = vadd.s32 %v1988_v43, %v956_v15 }
 0x16c   : > { %v1329_v18 = vadd.f32 %v1328_v63, %v1266_v13  ;;  %v1461_v4 = vadd.f32 %v1460_v54, %v2373_v24  ;;  %v1019_v24 = vadd.s32 %v1988_v43, %v954_v26  ;;  %v1020_v37 = vadd.s32 %v1988_v43, %v955_v21 }
 0x16d   : > { %v1403_v35 = vmul.f32 %v1270_v51, %v2354_v29  ;;  %v1272_v20 = vmul.f32 %v1680_v42, %v2428_v6  ;;  %v1682_v30 = vsel %vm1082_vm10, 1.0, %v1883_v61  ;;  %v1022_v47 = vadd.s32 %v1988_v43, %v957_v8 }
 0x16e   : > { %v1462_v55 = vadd.f32 %v1461_v4, %v1399_v31  ;;  %v1330_v27 = vadd.f32 %v1329_v18, %v1267_v3  ;;  %vm1083_vm11 = vcmp.lt.s32.totalorder %v1019_v24, 1024  ;;  %vm1084_vm12 = vcmp.lt.s32.totalorder %v1020_v37, 1024 }
 0x16f   : > { %v1404_v11 = vmul.f32 %v1271_v19, %v2646_v9  ;;  %v1273_v41 = vmul.f32 %v1681_v50, %v2434_v1  ;;  %v1683_v57 = vsel %vm1083_vm11, 1.0, %v1883_v61  ;;  %v1023_v29 = vadd.s32 %v1988_v43, %v958_v59 }
 0x170   : > { %v1331_v40 = vadd.f32 %v1330_v27, %v1268_v52  ;;  %v1463_v14 = vadd.f32 %v1462_v55, %v1400_v62  ;;  %vm1085_vm13 = vcmp.lt.s32.totalorder %v1021_v12, 1024  ;;  %v1274_v13 = vmul.f32 %v1682_v30, %v2647_v46 }
 0x171   : > { %v1405_v10 = vmul.f32 %v1272_v20, %v2428_v6  ;;  %vm1086_vm14 = vcmp.lt.s32.totalorder %v1022_v47, 1024  ;;  %v1684_v60 = vsel %vm1084_vm12, 1.0, %v1883_v61  ;;  %v1275_v33 = vmul.f32 %v1683_v57, %v2431_v38 }
 0x172   : > { %v1464_v7 = vadd.f32 %v1463_v14, %v1401_v22  ;;  %v1332_v0 = vadd.f32 %v1331_v40, %v1269_v17  ;;  %v1406_v3 = vmul.f32 %v1273_v41, %v2434_v1  ;;  %vm1087_vm15 = vcmp.lt.s32.totalorder %v1023_v29, 1024 }
 0x173   : > { %v1685_v63 = vsel %vm1085_vm13, 1.0, %v1883_v61  ;;  %v1407_v43 = vmul.f32 %v1274_v13, %v2647_v46  ;;  %v1276_v45 = vmul.f32 %v1684_v60, %v2466_v56  ;;  %v1686_v6 = vsel %vm1086_vm14, 1.0, %v1883_v61 }
 0x174   : > { %v1333_v5 = vadd.f32 %v1332_v0, %v1270_v51  ;;  %v1465_v25 = vadd.f32 %v1464_v7, %v1402_v16  ;;  %v1408_v31 = vmul.f32 %v1275_v33, %v2431_v38  ;;  %v1277_v52 = vmul.f32 %v1685_v63, %v2472_v28 }
 0x175   : > { %v1687_v23 = vsel %vm1087_vm15, 1.0, %v1883_v61  ;;  %v1278_v1 = vmul.f32 %v1686_v6, %v2443_v49  ;;  %v1409_v21 = vmul.f32 %v1276_v45, %v2466_v56  ;;  %vm1482_vm0 = vcmask 1040384  }
 0x176   : > { %v1466_v44 = vadd.f32 %v1465_v25, %v1403_v35  ;;  %v1334_v58 = vadd.f32 %v1333_v5, %v1271_v19  ;;  %v1279_v27 = vmul.f32 %v1687_v23, %v2469_v2  ;;  %v1410_v38 = vmul.f32 %v1277_v52, %v2472_v28 }
 0x177   : > { %v1411_v53 = vmul.f32 %v1278_v1, %v2443_v49 }
 0x178   : > { %v1335_v36 = vadd.f32 %v1334_v58, %v1272_v20  ;;  %v1467_v34 = vadd.f32 %v1466_v44, %v1404_v11  ;;  %v1412_v61 = vmul.f32 %v1279_v27, %v2469_v2 }
 0x17a   : > { %v1468_v32 = vadd.f32 %v1467_v34, %v1405_v10  ;;  %v1336_v54 = vadd.f32 %v1335_v36, %v1273_v41 }
 0x17c   : > { %v1337_v48 = vadd.f32 %v1336_v54, %v1274_v13  ;;  %v1469_v26 = vadd.f32 %v1468_v32, %v1406_v3 }
 0x17e   : > { %v1470_v18 = vadd.f32 %v1469_v26, %v1407_v43  ;;  %v1338_v4 = vadd.f32 %v1337_v48, %v1275_v33 }
 0x180   : > { %v1339_v39 = vadd.f32 %v1338_v4, %v1276_v45  ;;  %v1471_v62 = vadd.f32 %v1470_v18, %v1408_v31 }
 0x182   : > { %v1472_v55 = vadd.f32 %v1471_v62, %v1409_v21  ;;  %v1340_v17 = vadd.f32 %v1339_v39, %v1277_v52 }
 0x184   : > { %v1341_v24 = vadd.f32 %v1340_v17, %v1278_v1  ;;  %v1473_v15 = vadd.f32 %v1472_v55, %v1410_v38 }
 0x186   : > { %v1342_v51 = vadd.f32 %v1341_v24, %v1279_v27  ;;  %v1474_v40 = vadd.f32 %v1473_v15, %v1411_v53 }
 0x188   : > { %v1343_v22 = vrot.slane %v1342_v51, 4  ;;  %v1475_v14 = vadd.f32 %v1474_v40, %v1412_v61 }
 0x18a   : > { %v1344_v56 = vadd.f32 %v1343_v22, %v1342_v51  ;;  %v1476_v42 = vrot.slane %v1475_v14, 4 }
 0x18c   : > { %v1345_v8 = vrot.slane %v1344_v56, 2  ;;  %v1477_v37 = vadd.f32 %v1476_v42, %v1475_v14 }
 0x18e   : > { %v1346_v7 = vadd.f32 %v1345_v8, %v1344_v56  ;;  %v1478_v9 = vrot.slane %v1477_v37, 2 }
 0x190   : > { %v1347_v19 = vrot.slane %v1346_v7, 1  ;;  %v1479_v28 = vadd.f32 %v1478_v9, %v1477_v37 }
 0x192   : > { %v1480_v49 = vrot.slane %v1479_v28, 1  ;;  %v1348_v2 = vadd.f32 %v1347_v19, %v1346_v7 }
 0x194   : > { %v1481_v0 = vadd.f32 %v1480_v49, %v1479_v28 }
 0x196   : > { %v1483_v16 = vsel %vm1482_vm0, %v1348_v2, %v1481_v0 }
 0x197   : > { %1484 = vst [vmem:[%s211_s24] sm:$0x3] %v1483_v16 }
 0x198 PF: > { %s15_s15 = sadd.s32 1, %s1881_s15  }
 0x199   : > { %p12_p5 = scmp.ge.s32.totalorder %s15_s15, 4  }
 0x19b   :  { %14 = sbr.rel (!%p12_p5) target bundleno = 1 (0x1), region = 74 }

// kernel: in_conv_forward.5
= control target key start
LH: loop header
LB: loop body
LE: loop exit
PB: predicated region body
PF: predicated region fallthrough
CT: control target
= control target key end

     0   :  { %s1188_s12 = smov 0   ;;  %s1447_s0 = inlined_call_operand.vmem [shape: f32[1024,128], index: 0, kind: input, shape index: {}]   ;;  %s1448_s1 = inlined_call_operand.vmem [shape: f32[1,128], index: 1, kind: input, shape index: {}]   ;;  %s1449_s2 = inlined_call_operand.vmem [shape: f32[1,128], index: 2, kind: input, shape index: {}]   ;;  %s1450_s3 = inlined_call_operand.vmem [shape: bf16[1024,128], index: 3, kind: output, shape index: {}]  }
   0x1 LB: > { %s820_s13 = sadd.s32 4294967295, %s1166_s12   ;;  %p824_p0 = scmp.ge.s32.totalorder %s1166_s12, 1  ;;  %s1166_s12 = sphi %s1188_s12, %s13_s12  }
   0x2   : > { %p138_p1 = scmp.lt.s32.totalorder %s1166_s12, 3 }
   0x4   : > { %p139_p2 = pnand %p824_p0, %p138_p1 }
   0x5   : > { %s825_s14 = sshll.u32 (!%p139_p2), %s820_s13, 6  ;;  %v1202_v0 = vld [vmem:[%s1448_s1] ss:$0 sm:$0xff] (!%p139_p2) }
   0x6   : > { %142 = sbr.rel (%p139_p2) target bundleno = 79 (0x4f), region = 32  ;;  %p163_p3 = scmp.lt.s32.totalorder (!%p139_p2), %s825_s14, 127  ;;  %v1212_v1 = vld [vmem:[%s1449_s2] ss:$0 sm:$0xff] (!%p139_p2) }
   0xd   : > { %s1452_s14 = smov (!%p163_p3, %s825_s14), 127 }
   0xe   : > { %s826_s15 = sshll.u32 %s1452_s14, 3  ;;  %s828_s23 = sshll.u32 %s1452_s14, 2 }
   0xf   : > { %s1207_s20 = scalar_lea.vmem %s1447_s0, %s826_s15  ;;  %s1244_s26 = scalar_lea.vmem %s1450_s3, %s828_s23 }
  0x10   : > { %v174_v2 = vld [vmem:[%s1207_s20] sm:$0xff]  ;;  %v175_v3 = vld [vmem:[%s1207_s20 + $0x8] sm:$0xff]  ;;  %v176_v4 = vld [vmem:[%s1207_s20 + $0x10] sm:$0xff] }
  0x11   : > { %v245_v5 = vmul.f32 %v1202_v0, %v174_v2  ;;  %v246_v6 = vmul.f32 %v1202_v0, %v175_v3  ;;  %v177_v7 = vld [vmem:[%s1207_s20 + $0x18] sm:$0xff]  ;;  %v247_v8 = vmul.f32 %v1202_v0, %v176_v4  ;;  %v178_v9 = vld [vmem:[%s1207_s20 + $0x20] sm:$0xff]  ;;  %v179_v10 = vld [vmem:[%s1207_s20 + $0x28] sm:$0xff] }
  0x12   : > { %v248_v11 = vmul.f32 %v1202_v0, %v177_v7  ;;  %v249_v12 = vmul.f32 %v1202_v0, %v178_v9  ;;  %v250_v13 = vmul.f32 %v1202_v0, %v179_v10  ;;  %v180_v14 = vld [vmem:[%s1207_s20 + $0x30] sm:$0xff]  ;;  %v181_v15 = vld [vmem:[%s1207_s20 + $0x38] sm:$0xff]  ;;  %v182_v24 = vld [vmem:[%s1207_s20 + $0x40] sm:$0xff] }
  0x13   : > { %v316_v16 = vadd.f32 %v1212_v1, %v245_v5  ;;  %v317_v17 = vadd.f32 %v1212_v1, %v246_v6  ;;  %v318_v18 = vadd.f32 %v1212_v1, %v247_v8  ;;  %v251_v19 = vmul.f32 %v1202_v0, %v180_v14  ;;  %v183_v25 = vld [vmem:[%s1207_s20 + $0x48] sm:$0xff]  ;;  %v184_v30 = vld [vmem:[%s1207_s20 + $0x50] sm:$0xff]  ;;  %v185_v35 = vld [vmem:[%s1207_s20 + $0x58] sm:$0xff] }
  0x14   : > { %v319_v20 = vadd.f32 %v1212_v1, %v248_v11  ;;  %v320_v21 = vadd.f32 %v1212_v1, %v249_v12  ;;  %v321_v22 = vadd.f32 %v1212_v1, %v250_v13  ;;  %v252_v23 = vmul.f32 %v1202_v0, %v181_v15  ;;  %v186_v36 = vld [vmem:[%s1207_s20 + $0x60] sm:$0xff]  ;;  %v187_v41 = vld [vmem:[%s1207_s20 + $0x68] sm:$0xff]  ;;  %v188_v42 = vld [vmem:[%s1207_s20 + $0x70] sm:$0xff] }
  0x15   : > { %v380_v26 = vmax.f32 %v316_v16, 0.0  ;;  %v381_v27 = vmax.f32 %v317_v17, 0.0  ;;  %v382_v28 = vmax.f32 %v318_v18, 0.0  ;;  %v322_v29 = vadd.f32 %v1212_v1, %v251_v19  ;;  %v189_v51 = vld [vmem:[%s1207_s20 + $0x78] sm:$0xff]  ;;  %v190_v56 = vld [vmem:[%s1207_s20 + $0x80] sm:$0xff]  ;;  %v191_v61 = vld [vmem:[%s1207_s20 + $0x88] sm:$0xff] }
  0x16   : > { %v383_v31 = vmax.f32 %v319_v20, 0.0  ;;  %v384_v32 = vmax.f32 %v320_v21, 0.0  ;;  %v385_v33 = vmax.f32 %v321_v22, 0.0  ;;  %v323_v34 = vadd.f32 %v1212_v1, %v252_v23  ;;  %v192_v4 = vld [vmem:[%s1207_s20 + $0x90] sm:$0xff]  ;;  %v193_v5 = vld [vmem:[%s1207_s20 + $0x98] sm:$0xff]  ;;  %v194_v10 = vld [vmem:[%s1207_s20 + $0xa0] sm:$0xff] }
  0x17   : > { %v964_v37 = vpack.c.bf16 %v381_v27, %v380_v26  ;;  %v386_v38 = vmax.f32 %v322_v29, 0.0  ;;  %v253_v39 = vmul.f32 %v1202_v0, %v182_v24  ;;  %v254_v40 = vmul.f32 %v1202_v0, %v183_v25  ;;  %v195_v15 = vld [vmem:[%s1207_s20 + $0xa8] sm:$0xff]  ;;  %v196_v20 = vld [vmem:[%s1207_s20 + $0xb0] sm:$0xff]  ;;  %v197_v25 = vld [vmem:[%s1207_s20 + $0xb8] sm:$0xff] }
  0x18   : > { %v969_v43 = vpack.c.bf16 %v383_v31, %v382_v28  ;;  %v974_v44 = vpack.c.bf16 %v385_v33, %v384_v32  ;;  %v387_v45 = vmax.f32 %v323_v34, 0.0  ;;  %v255_v46 = vmul.f32 %v1202_v0, %v184_v30  ;;  %v198_v30 = vld [vmem:[%s1207_s20 + $0xc0] sm:$0xff] }
  0x19   : > { %965 = vst [vmem:[%s1244_s26] sm:$0xff] %v964_v37   ;;  %v324_v47 = vadd.f32 %v1212_v1, %v253_v39  ;;  %v325_v48 = vadd.f32 %v1212_v1, %v254_v40  ;;  %v256_v49 = vmul.f32 %v1202_v0, %v185_v35  ;;  %v257_v50 = vmul.f32 %v1202_v0, %v186_v36  ;;  %v199_v35 = vld [vmem:[%s1207_s20 + $0xc8] sm:$0xff]  ;;  %v200_v40 = vld [vmem:[%s1207_s20 + $0xd0] sm:$0xff] }
  0x1a   : > { %1121 = vst [vmem:[%s1244_s26 + $0x8] sm:$0xff] %v969_v43   ;;  %1122 = vst [vmem:[%s1244_s26 + $0x10] sm:$0xff] %v974_v44   ;;  %v979_v52 = vpack.c.bf16 %v387_v45, %v386_v38  ;;  %v326_v53 = vadd.f32 %v1212_v1, %v255_v46  ;;  %v258_v54 = vmul.f32 %v1202_v0, %v187_v41  ;;  %v201_v41 = vld [vmem:[%s1207_s20 + $0xd8] sm:$0xff]  ;;  %v202_v46 = vld [vmem:[%s1207_s20 + $0xe0] sm:$0xff] }
  0x1b   : > { %v259_v55 = vmul.f32 %v1202_v0, %v188_v42  ;;  %v388_v57 = vmax.f32 %v324_v47, 0.0  ;;  %v389_v58 = vmax.f32 %v325_v48, 0.0  ;;  %v327_v59 = vadd.f32 %v1212_v1, %v256_v49 }
  0x1c   : > { %v328_v60 = vadd.f32 %v1212_v1, %v257_v50  ;;  %1123 = vst [vmem:[%s1244_s26 + $0x18] sm:$0xff] %v979_v52   ;;  %v390_v62 = vmax.f32 %v326_v53, 0.0  ;;  %v329_v63 = vadd.f32 %v1212_v1, %v258_v54  ;;  %v260_v2 = vmul.f32 %v1202_v0, %v189_v51  ;;  %v203_v51 = vld [vmem:[%s1207_s20 + $0xe8] sm:$0xff] }
  0x1d   : > { %v330_v3 = vadd.f32 %v1212_v1, %v259_v55  ;;  %v984_v6 = vpack.c.bf16 %v389_v58, %v388_v57  ;;  %v391_v7 = vmax.f32 %v327_v59, 0.0  ;;  %v261_v9 = vmul.f32 %v1202_v0, %v190_v56  ;;  %v204_v56 = vld [vmem:[%s1207_s20 + $0xf0] sm:$0xff] }
  0x1e   : > { %v392_v8 = vmax.f32 %v328_v60, 0.0  ;;  %v393_v11 = vmax.f32 %v329_v63, 0.0  ;;  %v331_v12 = vadd.f32 %v1212_v1, %v260_v2  ;;  %v262_v14 = vmul.f32 %v1202_v0, %v191_v61  ;;  %v205_v61 = vld [vmem:[%s1207_s20 + $0xf8] sm:$0xff] }
  0x1f   : > { %v394_v13 = vmax.f32 %v330_v3, 0.0  ;;  %1124 = vst [vmem:[%s1244_s26 + $0x20] sm:$0xff] %v984_v6   ;;  %v989_v16 = vpack.c.bf16 %v391_v7, %v390_v62  ;;  %v332_v17 = vadd.f32 %v1212_v1, %v261_v9  ;;  %v263_v18 = vmul.f32 %v1202_v0, %v192_v4  ;;  %v206_v4 = vld [vmem:[%s1207_s20 + $0x100] sm:$0xff]  ;;  %v207_v9 = vld [vmem:[%s1207_s20 + $0x108] sm:$0xff] }
  0x20   : > { %v264_v19 = vmul.f32 %v1202_v0, %v193_v5  ;;  %v994_v21 = vpack.c.bf16 %v393_v11, %v392_v8  ;;  %v395_v22 = vmax.f32 %v331_v12, 0.0  ;;  %v333_v23 = vadd.f32 %v1212_v1, %v262_v14  ;;  %v208_v14 = vld [vmem:[%s1207_s20 + $0x110] sm:$0xff] }
  0x21   : > { %v265_v24 = vmul.f32 %v1202_v0, %v194_v10  ;;  %1125 = vst [vmem:[%s1244_s26 + $0x28] sm:$0xff] %v989_v16   ;;  %v396_v26 = vmax.f32 %v332_v17, 0.0  ;;  %v334_v27 = vadd.f32 %v1212_v1, %v263_v18  ;;  %v266_v29 = vmul.f32 %v1202_v0, %v195_v15  ;;  %v209_v15 = vld [vmem:[%s1207_s20 + $0x118] sm:$0xff] }
  0x22   : > { %v335_v28 = vadd.f32 %v1212_v1, %v264_v19  ;;  %1126 = vst [vmem:[%s1244_s26 + $0x30] sm:$0xff] %v994_v21   ;;  %v999_v31 = vpack.c.bf16 %v395_v22, %v394_v13  ;;  %v397_v32 = vmax.f32 %v333_v23, 0.0  ;;  %v267_v34 = vmul.f32 %v1202_v0, %v196_v20  ;;  %v210_v20 = vld [vmem:[%s1207_s20 + $0x120] sm:$0xff] }
  0x23   : > { %v336_v33 = vadd.f32 %v1212_v1, %v265_v24  ;;  %v398_v36 = vmax.f32 %v334_v27, 0.0  ;;  %v337_v38 = vadd.f32 %v1212_v1, %v266_v29  ;;  %v268_v39 = vmul.f32 %v1202_v0, %v197_v25  ;;  %v211_v25 = vld [vmem:[%s1207_s20 + $0x128] sm:$0xff] }
  0x24   : > { %v399_v37 = vmax.f32 %v335_v28, 0.0  ;;  %1127 = vst [vmem:[%s1244_s26 + $0x38] sm:$0xff] %v999_v31   ;;  %v1004_v42 = vpack.c.bf16 %v397_v32, %v396_v26  ;;  %v338_v44 = vadd.f32 %v1212_v1, %v267_v34  ;;  %v269_v45 = vmul.f32 %v1202_v0, %v198_v30  ;;  %v212_v30 = vld [vmem:[%s1207_s20 + $0x130] sm:$0xff] }
  0x25   : > { %v400_v43 = vmax.f32 %v336_v33, 0.0  ;;  %v401_v48 = vmax.f32 %v337_v38, 0.0  ;;  %v339_v49 = vadd.f32 %v1212_v1, %v268_v39  ;;  %v270_v50 = vmul.f32 %v1202_v0, %v199_v35  ;;  %v213_v35 = vld [vmem:[%s1207_s20 + $0x138] sm:$0xff] }
  0x26   : > { %v1009_v47 = vpack.c.bf16 %v399_v37, %v398_v36  ;;  %1128 = vst [vmem:[%s1244_s26 + $0x40] sm:$0xff] %v1004_v42   ;;  %v402_v52 = vmax.f32 %v338_v44, 0.0  ;;  %v340_v53 = vadd.f32 %v1212_v1, %v269_v45  ;;  %v271_v54 = vmul.f32 %v1202_v0, %v200_v40  ;;  %v214_v40 = vld [vmem:[%s1207_s20 + $0x140] sm:$0xff]  ;;  %v215_v45 = vld [vmem:[%s1207_s20 + $0x148] sm:$0xff] }
  0x27   : > { %v272_v55 = vmul.f32 %v1202_v0, %v201_v41  ;;  %v1014_v57 = vpack.c.bf16 %v401_v48, %v400_v43  ;;  %v403_v58 = vmax.f32 %v339_v49, 0.0  ;;  %v341_v59 = vadd.f32 %v1212_v1, %v270_v50  ;;  %v216_v50 = vld [vmem:[%s1207_s20 + $0x150] sm:$0xff] }
  0x28   : > { %1129 = vst [vmem:[%s1244_s26 + $0x48] sm:$0xff] %v1009_v47   ;;  %v273_v60 = vmul.f32 %v1202_v0, %v202_v46  ;;  %v404_v62 = vmax.f32 %v340_v53, 0.0  ;;  %v342_v63 = vadd.f32 %v1212_v1, %v271_v54  ;;  %v274_v3 = vmul.f32 %v1202_v0, %v203_v51  ;;  %v217_v51 = vld [vmem:[%s1207_s20 + $0x158] sm:$0xff] }
  0x29   : > { %v343_v2 = vadd.f32 %v1212_v1, %v272_v55  ;;  %1130 = vst [vmem:[%s1244_s26 + $0x50] sm:$0xff] %v1014_v57   ;;  %v1019_v5 = vpack.c.bf16 %v403_v58, %v402_v52  ;;  %v405_v6 = vmax.f32 %v341_v59, 0.0  ;;  %v275_v8 = vmul.f32 %v1202_v0, %v204_v56  ;;  %v218_v56 = vld [vmem:[%s1207_s20 + $0x160] sm:$0xff] }
  0x2a   : > { %v344_v7 = vadd.f32 %v1212_v1, %v273_v60  ;;  %v406_v10 = vmax.f32 %v342_v63, 0.0  ;;  %v345_v12 = vadd.f32 %v1212_v1, %v274_v3  ;;  %v276_v13 = vmul.f32 %v1202_v0, %v205_v61  ;;  %v219_v61 = vld [vmem:[%s1207_s20 + $0x168] sm:$0xff] }
  0x2b   : > { %v407_v11 = vmax.f32 %v343_v2, 0.0  ;;  %1131 = vst [vmem:[%s1244_s26 + $0x58] sm:$0xff] %v1019_v5   ;;  %v1024_v16 = vpack.c.bf16 %v405_v6, %v404_v62  ;;  %v346_v18 = vadd.f32 %v1212_v1, %v275_v8  ;;  %v277_v19 = vmul.f32 %v1202_v0, %v206_v4  ;;  %v220_v4 = vld [vmem:[%s1207_s20 + $0x170] sm:$0xff] }
  0x2c   : > { %v408_v17 = vmax.f32 %v344_v7, 0.0  ;;  %v409_v22 = vmax.f32 %v345_v12, 0.0  ;;  %v347_v23 = vadd.f32 %v1212_v1, %v276_v13  ;;  %v278_v24 = vmul.f32 %v1202_v0, %v207_v9  ;;  %v221_v9 = vld [vmem:[%s1207_s20 + $0x178] sm:$0xff] }
  0x2d   : > { %v1029_v21 = vpack.c.bf16 %v407_v11, %v406_v10  ;;  %1132 = vst [vmem:[%s1244_s26 + $0x60] sm:$0xff] %v1024_v16   ;;  %v410_v26 = vmax.f32 %v346_v18, 0.0  ;;  %v348_v27 = vadd.f32 %v1212_v1, %v277_v19  ;;  %v279_v28 = vmul.f32 %v1202_v0, %v208_v14  ;;  %v222_v14 = vld [vmem:[%s1207_s20 + $0x180] sm:$0xff]  ;;  %v223_v19 = vld [vmem:[%s1207_s20 + $0x188] sm:$0xff] }
  0x2e   : > { %v280_v29 = vmul.f32 %v1202_v0, %v209_v15  ;;  %v1034_v31 = vpack.c.bf16 %v409_v22, %v408_v17  ;;  %v411_v32 = vmax.f32 %v347_v23, 0.0  ;;  %v349_v33 = vadd.f32 %v1212_v1, %v278_v24  ;;  %v224_v24 = vld [vmem:[%s1207_s20 + $0x190] sm:$0xff] }
  0x2f   : > { %1133 = vst [vmem:[%s1244_s26 + $0x68] sm:$0xff] %v1029_v21   ;;  %v281_v34 = vmul.f32 %v1202_v0, %v210_v20  ;;  %v412_v36 = vmax.f32 %v348_v27, 0.0  ;;  %v350_v37 = vadd.f32 %v1212_v1, %v279_v28  ;;  %v282_v39 = vmul.f32 %v1202_v0, %v211_v25  ;;  %v225_v25 = vld [vmem:[%s1207_s20 + $0x198] sm:$0xff] }
  0x30   : > { %v351_v38 = vadd.f32 %v1212_v1, %v280_v29  ;;  %1134 = vst [vmem:[%s1244_s26 + $0x70] sm:$0xff] %v1034_v31   ;;  %v1039_v41 = vpack.c.bf16 %v411_v32, %v410_v26  ;;  %v413_v42 = vmax.f32 %v349_v33, 0.0  ;;  %v283_v44 = vmul.f32 %v1202_v0, %v212_v30  ;;  %v226_v30 = vld [vmem:[%s1207_s20 + $0x1a0] sm:$0xff] }
  0x31   : > { %v352_v43 = vadd.f32 %v1212_v1, %v281_v34  ;;  %v414_v46 = vmax.f32 %v350_v37, 0.0  ;;  %v353_v48 = vadd.f32 %v1212_v1, %v282_v39  ;;  %v284_v49 = vmul.f32 %v1202_v0, %v213_v35  ;;  %v227_v35 = vld [vmem:[%s1207_s20 + $0x1a8] sm:$0xff] }
  0x32   : > { %v415_v47 = vmax.f32 %v351_v38, 0.0  ;;  %1135 = vst [vmem:[%s1244_s26 + $0x78] sm:$0xff] %v1039_v41   ;;  %v1044_v52 = vpack.c.bf16 %v413_v42, %v412_v36  ;;  %v354_v54 = vadd.f32 %v1212_v1, %v283_v44  ;;  %v285_v55 = vmul.f32 %v1202_v0, %v214_v40  ;;  %v228_v40 = vld [vmem:[%s1207_s20 + $0x1b0] sm:$0xff] }
  0x33   : > { %v416_v53 = vmax.f32 %v352_v43, 0.0  ;;  %v417_v58 = vmax.f32 %v353_v48, 0.0  ;;  %v355_v59 = vadd.f32 %v1212_v1, %v284_v49  ;;  %v286_v60 = vmul.f32 %v1202_v0, %v215_v45  ;;  %v229_v45 = vld [vmem:[%s1207_s20 + $0x1b8] sm:$0xff] }
  0x34   : > { %v1049_v57 = vpack.c.bf16 %v415_v47, %v414_v46  ;;  %1136 = vst [vmem:[%s1244_s26 + $0x80] sm:$0xff] %v1044_v52   ;;  %v418_v62 = vmax.f32 %v354_v54, 0.0  ;;  %v356_v63 = vadd.f32 %v1212_v1, %v285_v55  ;;  %v287_v2 = vmul.f32 %v1202_v0, %v216_v50  ;;  %v230_v50 = vld [vmem:[%s1207_s20 + $0x1c0] sm:$0xff]  ;;  %v231_v55 = vld [vmem:[%s1207_s20 + $0x1c8] sm:$0xff] }
  0x35   : > { %v288_v3 = vmul.f32 %v1202_v0, %v217_v51  ;;  %v1054_v5 = vpack.c.bf16 %v417_v58, %v416_v53  ;;  %v419_v6 = vmax.f32 %v355_v59, 0.0  ;;  %v357_v7 = vadd.f32 %v1212_v1, %v286_v60  ;;  %v232_v60 = vld [vmem:[%s1207_s20 + $0x1d0] sm:$0xff] }
  0x36   : > { %1137 = vst [vmem:[%s1244_s26 + $0x88] sm:$0xff] %v1049_v57   ;;  %v289_v8 = vmul.f32 %v1202_v0, %v218_v56  ;;  %v420_v10 = vmax.f32 %v356_v63, 0.0  ;;  %v358_v11 = vadd.f32 %v1212_v1, %v287_v2  ;;  %v290_v13 = vmul.f32 %v1202_v0, %v219_v61  ;;  %v233_v61 = vld [vmem:[%s1207_s20 + $0x1d8] sm:$0xff] }
  0x37   : > { %v359_v12 = vadd.f32 %v1212_v1, %v288_v3  ;;  %1138 = vst [vmem:[%s1244_s26 + $0x90] sm:$0xff] %v1054_v5   ;;  %v1059_v15 = vpack.c.bf16 %v419_v6, %v418_v62  ;;  %v421_v16 = vmax.f32 %v357_v7, 0.0  ;;  %v291_v18 = vmul.f32 %v1202_v0, %v220_v4  ;;  %v234_v4 = vld [vmem:[%s1207_s20 + $0x1e0] sm:$0xff] }
  0x38   : > { %v360_v17 = vadd.f32 %v1212_v1, %v289_v8  ;;  %v422_v20 = vmax.f32 %v358_v11, 0.0  ;;  %v361_v22 = vadd.f32 %v1212_v1, %v290_v13  ;;  %v292_v23 = vmul.f32 %v1202_v0, %v221_v9  ;;  %v235_v9 = vld [vmem:[%s1207_s20 + $0x1e8] sm:$0xff] }
  0x39   : > { %v423_v21 = vmax.f32 %v359_v12, 0.0  ;;  %1139 = vst [vmem:[%s1244_s26 + $0x98] sm:$0xff] %v1059_v15   ;;  %v1064_v26 = vpack.c.bf16 %v421_v16, %v420_v10  ;;  %v362_v28 = vadd.f32 %v1212_v1, %v291_v18  ;;  %v293_v29 = vmul.f32 %v1202_v0, %v222_v14  ;;  %v236_v14 = vld [vmem:[%s1207_s20 + $0x1f0] sm:$0xff] }
  0x3a   : > { %v424_v27 = vmax.f32 %v360_v17, 0.0  ;;  %v425_v32 = vmax.f32 %v361_v22, 0.0  ;;  %v363_v33 = vadd.f32 %v1212_v1, %v292_v23  ;;  %v294_v34 = vmul.f32 %v1202_v0, %v223_v19  ;;  %v237_v19 = vld [vmem:[%s1207_s20 + $0x1f8] sm:$0xff] }
  0x3b   : > { %v1069_v31 = vpack.c.bf16 %v423_v21, %v422_v20  ;;  %1140 = vst [vmem:[%s1244_s26 + $0xa0] sm:$0xff] %v1064_v26   ;;  %v426_v36 = vmax.f32 %v362_v28, 0.0  ;;  %v364_v37 = vadd.f32 %v1212_v1, %v293_v29  ;;  %v295_v38 = vmul.f32 %v1202_v0, %v224_v24 }
  0x3c   : > { %v296_v39 = vmul.f32 %v1202_v0, %v225_v25  ;;  %v1074_v41 = vpack.c.bf16 %v425_v32, %v424_v27  ;;  %v427_v42 = vmax.f32 %v363_v33, 0.0  ;;  %v365_v43 = vadd.f32 %v1212_v1, %v294_v34 }
  0x3d   : > { %1141 = vst [vmem:[%s1244_s26 + $0xa8] sm:$0xff] %v1069_v31   ;;  %v297_v44 = vmul.f32 %v1202_v0, %v226_v30  ;;  %v428_v46 = vmax.f32 %v364_v37, 0.0  ;;  %v366_v47 = vadd.f32 %v1212_v1, %v295_v38  ;;  %v298_v49 = vmul.f32 %v1202_v0, %v227_v35 }
  0x3e   : > { %v367_v48 = vadd.f32 %v1212_v1, %v296_v39  ;;  %1142 = vst [vmem:[%s1244_s26 + $0xb0] sm:$0xff] %v1074_v41   ;;  %v1079_v51 = vpack.c.bf16 %v427_v42, %v426_v36  ;;  %v429_v52 = vmax.f32 %v365_v43, 0.0  ;;  %v299_v54 = vmul.f32 %v1202_v0, %v228_v40 }
  0x3f   : > { %v368_v53 = vadd.f32 %v1212_v1, %v297_v44  ;;  %v430_v56 = vmax.f32 %v366_v47, 0.0  ;;  %v369_v58 = vadd.f32 %v1212_v1, %v298_v49  ;;  %v300_v59 = vmul.f32 %v1202_v0, %v229_v45 }
  0x40   : > { %v431_v57 = vmax.f32 %v367_v48, 0.0  ;;  %1143 = vst [vmem:[%s1244_s26 + $0xb8] sm:$0xff] %v1079_v51   ;;  %v1084_v62 = vpack.c.bf16 %v429_v52, %v428_v46  ;;  %v370_v2 = vadd.f32 %v1212_v1, %v299_v54  ;;  %v301_v3 = vmul.f32 %v1202_v0, %v230_v50 }
  0x41   : > { %v432_v63 = vmax.f32 %v368_v53, 0.0  ;;  %v433_v6 = vmax.f32 %v369_v58, 0.0  ;;  %v371_v7 = vadd.f32 %v1212_v1, %v300_v59  ;;  %v302_v8 = vmul.f32 %v1202_v0, %v231_v55 }
  0x42   : > { %v1089_v5 = vpack.c.bf16 %v431_v57, %v430_v56  ;;  %1144 = vst [vmem:[%s1244_s26 + $0xc0] sm:$0xff] %v1084_v62   ;;  %v434_v10 = vmax.f32 %v370_v2, 0.0  ;;  %v372_v11 = vadd.f32 %v1212_v1, %v301_v3  ;;  %v303_v12 = vmul.f32 %v1202_v0, %v232_v60 }
  0x43   : > { %v304_v13 = vmul.f32 %v1202_v0, %v233_v61  ;;  %v1094_v15 = vpack.c.bf16 %v433_v6, %v432_v63  ;;  %v435_v16 = vmax.f32 %v371_v7, 0.0  ;;  %v373_v17 = vadd.f32 %v1212_v1, %v302_v8 }
  0x44   : > { %1145 = vst [vmem:[%s1244_s26 + $0xc8] sm:$0xff] %v1089_v5   ;;  %v305_v18 = vmul.f32 %v1202_v0, %v234_v4  ;;  %v436_v20 = vmax.f32 %v372_v11, 0.0  ;;  %v374_v21 = vadd.f32 %v1212_v1, %v303_v12  ;;  %v306_v23 = vmul.f32 %v1202_v0, %v235_v9 }
  0x45   : > { %v375_v22 = vadd.f32 %v1212_v1, %v304_v13  ;;  %1146 = vst [vmem:[%s1244_s26 + $0xd0] sm:$0xff] %v1094_v15   ;;  %v1099_v24 = vpack.c.bf16 %v435_v16, %v434_v10  ;;  %v437_v25 = vmax.f32 %v373_v17, 0.0  ;;  %v307_v27 = vmul.f32 %v1202_v0, %v236_v14 }
  0x46   : > { %v376_v26 = vadd.f32 %v1212_v1, %v305_v18  ;;  %v438_v28 = vmax.f32 %v374_v21, 0.0  ;;  %v377_v30 = vadd.f32 %v1212_v1, %v306_v23  ;;  %v308_v31 = vmul.f32 %v1202_v0, %v237_v19 }
  0x47   : > { %v439_v29 = vmax.f32 %v375_v22, 0.0  ;;  %1147 = vst [vmem:[%s1244_s26 + $0xd8] sm:$0xff] %v1099_v24   ;;  %v1104_v32 = vpack.c.bf16 %v437_v25, %v436_v20  ;;  %v378_v34 = vadd.f32 %v1212_v1, %v307_v27 }
  0x48   : > { %v440_v33 = vmax.f32 %v376_v26, 0.0  ;;  %v441_v36 = vmax.f32 %v377_v30, 0.0  ;;  %v379_v37 = vadd.f32 %v1212_v1, %v308_v31 }
  0x49   : > { %v1109_v35 = vpack.c.bf16 %v439_v29, %v438_v28  ;;  %1148 = vst [vmem:[%s1244_s26 + $0xe0] sm:$0xff] %v1104_v32   ;;  %v442_v38 = vmax.f32 %v378_v34, 0.0 }
  0x4a   : > { %v1114_v39 = vpack.c.bf16 %v441_v36, %v440_v33  ;;  %v443_v40 = vmax.f32 %v379_v37, 0.0 }
  0x4b   : > { %1149 = vst [vmem:[%s1244_s26 + $0xe8] sm:$0xff] %v1109_v35  }
  0x4c   : > { %1150 = vst [vmem:[%s1244_s26 + $0xf0] sm:$0xff] %v1114_v39   ;;  %v1119_v41 = vpack.c.bf16 %v443_v40, %v442_v38 }
  0x4e   : > { %1151 = vst [vmem:[%s1244_s26 + $0xf8] sm:$0xff] %v1119_v41  }
  0x4f PF: > { %s13_s12 = sadd.s32 1, %s1166_s12  }
  0x50   : > { %p10_p4 = scmp.ge.s32.totalorder %s13_s12, 4  }
  0x52   :  { %12 = sbr.rel (!%p10_p4) target bundleno = 1 (0x1), region = 62 }

// kernel: in_conv_forward.7
= control target key start
LH: loop header
LB: loop body
LE: loop exit
PB: predicated region body
PF: predicated region fallthrough
CT: control target
= control target key end

     0   :  { %s613_s12 = smov 0   ;;  %s900_s0 = inlined_call_operand.vmem [shape: f32[1024,128], index: 0, kind: input, shape index: {}]   ;;  %s901_s1 = inlined_call_operand.vmem [shape: f32[1,128], index: 1, kind: input, shape index: {}]   ;;  %s902_s2 = inlined_call_operand.vmem [shape: f32[1,128], index: 2, kind: input, shape index: {}]   ;;  %s903_s3 = inlined_call_operand.vmem [shape: f32[1024,128], index: 3, kind: output, shape index: {}]  }
   0x1 LB: > { %s564_s13 = sadd.s32 4294967295, %s591_s12   ;;  %p568_p0 = scmp.ge.s32.totalorder %s591_s12, 1  ;;  %s591_s12 = sphi %s613_s12, %s13_s12  }
   0x2   : > { %p138_p1 = scmp.lt.s32.totalorder %s591_s12, 3 }
   0x4   : > { %p139_p2 = pnand %p568_p0, %p138_p1 }
   0x5   : > { %s569_s14 = sshll.u32 (!%p139_p2), %s564_s13, 6  ;;  %v624_v0 = vld [vmem:[%s901_s1] ss:$0 sm:$0xff] (!%p139_p2) }
   0x6   : > { %142 = sbr.rel (%p139_p2) target bundleno = 70 (0x46), region = 32  ;;  %p163_p3 = scmp.lt.s32.totalorder (!%p139_p2), %s569_s14, 127  ;;  %v634_v1 = vld [vmem:[%s902_s2] ss:$0 sm:$0xff] (!%p139_p2) }
   0xd   : > { %s905_s14 = smov (!%p163_p3, %s569_s14), 127 }
   0xe   : > { %s570_s15 = sshll.u32 %s905_s14, 3 }
   0xf   : > { %s629_s20 = scalar_lea.vmem %s900_s0, %s570_s15  ;;  %s657_s25 = scalar_lea.vmem %s903_s3, %s570_s15 }
  0x10   : > { %v174_v2 = vld [vmem:[%s629_s20] sm:$0xff]  ;;  %v175_v3 = vld [vmem:[%s629_s20 + $0x8] sm:$0xff]  ;;  %v176_v4 = vld [vmem:[%s629_s20 + $0x10] sm:$0xff] }
  0x11   : > { %v245_v5 = vmul.f32 %v624_v0, %v174_v2  ;;  %v246_v6 = vmul.f32 %v624_v0, %v175_v3  ;;  %v247_v7 = vmul.f32 %v624_v0, %v176_v4  ;;  %v177_v8 = vld [vmem:[%s629_s20 + $0x18] sm:$0xff]  ;;  %v178_v9 = vld [vmem:[%s629_s20 + $0x20] sm:$0xff]  ;;  %v179_v10 = vld [vmem:[%s629_s20 + $0x28] sm:$0xff] }
  0x12   : > { %v248_v11 = vmul.f32 %v624_v0, %v177_v8  ;;  %v249_v12 = vmul.f32 %v624_v0, %v178_v9  ;;  %v250_v13 = vmul.f32 %v624_v0, %v179_v10  ;;  %v180_v14 = vld [vmem:[%s629_s20 + $0x30] sm:$0xff]  ;;  %v181_v15 = vld [vmem:[%s629_s20 + $0x38] sm:$0xff]  ;;  %v182_v24 = vld [vmem:[%s629_s20 + $0x40] sm:$0xff] }
  0x13   : > { %v316_v16 = vadd.f32 %v634_v1, %v245_v5  ;;  %v317_v17 = vadd.f32 %v634_v1, %v246_v6  ;;  %v318_v18 = vadd.f32 %v634_v1, %v247_v7  ;;  %v251_v19 = vmul.f32 %v624_v0, %v180_v14  ;;  %v183_v25 = vld [vmem:[%s629_s20 + $0x48] sm:$0xff]  ;;  %v184_v26 = vld [vmem:[%s629_s20 + $0x50] sm:$0xff]  ;;  %v185_v31 = vld [vmem:[%s629_s20 + $0x58] sm:$0xff] }
  0x14   : > { %v319_v20 = vadd.f32 %v634_v1, %v248_v11  ;;  %v320_v21 = vadd.f32 %v634_v1, %v249_v12  ;;  %v321_v22 = vadd.f32 %v634_v1, %v250_v13  ;;  %v252_v23 = vmul.f32 %v624_v0, %v181_v15  ;;  %v186_v32 = vld [vmem:[%s629_s20 + $0x60] sm:$0xff]  ;;  %v187_v33 = vld [vmem:[%s629_s20 + $0x68] sm:$0xff]  ;;  %v188_v38 = vld [vmem:[%s629_s20 + $0x70] sm:$0xff] }
  0x15   : > { %v380_v27 = vmax.f32 %v316_v16, 0.0  ;;  %v381_v28 = vmax.f32 %v317_v17, 0.0  ;;  %v382_v29 = vmax.f32 %v318_v18, 0.0  ;;  %v322_v30 = vadd.f32 %v634_v1, %v251_v19  ;;  %v189_v43 = vld [vmem:[%s629_s20 + $0x78] sm:$0xff]  ;;  %v190_v56 = vld [vmem:[%s629_s20 + $0x80] sm:$0xff]  ;;  %v191_v57 = vld [vmem:[%s629_s20 + $0x88] sm:$0xff] }
  0x16   : > { %v383_v34 = vmax.f32 %v319_v20, 0.0  ;;  %v384_v35 = vmax.f32 %v320_v21, 0.0  ;;  %v385_v36 = vmax.f32 %v321_v22, 0.0  ;;  %v323_v37 = vadd.f32 %v634_v1, %v252_v23  ;;  %v192_v58 = vld [vmem:[%s629_s20 + $0x90] sm:$0xff]  ;;  %v193_v63 = vld [vmem:[%s629_s20 + $0x98] sm:$0xff]  ;;  %v194_v2 = vld [vmem:[%s629_s20 + $0xa0] sm:$0xff] }
  0x17   : > { %444 = vst [vmem:[%s657_s25] sm:$0xff] %v380_v27  ;;  %445 = vst [vmem:[%s657_s25 + $0x8] sm:$0xff] %v381_v28  ;;  %v386_v39 = vmax.f32 %v322_v30, 0.0  ;;  %v253_v40 = vmul.f32 %v624_v0, %v182_v24  ;;  %v254_v41 = vmul.f32 %v624_v0, %v183_v25  ;;  %v255_v42 = vmul.f32 %v624_v0, %v184_v26  ;;  %v195_v3 = vld [vmem:[%s629_s20 + $0xa8] sm:$0xff]  ;;  %v196_v8 = vld [vmem:[%s629_s20 + $0xb0] sm:$0xff] }
  0x18   : > { %446 = vst [vmem:[%s657_s25 + $0x10] sm:$0xff] %v382_v29  ;;  %447 = vst [vmem:[%s657_s25 + $0x18] sm:$0xff] %v383_v34  ;;  %v387_v44 = vmax.f32 %v323_v37, 0.0  ;;  %v256_v45 = vmul.f32 %v624_v0, %v185_v31  ;;  %v257_v46 = vmul.f32 %v624_v0, %v186_v32  ;;  %v258_v47 = vmul.f32 %v624_v0, %v187_v33  ;;  %v197_v13 = vld [vmem:[%s629_s20 + $0xb8] sm:$0xff]  ;;  %v198_v26 = vld [vmem:[%s629_s20 + $0xc0] sm:$0xff] }
  0x19   : > { %448 = vst [vmem:[%s657_s25 + $0x20] sm:$0xff] %v384_v35  ;;  %449 = vst [vmem:[%s657_s25 + $0x28] sm:$0xff] %v385_v36  ;;  %v324_v48 = vadd.f32 %v634_v1, %v253_v40  ;;  %v325_v49 = vadd.f32 %v634_v1, %v254_v41  ;;  %v326_v50 = vadd.f32 %v634_v1, %v255_v42  ;;  %v199_v27 = vld [vmem:[%s629_s20 + $0xc8] sm:$0xff]  ;;  %v200_v28 = vld [vmem:[%s629_s20 + $0xd0] sm:$0xff] }
  0x1a   : > { %450 = vst [vmem:[%s657_s25 + $0x30] sm:$0xff] %v386_v39  ;;  %v259_v51 = vmul.f32 %v624_v0, %v188_v38  ;;  %451 = vst [vmem:[%s657_s25 + $0x38] sm:$0xff] %v387_v44  ;;  %v327_v52 = vadd.f32 %v634_v1, %v256_v45  ;;  %v328_v53 = vadd.f32 %v634_v1, %v257_v46  ;;  %v201_v33 = vld [vmem:[%s629_s20 + $0xd8] sm:$0xff]  ;;  %v202_v34 = vld [vmem:[%s629_s20 + $0xe0] sm:$0xff] }
  0x1b   : > { %v329_v54 = vadd.f32 %v634_v1, %v258_v47  ;;  %v260_v55 = vmul.f32 %v624_v0, %v189_v43  ;;  %v388_v59 = vmax.f32 %v324_v48, 0.0  ;;  %v389_v60 = vmax.f32 %v325_v49, 0.0  ;;  %v203_v35 = vld [vmem:[%s629_s20 + $0xe8] sm:$0xff]  ;;  %v204_v40 = vld [vmem:[%s629_s20 + $0xf0] sm:$0xff]  ;;  %v205_v45 = vld [vmem:[%s629_s20 + $0xf8] sm:$0xff] }
  0x1c   : > { %v390_v61 = vmax.f32 %v326_v50, 0.0  ;;  %v330_v62 = vadd.f32 %v634_v1, %v259_v51  ;;  %v391_v4 = vmax.f32 %v327_v52, 0.0  ;;  %v392_v5 = vmax.f32 %v328_v53, 0.0 }
  0x1d   : > { %v393_v6 = vmax.f32 %v329_v54, 0.0  ;;  %v331_v7 = vadd.f32 %v634_v1, %v260_v55  ;;  %452 = vst [vmem:[%s657_s25 + $0x40] sm:$0xff] %v388_v59  ;;  %453 = vst [vmem:[%s657_s25 + $0x48] sm:$0xff] %v389_v60  ;;  %v261_v10 = vmul.f32 %v624_v0, %v190_v56  ;;  %v262_v11 = vmul.f32 %v624_v0, %v191_v57  ;;  %v207_v59 = vld [vmem:[%s629_s20 + $0x108] sm:$0xff]  ;;  %v208_v60 = vld [vmem:[%s629_s20 + $0x110] sm:$0xff] }
  0x1e   : > { %454 = vst [vmem:[%s657_s25 + $0x50] sm:$0xff] %v390_v61  ;;  %v394_v9 = vmax.f32 %v330_v62, 0.0  ;;  %v263_v12 = vmul.f32 %v624_v0, %v192_v58  ;;  %455 = vst [vmem:[%s657_s25 + $0x58] sm:$0xff] %v391_v4  ;;  %v264_v15 = vmul.f32 %v624_v0, %v193_v63  ;;  %v265_v16 = vmul.f32 %v624_v0, %v194_v2  ;;  %v206_v58 = vld [vmem:[%s629_s20 + $0x100] sm:$0xff] }
  0x1f   : > { %456 = vst [vmem:[%s657_s25 + $0x60] sm:$0xff] %v392_v5  ;;  %457 = vst [vmem:[%s657_s25 + $0x68] sm:$0xff] %v393_v6  ;;  %v395_v14 = vmax.f32 %v331_v7, 0.0  ;;  %v266_v17 = vmul.f32 %v624_v0, %v195_v3  ;;  %v332_v18 = vadd.f32 %v634_v1, %v261_v10  ;;  %v333_v19 = vadd.f32 %v634_v1, %v262_v11  ;;  %v209_v3 = vld [vmem:[%s629_s20 + $0x118] sm:$0xff]  ;;  %v210_v4 = vld [vmem:[%s629_s20 + $0x120] sm:$0xff] }
  0x20   : > { %458 = vst [vmem:[%s657_s25 + $0x70] sm:$0xff] %v394_v9  ;;  %v334_v20 = vadd.f32 %v634_v1, %v263_v12  ;;  %v267_v21 = vmul.f32 %v624_v0, %v196_v8  ;;  %v335_v22 = vadd.f32 %v634_v1, %v264_v15  ;;  %v336_v23 = vadd.f32 %v634_v1, %v265_v16  ;;  %v211_v5 = vld [vmem:[%s629_s20 + $0x128] sm:$0xff]  ;;  %v212_v10 = vld [vmem:[%s629_s20 + $0x130] sm:$0xff]  ;;  %v213_v15 = vld [vmem:[%s629_s20 + $0x138] sm:$0xff] }
  0x21   : > { %459 = vst [vmem:[%s657_s25 + $0x78] sm:$0xff] %v395_v14  ;;  %v337_v24 = vadd.f32 %v634_v1, %v266_v17  ;;  %v268_v25 = vmul.f32 %v624_v0, %v197_v13  ;;  %v396_v29 = vmax.f32 %v332_v18, 0.0  ;;  %v397_v30 = vmax.f32 %v333_v19, 0.0 }
  0x22   : > { %v398_v31 = vmax.f32 %v334_v20, 0.0  ;;  %v338_v32 = vadd.f32 %v634_v1, %v267_v21  ;;  %v399_v36 = vmax.f32 %v335_v22, 0.0  ;;  %v400_v37 = vmax.f32 %v336_v23, 0.0 }
  0x23   : > { %v401_v38 = vmax.f32 %v337_v24, 0.0  ;;  %v339_v39 = vadd.f32 %v634_v1, %v268_v25  ;;  %460 = vst [vmem:[%s657_s25 + $0x80] sm:$0xff] %v396_v29  ;;  %461 = vst [vmem:[%s657_s25 + $0x88] sm:$0xff] %v397_v30  ;;  %v269_v42 = vmul.f32 %v624_v0, %v198_v26  ;;  %v270_v43 = vmul.f32 %v624_v0, %v199_v27  ;;  %v215_v29 = vld [vmem:[%s629_s20 + $0x148] sm:$0xff]  ;;  %v216_v30 = vld [vmem:[%s629_s20 + $0x150] sm:$0xff] }
  0x24   : > { %462 = vst [vmem:[%s657_s25 + $0x90] sm:$0xff] %v398_v31  ;;  %v402_v41 = vmax.f32 %v338_v32, 0.0  ;;  %v271_v44 = vmul.f32 %v624_v0, %v200_v28  ;;  %463 = vst [vmem:[%s657_s25 + $0x98] sm:$0xff] %v399_v36  ;;  %v272_v47 = vmul.f32 %v624_v0, %v201_v33  ;;  %v273_v48 = vmul.f32 %v624_v0, %v202_v34  ;;  %v214_v28 = vld [vmem:[%s629_s20 + $0x140] sm:$0xff] }
  0x25   : > { %464 = vst [vmem:[%s657_s25 + $0xa0] sm:$0xff] %v400_v37  ;;  %465 = vst [vmem:[%s657_s25 + $0xa8] sm:$0xff] %v401_v38  ;;  %v403_v46 = vmax.f32 %v339_v39, 0.0  ;;  %v274_v49 = vmul.f32 %v624_v0, %v203_v35  ;;  %v340_v50 = vadd.f32 %v634_v1, %v269_v42  ;;  %v341_v51 = vadd.f32 %v634_v1, %v270_v43  ;;  %v217_v35 = vld [vmem:[%s629_s20 + $0x158] sm:$0xff]  ;;  %v218_v36 = vld [vmem:[%s629_s20 + $0x160] sm:$0xff] }
  0x26   : > { %466 = vst [vmem:[%s657_s25 + $0xb0] sm:$0xff] %v402_v41  ;;  %v342_v52 = vadd.f32 %v634_v1, %v271_v44  ;;  %v275_v53 = vmul.f32 %v624_v0, %v204_v40  ;;  %v343_v54 = vadd.f32 %v634_v1, %v272_v47  ;;  %v344_v55 = vadd.f32 %v634_v1, %v273_v48  ;;  %v219_v37 = vld [vmem:[%s629_s20 + $0x168] sm:$0xff]  ;;  %v220_v42 = vld [vmem:[%s629_s20 + $0x170] sm:$0xff]  ;;  %v221_v47 = vld [vmem:[%s629_s20 + $0x178] sm:$0xff] }
  0x27   : > { %467 = vst [vmem:[%s657_s25 + $0xb8] sm:$0xff] %v403_v46  ;;  %v345_v56 = vadd.f32 %v634_v1, %v274_v49  ;;  %v276_v57 = vmul.f32 %v624_v0, %v205_v45  ;;  %v404_v61 = vmax.f32 %v340_v50, 0.0  ;;  %v405_v62 = vmax.f32 %v341_v51, 0.0 }
  0x28   : > { %v406_v63 = vmax.f32 %v342_v52, 0.0  ;;  %v346_v2 = vadd.f32 %v634_v1, %v275_v53  ;;  %v407_v6 = vmax.f32 %v343_v54, 0.0  ;;  %v408_v7 = vmax.f32 %v344_v55, 0.0 }
  0x29   : > { %v409_v8 = vmax.f32 %v345_v56, 0.0  ;;  %v347_v9 = vadd.f32 %v634_v1, %v276_v57  ;;  %468 = vst [vmem:[%s657_s25 + $0xc0] sm:$0xff] %v404_v61  ;;  %469 = vst [vmem:[%s657_s25 + $0xc8] sm:$0xff] %v405_v62  ;;  %v277_v12 = vmul.f32 %v624_v0, %v206_v58  ;;  %v278_v13 = vmul.f32 %v624_v0, %v207_v59  ;;  %v223_v61 = vld [vmem:[%s629_s20 + $0x188] sm:$0xff]  ;;  %v224_v62 = vld [vmem:[%s629_s20 + $0x190] sm:$0xff] }
  0x2a   : > { %470 = vst [vmem:[%s657_s25 + $0xd0] sm:$0xff] %v406_v63  ;;  %v410_v11 = vmax.f32 %v346_v2, 0.0  ;;  %v279_v14 = vmul.f32 %v624_v0, %v208_v60  ;;  %471 = vst [vmem:[%s657_s25 + $0xd8] sm:$0xff] %v407_v6  ;;  %v280_v17 = vmul.f32 %v624_v0, %v209_v3  ;;  %v281_v18 = vmul.f32 %v624_v0, %v210_v4  ;;  %v222_v60 = vld [vmem:[%s629_s20 + $0x180] sm:$0xff] }
  0x2b   : > { %472 = vst [vmem:[%s657_s25 + $0xe0] sm:$0xff] %v408_v7  ;;  %473 = vst [vmem:[%s657_s25 + $0xe8] sm:$0xff] %v409_v8  ;;  %v411_v16 = vmax.f32 %v347_v9, 0.0  ;;  %v282_v19 = vmul.f32 %v624_v0, %v211_v5  ;;  %v348_v20 = vadd.f32 %v634_v1, %v277_v12  ;;  %v349_v21 = vadd.f32 %v634_v1, %v278_v13  ;;  %v225_v5 = vld [vmem:[%s629_s20 + $0x198] sm:$0xff]  ;;  %v226_v6 = vld [vmem:[%s629_s20 + $0x1a0] sm:$0xff] }
  0x2c   : > { %474 = vst [vmem:[%s657_s25 + $0xf0] sm:$0xff] %v410_v11  ;;  %v350_v22 = vadd.f32 %v634_v1, %v279_v14  ;;  %v283_v23 = vmul.f32 %v624_v0, %v212_v10  ;;  %v351_v24 = vadd.f32 %v634_v1, %v280_v17  ;;  %v352_v25 = vadd.f32 %v634_v1, %v281_v18  ;;  %v227_v7 = vld [vmem:[%s629_s20 + $0x1a8] sm:$0xff]  ;;  %v228_v12 = vld [vmem:[%s629_s20 + $0x1b0] sm:$0xff]  ;;  %v229_v17 = vld [vmem:[%s629_s20 + $0x1b8] sm:$0xff] }
  0x2d   : > { %475 = vst [vmem:[%s657_s25 + $0xf8] sm:$0xff] %v411_v16  ;;  %v353_v26 = vadd.f32 %v634_v1, %v282_v19  ;;  %v284_v27 = vmul.f32 %v624_v0, %v213_v15  ;;  %v412_v31 = vmax.f32 %v348_v20, 0.0  ;;  %v413_v32 = vmax.f32 %v349_v21, 0.0 }
  0x2e   : > { %v414_v33 = vmax.f32 %v350_v22, 0.0  ;;  %v354_v34 = vadd.f32 %v634_v1, %v283_v23  ;;  %v415_v38 = vmax.f32 %v351_v24, 0.0  ;;  %v416_v39 = vmax.f32 %v352_v25, 0.0 }
  0x2f   : > { %v417_v40 = vmax.f32 %v353_v26, 0.0  ;;  %v355_v41 = vadd.f32 %v634_v1, %v284_v27  ;;  %476 = vst [vmem:[%s657_s25 + $0x100] sm:$0xff] %v412_v31  ;;  %477 = vst [vmem:[%s657_s25 + $0x108] sm:$0xff] %v413_v32  ;;  %v285_v44 = vmul.f32 %v624_v0, %v214_v28  ;;  %v286_v45 = vmul.f32 %v624_v0, %v215_v29  ;;  %v231_v31 = vld [vmem:[%s629_s20 + $0x1c8] sm:$0xff]  ;;  %v232_v32 = vld [vmem:[%s629_s20 + $0x1d0] sm:$0xff] }
  0x30   : > { %478 = vst [vmem:[%s657_s25 + $0x110] sm:$0xff] %v414_v33  ;;  %v418_v43 = vmax.f32 %v354_v34, 0.0  ;;  %v287_v46 = vmul.f32 %v624_v0, %v216_v30  ;;  %479 = vst [vmem:[%s657_s25 + $0x118] sm:$0xff] %v415_v38  ;;  %v288_v49 = vmul.f32 %v624_v0, %v217_v35  ;;  %v289_v50 = vmul.f32 %v624_v0, %v218_v36  ;;  %v230_v30 = vld [vmem:[%s629_s20 + $0x1c0] sm:$0xff] }
  0x31   : > { %480 = vst [vmem:[%s657_s25 + $0x120] sm:$0xff] %v416_v39  ;;  %481 = vst [vmem:[%s657_s25 + $0x128] sm:$0xff] %v417_v40  ;;  %v419_v48 = vmax.f32 %v355_v41, 0.0  ;;  %v290_v51 = vmul.f32 %v624_v0, %v219_v37  ;;  %v356_v52 = vadd.f32 %v634_v1, %v285_v44  ;;  %v357_v53 = vadd.f32 %v634_v1, %v286_v45  ;;  %v233_v37 = vld [vmem:[%s629_s20 + $0x1d8] sm:$0xff]  ;;  %v234_v38 = vld [vmem:[%s629_s20 + $0x1e0] sm:$0xff] }
  0x32   : > { %482 = vst [vmem:[%s657_s25 + $0x130] sm:$0xff] %v418_v43  ;;  %v358_v54 = vadd.f32 %v634_v1, %v287_v46  ;;  %v291_v55 = vmul.f32 %v624_v0, %v220_v42  ;;  %v359_v56 = vadd.f32 %v634_v1, %v288_v49  ;;  %v360_v57 = vadd.f32 %v634_v1, %v289_v50  ;;  %v235_v39 = vld [vmem:[%s629_s20 + $0x1e8] sm:$0xff]  ;;  %v236_v44 = vld [vmem:[%s629_s20 + $0x1f0] sm:$0xff]  ;;  %v237_v49 = vld [vmem:[%s629_s20 + $0x1f8] sm:$0xff] }
  0x33   : > { %483 = vst [vmem:[%s657_s25 + $0x138] sm:$0xff] %v419_v48  ;;  %v361_v58 = vadd.f32 %v634_v1, %v290_v51  ;;  %v292_v59 = vmul.f32 %v624_v0, %v221_v47  ;;  %v420_v63 = vmax.f32 %v356_v52, 0.0  ;;  %v421_v2 = vmax.f32 %v357_v53, 0.0 }
  0x34   : > { %v422_v3 = vmax.f32 %v358_v54, 0.0  ;;  %v362_v4 = vadd.f32 %v634_v1, %v291_v55  ;;  %v423_v8 = vmax.f32 %v359_v56, 0.0  ;;  %v424_v9 = vmax.f32 %v360_v57, 0.0 }
  0x35   : > { %v425_v10 = vmax.f32 %v361_v58, 0.0  ;;  %v363_v11 = vadd.f32 %v634_v1, %v292_v59  ;;  %484 = vst [vmem:[%s657_s25 + $0x140] sm:$0xff] %v420_v63  ;;  %485 = vst [vmem:[%s657_s25 + $0x148] sm:$0xff] %v421_v2  ;;  %v293_v14 = vmul.f32 %v624_v0, %v222_v60  ;;  %v294_v15 = vmul.f32 %v624_v0, %v223_v61 }
  0x36   : > { %486 = vst [vmem:[%s657_s25 + $0x150] sm:$0xff] %v422_v3  ;;  %v426_v13 = vmax.f32 %v362_v4, 0.0  ;;  %v295_v16 = vmul.f32 %v624_v0, %v224_v62  ;;  %487 = vst [vmem:[%s657_s25 + $0x158] sm:$0xff] %v423_v8  ;;  %v296_v19 = vmul.f32 %v624_v0, %v225_v5  ;;  %v297_v20 = vmul.f32 %v624_v0, %v226_v6 }
  0x37   : > { %488 = vst [vmem:[%s657_s25 + $0x160] sm:$0xff] %v424_v9  ;;  %489 = vst [vmem:[%s657_s25 + $0x168] sm:$0xff] %v425_v10  ;;  %v427_v18 = vmax.f32 %v363_v11, 0.0  ;;  %v298_v21 = vmul.f32 %v624_v0, %v227_v7  ;;  %v364_v22 = vadd.f32 %v634_v1, %v293_v14  ;;  %v365_v23 = vadd.f32 %v634_v1, %v294_v15 }
  0x38   : > { %490 = vst [vmem:[%s657_s25 + $0x170] sm:$0xff] %v426_v13  ;;  %v366_v24 = vadd.f32 %v634_v1, %v295_v16  ;;  %v299_v25 = vmul.f32 %v624_v0, %v228_v12  ;;  %v367_v26 = vadd.f32 %v634_v1, %v296_v19  ;;  %v368_v27 = vadd.f32 %v634_v1, %v297_v20 }
  0x39   : > { %491 = vst [vmem:[%s657_s25 + $0x178] sm:$0xff] %v427_v18  ;;  %v369_v28 = vadd.f32 %v634_v1, %v298_v21  ;;  %v300_v29 = vmul.f32 %v624_v0, %v229_v17  ;;  %v428_v33 = vmax.f32 %v364_v22, 0.0  ;;  %v429_v34 = vmax.f32 %v365_v23, 0.0 }
  0x3a   : > { %v430_v35 = vmax.f32 %v366_v24, 0.0  ;;  %v370_v36 = vadd.f32 %v634_v1, %v299_v25  ;;  %v431_v40 = vmax.f32 %v367_v26, 0.0  ;;  %v432_v41 = vmax.f32 %v368_v27, 0.0 }
  0x3b   : > { %v433_v42 = vmax.f32 %v369_v28, 0.0  ;;  %v371_v43 = vadd.f32 %v634_v1, %v300_v29  ;;  %492 = vst [vmem:[%s657_s25 + $0x180] sm:$0xff] %v428_v33  ;;  %493 = vst [vmem:[%s657_s25 + $0x188] sm:$0xff] %v429_v34  ;;  %v301_v46 = vmul.f32 %v624_v0, %v230_v30  ;;  %v302_v47 = vmul.f32 %v624_v0, %v231_v31 }
  0x3c   : > { %494 = vst [vmem:[%s657_s25 + $0x190] sm:$0xff] %v430_v35  ;;  %v434_v45 = vmax.f32 %v370_v36, 0.0  ;;  %v303_v48 = vmul.f32 %v624_v0, %v232_v32  ;;  %495 = vst [vmem:[%s657_s25 + $0x198] sm:$0xff] %v431_v40  ;;  %v304_v51 = vmul.f32 %v624_v0, %v233_v37  ;;  %v305_v52 = vmul.f32 %v624_v0, %v234_v38 }
  0x3d   : > { %496 = vst [vmem:[%s657_s25 + $0x1a0] sm:$0xff] %v432_v41  ;;  %497 = vst [vmem:[%s657_s25 + $0x1a8] sm:$0xff] %v433_v42  ;;  %v435_v50 = vmax.f32 %v371_v43, 0.0  ;;  %v306_v53 = vmul.f32 %v624_v0, %v235_v39  ;;  %v372_v54 = vadd.f32 %v634_v1, %v301_v46  ;;  %v373_v55 = vadd.f32 %v634_v1, %v302_v47 }
  0x3e   : > { %498 = vst [vmem:[%s657_s25 + $0x1b0] sm:$0xff] %v434_v45  ;;  %v374_v56 = vadd.f32 %v634_v1, %v303_v48  ;;  %v307_v57 = vmul.f32 %v624_v0, %v236_v44  ;;  %v375_v58 = vadd.f32 %v634_v1, %v304_v51  ;;  %v376_v59 = vadd.f32 %v634_v1, %v305_v52 }
  0x3f   : > { %499 = vst [vmem:[%s657_s25 + $0x1b8] sm:$0xff] %v435_v50  ;;  %v377_v60 = vadd.f32 %v634_v1, %v306_v53  ;;  %v308_v61 = vmul.f32 %v624_v0, %v237_v49  ;;  %v436_v62 = vmax.f32 %v372_v54, 0.0  ;;  %v437_v63 = vmax.f32 %v373_v55, 0.0 }
  0x40   : > { %v438_v2 = vmax.f32 %v374_v56, 0.0  ;;  %v378_v3 = vadd.f32 %v634_v1, %v307_v57  ;;  %v439_v4 = vmax.f32 %v375_v58, 0.0  ;;  %v440_v5 = vmax.f32 %v376_v59, 0.0 }
  0x41   : > { %v441_v6 = vmax.f32 %v377_v60, 0.0  ;;  %v379_v7 = vadd.f32 %v634_v1, %v308_v61  ;;  %500 = vst [vmem:[%s657_s25 + $0x1c0] sm:$0xff] %v436_v62  ;;  %501 = vst [vmem:[%s657_s25 + $0x1c8] sm:$0xff] %v437_v63 }
  0x42   : > { %502 = vst [vmem:[%s657_s25 + $0x1d0] sm:$0xff] %v438_v2  ;;  %v442_v8 = vmax.f32 %v378_v3, 0.0  ;;  %503 = vst [vmem:[%s657_s25 + $0x1d8] sm:$0xff] %v439_v4 }
  0x43   : > { %504 = vst [vmem:[%s657_s25 + $0x1e0] sm:$0xff] %v440_v5  ;;  %505 = vst [vmem:[%s657_s25 + $0x1e8] sm:$0xff] %v441_v6  ;;  %v443_v0 = vmax.f32 %v379_v7, 0.0 }
  0x44   : > { %506 = vst [vmem:[%s657_s25 + $0x1f0] sm:$0xff] %v442_v8 }
  0x45   : > { %507 = vst [vmem:[%s657_s25 + $0x1f8] sm:$0xff] %v443_v0 }
  0x46 PF: > { %s13_s12 = sadd.s32 1, %s591_s12  }
  0x47   : > { %p10_p4 = scmp.ge.s32.totalorder %s13_s12, 4  }
  0x49   :  { %12 = sbr.rel (!%p10_p4) target bundleno = 1 (0x1), region = 62 }

// kernel: in_conv_forward.6
= control target key start
LH: loop header
LB: loop body
LE: loop exit
PB: predicated region body
PF: predicated region fallthrough
CT: control target
= control target key end

     0   :  { %s2118_s15 = smov 0   ;;  %s2797_s0 = inlined_call_operand.vmem [shape: bf16[1024,256], index: 0, kind: input, shape index: {}]   ;;  %s2798_s1 = inlined_call_operand.vmem [shape: bf16[256,128], index: 1, kind: input, shape index: {}]   ;;  %s2799_s2 = inlined_call_operand.vmem [shape: f32[1,128], index: 2, kind: input, shape index: {}]   ;;  %s2800_s3 = inlined_call_operand.vmem [shape: f32[1024,128], index: 3, kind: output, shape index: {0}]   ;;  %s2801_s4 = inlined_call_operand.vmem [shape: f32[2,2,128], index: 4, kind: output, shape index: {1}]  }
   0x1 LB: > { %s2124_s16 = sadd.s32 4294967295, %s2089_s15   ;;  %p1771_p0 = scmp.ge.s32.totalorder %s2089_s15, 1  ;;  %s2089_s15 = sphi %s2118_s15, %s15_s15  }
   0x2   : > { %p167_p1 = scmp.lt.s32.totalorder %s2089_s15, 3 }
   0x4   : > { %p168_p2 = pnand %p1771_p0, %p167_p1 }
   0x5   : > { %v1969_v0 = vld [vmem:[%s2798_s1] sm:$0xff] (!%p168_p2)   ;;  %v2091_v1 = vmov (!%p168_p2), 0   ;;  %s1772_s19 = sshll.u32 (!%p168_p2), %s2124_s16, 6  ;;  %v1970_v2 = vld [vmem:[%s2798_s1 + $0x8] sm:$0xff] (!%p168_p2)   ;;  %v1971_v3 = vld [vmem:[%s2798_s1 + $0x10] sm:$0xff] (!%p168_p2)   ;;  %s1859_s7 = sshll.u32 (!%p168_p2), %s2124_s16, 9 }
   0x6   : > { %171 = sbr.rel (%p168_p2) target bundleno = 490 (0x1ea), region = 32  ;;  %735 = vmatprep.subr.bf16.mxu0 (!%p168_p2), %v2091_v1  ;;  %1927 = vmatprep.subr.bf16.mxu1 (!%p168_p2), %v2091_v1  ;;  %p199_p3 = scmp.lt.s32.totalorder (!%p168_p2), %s1772_s19, 127  ;;  %v1972_v4 = vld [vmem:[%s2798_s1 + $0x18] sm:$0xff] (!%p168_p2)   ;;  %v1973_v5 = vld [vmem:[%s2798_s1 + $0x20] sm:$0xff] (!%p168_p2)   ;;  %v1974_v7 = vld [vmem:[%s2798_s1 + $0x28] sm:$0xff] (!%p168_p2)  }
   0x7   : > { %736 = vmatpush1.bf16.msra.mxu0 (!%p168_p2), %v1969_v0  ;;  %1943 = vmatpush1.bf16.msra.mxu1 (!%p168_p2), %v1969_v0  ;;  %v1975_v8 = vld [vmem:[%s2798_s1 + $0x30] sm:$0xff] (!%p168_p2)   ;;  %v1976_v9 = vld [vmem:[%s2798_s1 + $0x38] sm:$0xff] (!%p168_p2)   ;;  %v1977_v11 = vld [vmem:[%s2798_s1 + $0x40] sm:$0xff] (!%p168_p2)   ;;  %p211_p4 = scmp.lt.s32.totalorder (!%p168_p2), %s2124_s16, 1 }
   0x8   : > { %737 = vmatprep.subr.bf16.mxu0 (!%p168_p2), %v2091_v1  ;;  %1928 = vmatprep.subr.bf16.mxu1 (!%p168_p2), %v2091_v1  ;;  %v1978_v12 = vld [vmem:[%s2798_s1 + $0x48] sm:$0xff] (!%p168_p2)   ;;  %v1979_v13 = vld [vmem:[%s2798_s1 + $0x50] sm:$0xff] (!%p168_p2)   ;;  %v1980_v14 = vld [vmem:[%s2798_s1 + $0x58] sm:$0xff] (!%p168_p2)  }
   0x9   : > { %v1981_v15 = vld [vmem:[%s2798_s1 + $0x60] sm:$0xff] (!%p168_p2)   ;;  %v1982_v16 = vld [vmem:[%s2798_s1 + $0x68] sm:$0xff] (!%p168_p2)   ;;  %v1983_v17 = vld [vmem:[%s2798_s1 + $0x70] sm:$0xff] (!%p168_p2)  }
   0xa   : > { %v1984_v18 = vld [vmem:[%s2798_s1 + $0x78] sm:$0xff] (!%p168_p2)  }
   0xb   : > { %738 = vmatpush1.bf16.msra.mxu0 (!%p168_p2), %v1970_v2  ;;  %1944 = vmatpush1.bf16.msra.mxu1 (!%p168_p2), %v1970_v2 }
   0xc   : > { %739 = vmatprep.subr.bf16.mxu0 (!%p168_p2), %v2091_v1  ;;  %1929 = vmatprep.subr.bf16.mxu1 (!%p168_p2), %v2091_v1 }
   0xd   : > { %s2803_s19 = smov (!%p199_p3, %s1772_s19), 127  ;;  %s2805_s16 = smov (!%p211_p4, %s2124_s16), 1 }
   0xe   : > { %s1926_s26 = sshll.u32 %s2803_s19, 3  ;;  %s1777_s19 = sshll.u32 %s2805_s16, 1 }
   0xf   : > { %740 = vmatpush1.bf16.msra.mxu0 %v1971_v3  ;;  %1945 = vmatpush1.bf16.msra.mxu1 %v1971_v3  ;;  %s2160_s5 = scalar_lea.vmem %s2797_s0, %s1926_s26  ;;  %s2304_s11 = scalar_lea.vmem %s2800_s3, %s1926_s26 }
  0x10   : > { %741 = vmatprep.subr.bf16.mxu0 %v2091_v1  ;;  %1930 = vmatprep.subr.bf16.mxu1 %v2091_v1  ;;  %v1987_v6 = vld [vmem:[%s2160_s5 + $0x4] ss:$8 sps:$4 sm:$0xff]   ;;  %v1985_v19 = vld [vmem:[%s2160_s5] ss:$8 sps:$4 sm:$0xff]   ;;  %v1988_v21 = vld [vmem:[%s2160_s5 + $0x14] ss:$8 sps:$4 sm:$0xff]   ;;  %s214_s13 = scalar_lea.vmem %s2801_s4, %s1777_s19 }
  0x11   : > { %767 = vmatprep.mubr.bf16.mxu0 %v1987_v6  ;;  %v2011_v10 = vld [vmem:[%s2160_s5 + $0x104] ss:$8 sps:$4 sm:$0xff]   ;;  %v2009_v20 = vld [vmem:[%s2160_s5 + $0x100] ss:$8 sps:$4 sm:$0xff]   ;;  %v2015_v22 = vld [vmem:[%s2160_s5 + $0x114] ss:$8 sps:$4 sm:$0xff]  }
  0x12   : > { %895 = vmatprep.mubr.bf16.mxu1 %v2011_v10  ;;  %v1990_v23 = vld [vmem:[%s2160_s5 + $0x10] ss:$8 sps:$4 sm:$0xff]   ;;  %v1991_v25 = vld [vmem:[%s2160_s5 + $0x24] ss:$8 sps:$4 sm:$0xff]   ;;  %v1993_v27 = vld [vmem:[%s2160_s5 + $0x20] ss:$8 sps:$4 sm:$0xff]  }
  0x13   : > { %742 = vmatpush1.bf16.msra.mxu0 %v1972_v4  ;;  %1946 = vmatpush1.bf16.msra.mxu1 %v1972_v4  ;;  %v2017_v24 = vld [vmem:[%s2160_s5 + $0x110] ss:$8 sps:$4 sm:$0xff]   ;;  %v2021_v26 = vld [vmem:[%s2160_s5 + $0x124] ss:$8 sps:$4 sm:$0xff]   ;;  %v2023_v28 = vld [vmem:[%s2160_s5 + $0x120] ss:$8 sps:$4 sm:$0xff]  }
  0x14   : > { %743 = vmatprep.subr.bf16.mxu0 %v2091_v1  ;;  %1931 = vmatprep.subr.bf16.mxu1 %v2091_v1  ;;  %v1994_v29 = vld [vmem:[%s2160_s5 + $0x34] ss:$8 sps:$4 sm:$0xff]   ;;  %v1996_v31 = vld [vmem:[%s2160_s5 + $0x30] ss:$8 sps:$4 sm:$0xff]   ;;  %v1997_v33 = vld [vmem:[%s2160_s5 + $0x44] ss:$8 sps:$4 sm:$0xff]  }
  0x15   : > { %v2027_v30 = vld [vmem:[%s2160_s5 + $0x134] ss:$8 sps:$4 sm:$0xff]   ;;  %v2029_v32 = vld [vmem:[%s2160_s5 + $0x130] ss:$8 sps:$4 sm:$0xff]   ;;  %v2033_v34 = vld [vmem:[%s2160_s5 + $0x144] ss:$8 sps:$4 sm:$0xff]  }
  0x16   : > { %v1999_v35 = vld [vmem:[%s2160_s5 + $0x40] ss:$8 sps:$4 sm:$0xff]   ;;  %v2000_v37 = vld [vmem:[%s2160_s5 + $0x54] ss:$8 sps:$4 sm:$0xff]   ;;  %v2002_v39 = vld [vmem:[%s2160_s5 + $0x50] ss:$8 sps:$4 sm:$0xff]  }
  0x17   : > { %744 = vmatpush1.bf16.msra.mxu0 %v1973_v5  ;;  %1947 = vmatpush1.bf16.msra.mxu1 %v1973_v5  ;;  %v2035_v36 = vld [vmem:[%s2160_s5 + $0x140] ss:$8 sps:$4 sm:$0xff]   ;;  %v2039_v38 = vld [vmem:[%s2160_s5 + $0x154] ss:$8 sps:$4 sm:$0xff]   ;;  %v2041_v40 = vld [vmem:[%s2160_s5 + $0x150] ss:$8 sps:$4 sm:$0xff]  }
  0x18   : > { %745 = vmatprep.subr.bf16.mxu0 %v2091_v1  ;;  %1932 = vmatprep.subr.bf16.mxu1 %v2091_v1  ;;  %v2003_v41 = vld [vmem:[%s2160_s5 + $0x64] ss:$8 sps:$4 sm:$0xff]   ;;  %v2005_v43 = vld [vmem:[%s2160_s5 + $0x60] ss:$8 sps:$4 sm:$0xff]   ;;  %v2006_v45 = vld [vmem:[%s2160_s5 + $0x74] ss:$8 sps:$4 sm:$0xff]  }
  0x19   : > { %v2045_v42 = vld [vmem:[%s2160_s5 + $0x164] ss:$8 sps:$4 sm:$0xff]   ;;  %v2047_v44 = vld [vmem:[%s2160_s5 + $0x160] ss:$8 sps:$4 sm:$0xff]   ;;  %v2051_v46 = vld [vmem:[%s2160_s5 + $0x174] ss:$8 sps:$4 sm:$0xff]  }
  0x1a   : > { %v2008_v47 = vld [vmem:[%s2160_s5 + $0x70] ss:$8 sps:$4 sm:$0xff]   ;;  %v2012_v49 = vld [vmem:[%s2160_s5 + $0x84] ss:$8 sps:$4 sm:$0xff]   ;;  %v2014_v51 = vld [vmem:[%s2160_s5 + $0x80] ss:$8 sps:$4 sm:$0xff]  }
  0x1b   : > { %746 = vmatpush1.bf16.msra.mxu0 %v1974_v7  ;;  %1948 = vmatpush1.bf16.msra.mxu1 %v1974_v7  ;;  %v2053_v48 = vld [vmem:[%s2160_s5 + $0x170] ss:$8 sps:$4 sm:$0xff]   ;;  %v2057_v50 = vld [vmem:[%s2160_s5 + $0x184] ss:$8 sps:$4 sm:$0xff]   ;;  %v2059_v52 = vld [vmem:[%s2160_s5 + $0x180] ss:$8 sps:$4 sm:$0xff]  }
  0x1c   : > { %747 = vmatprep.subr.bf16.mxu0 %v2091_v1  ;;  %1933 = vmatprep.subr.bf16.mxu1 %v2091_v1  ;;  %v2018_v53 = vld [vmem:[%s2160_s5 + $0x94] ss:$8 sps:$4 sm:$0xff]   ;;  %v2020_v55 = vld [vmem:[%s2160_s5 + $0x90] ss:$8 sps:$4 sm:$0xff]   ;;  %v2024_v57 = vld [vmem:[%s2160_s5 + $0xa4] ss:$8 sps:$4 sm:$0xff]  }
  0x1d   : > { %v2060_v54 = vld [vmem:[%s2160_s5 + $0x194] ss:$8 sps:$4 sm:$0xff]   ;;  %v2062_v56 = vld [vmem:[%s2160_s5 + $0x190] ss:$8 sps:$4 sm:$0xff]   ;;  %v2063_v58 = vld [vmem:[%s2160_s5 + $0x1a4] ss:$8 sps:$4 sm:$0xff]  }
  0x1e   : > { %v2026_v59 = vld [vmem:[%s2160_s5 + $0xa0] ss:$8 sps:$4 sm:$0xff]   ;;  %v2030_v61 = vld [vmem:[%s2160_s5 + $0xb4] ss:$8 sps:$4 sm:$0xff]   ;;  %v2032_v63 = vld [vmem:[%s2160_s5 + $0xb0] ss:$8 sps:$4 sm:$0xff]  }
  0x1f   : > { %748 = vmatpush1.bf16.msra.mxu0 %v1975_v8  ;;  %1949 = vmatpush1.bf16.msra.mxu1 %v1975_v8  ;;  %v2065_v60 = vld [vmem:[%s2160_s5 + $0x1a0] ss:$8 sps:$4 sm:$0xff]   ;;  %v2066_v62 = vld [vmem:[%s2160_s5 + $0x1b4] ss:$8 sps:$4 sm:$0xff]   ;;  %v2068_v0 = vld [vmem:[%s2160_s5 + $0x1b0] ss:$8 sps:$4 sm:$0xff]  }
  0x20   : > { %749 = vmatprep.subr.bf16.mxu0 %v2091_v1  ;;  %1934 = vmatprep.subr.bf16.mxu1 %v2091_v1  ;;  %v2069_v2 = vld [vmem:[%s2160_s5 + $0x1c4] ss:$8 sps:$4 sm:$0xff]   ;;  %v2038_v3 = vld [vmem:[%s2160_s5 + $0xc0] ss:$8 sps:$4 sm:$0xff]   ;;  %v2042_v5 = vld [vmem:[%s2160_s5 + $0xd4] ss:$8 sps:$4 sm:$0xff]  }
  0x21   : > { %v2071_v4 = vld [vmem:[%s2160_s5 + $0x1c0] ss:$8 sps:$4 sm:$0xff]   ;;  %v2072_v6 = vld [vmem:[%s2160_s5 + $0x1d4] ss:$8 sps:$4 sm:$0xff]   ;;  %v2044_v7 = vld [vmem:[%s2160_s5 + $0xd0] ss:$8 sps:$4 sm:$0xff]  }
  0x22   : > { %v2074_v8 = vld [vmem:[%s2160_s5 + $0x1d0] ss:$8 sps:$4 sm:$0xff]   ;;  %v2075_v10 = vld [vmem:[%s2160_s5 + $0x1e4] ss:$8 sps:$4 sm:$0xff]  }
  0x23   : > { %750 = vmatpush1.bf16.msra.mxu0 %v1976_v9  ;;  %1950 = vmatpush1.bf16.msra.mxu1 %v1976_v9  ;;  %v2048_v9 = vld [vmem:[%s2160_s5 + $0xe4] ss:$8 sps:$4 sm:$0xff]  }
  0x24   : > { %751 = vmatprep.subr.bf16.mxu0 %v2091_v1  ;;  %1935 = vmatprep.subr.bf16.mxu1 %v2091_v1 }
  0x27   : > { %752 = vmatpush1.bf16.msra.mxu0 %v1977_v11  ;;  %1951 = vmatpush1.bf16.msra.mxu1 %v1977_v11  ;;  %v2050_v11 = vld [vmem:[%s2160_s5 + $0xe0] ss:$8 sps:$4 sm:$0xff]  }
  0x28   : > { %753 = vmatprep.subr.bf16.mxu0 %v2091_v1  ;;  %1936 = vmatprep.subr.bf16.mxu1 %v2091_v1 }
  0x2b   : > { %754 = vmatpush1.bf16.msra.mxu0 %v1978_v12  ;;  %1952 = vmatpush1.bf16.msra.mxu1 %v1978_v12  ;;  %v2077_v12 = vld [vmem:[%s2160_s5 + $0x1e0] ss:$8 sps:$4 sm:$0xff]  }
  0x2c   : > { %755 = vmatprep.subr.bf16.mxu0 %v2091_v1  ;;  %1937 = vmatprep.subr.bf16.mxu1 %v2091_v1 }
  0x2f   : > { %756 = vmatpush1.bf16.msra.mxu0 %v1979_v13  ;;  %1953 = vmatpush1.bf16.msra.mxu1 %v1979_v13  ;;  %v2054_v13 = vld [vmem:[%s2160_s5 + $0xf4] ss:$8 sps:$4 sm:$0xff]  }
  0x30   : > { %757 = vmatprep.subr.bf16.mxu0 %v2091_v1  ;;  %1938 = vmatprep.subr.bf16.mxu1 %v2091_v1 }
  0x33   : > { %758 = vmatpush1.bf16.msra.mxu0 %v1980_v14  ;;  %1954 = vmatpush1.bf16.msra.mxu1 %v1980_v14  ;;  %v2078_v14 = vld [vmem:[%s2160_s5 + $0x1f4] ss:$8 sps:$4 sm:$0xff]  }
  0x34   : > { %759 = vmatprep.subr.bf16.mxu0 %v2091_v1  ;;  %1939 = vmatprep.subr.bf16.mxu1 %v2091_v1 }
  0x37   : > { %760 = vmatpush1.bf16.msra.mxu0 %v1981_v15  ;;  %1955 = vmatpush1.bf16.msra.mxu1 %v1981_v15  ;;  %v2056_v15 = vld [vmem:[%s2160_s5 + $0xf0] ss:$8 sps:$4 sm:$0xff]  }
  0x38   : > { %761 = vmatprep.subr.bf16.mxu0 %v2091_v1  ;;  %1940 = vmatprep.subr.bf16.mxu1 %v2091_v1 }
  0x3b   : > { %762 = vmatpush1.bf16.msra.mxu0 %v1982_v16  ;;  %1956 = vmatpush1.bf16.msra.mxu1 %v1982_v16  ;;  %v2080_v16 = vld [vmem:[%s2160_s5 + $0x1f0] ss:$8 sps:$4 sm:$0xff]  }
  0x3c   : > { %763 = vmatprep.subr.bf16.mxu0 %v2091_v1  ;;  %1941 = vmatprep.subr.bf16.mxu1 %v2091_v1 }
  0x3f   : > { %764 = vmatpush1.bf16.msra.mxu0 %v1983_v17  ;;  %1957 = vmatpush1.bf16.msra.mxu1 %v1983_v17  ;;  %v1089_v17 = vlaneseq }
  0x40   : > { %765 = vmatprep.subr.bf16.mxu0 %v2091_v1  ;;  %1942 = vmatprep.subr.bf16.mxu1 %v2091_v1  ;;  %v2036_v1 = vld [vmem:[%s2160_s5 + $0xc4] ss:$8 sps:$4 sm:$0xff]  }
  0x43   : > { %766 = vmatpush1.bf16.msra.mxu0 %v1984_v18  ;;  %1958 = vmatpush1.bf16.msra.mxu1 %v1984_v18  ;;  %v2284_v18 = vshrl.u32 %v1089_v17, 7 }
  0x46   : > { %768 = vmatmul.mubr.bf16.vlgmr.msra.gmra.mrb[0].mxu0 %v1985_v19  ;;  %896 = vmatmul.mubr.bf16.vlgmr.msra.gmra.mrb[0].mxu1 %v2009_v20  ;;  %v2286_v19 = vstv %s1859_s7  ;;  %v1091_v20 = vadd.s32 8, %v2284_v18 }
  0x47   : > { %775 = vmatprep.mubr.bf16.mxu0 %v1988_v21  ;;  %903 = vmatprep.mubr.bf16.mxu1 %v2015_v22  ;;  %v1155_v21 = vadd.s32 %v2286_v19, %v2284_v18 }
  0x48   : > { %v1156_v22 = vadd.s32 %v2286_v19, %v1091_v20 }
  0x49   : > { %vm1219_vm0 = vcmp.lt.s32.totalorder %v1155_v21, 1024 }
  0x4a   : > { %vm1220_vm1 = vcmp.lt.s32.totalorder %v1156_v22, 1024 }
  0x4e   : > { %776 = vmatmul.mubr.bf16.gmra.mrb[4].mxu0 %v1990_v23  ;;  %904 = vmatmul.mubr.bf16.gmra.mrb[4].mxu1 %v2017_v24  ;;  %v1092_v23 = vadd.s32 16, %v2284_v18  ;;  %v2296_v24 = vld [vmem:[%s2799_s2] ss:$0 sm:$0xff] }
  0x4f   : > { %783 = vmatprep.mubr.bf16.mxu0 %v1991_v25  ;;  %911 = vmatprep.mubr.bf16.mxu1 %v2021_v26  ;;  %v1093_v25 = vadd.s32 24, %v2284_v18 }
  0x56   : > { %784 = vmatmul.mubr.bf16.gmra.mrb[8].mxu0 %v1993_v27  ;;  %912 = vmatmul.mubr.bf16.gmra.mrb[8].mxu1 %v2023_v28  ;;  %v2092_v27 = vmov 0.0  }
  0x57   : > { %791 = vmatprep.mubr.bf16.mxu0 %v1994_v29  ;;  %919 = vmatprep.mubr.bf16.mxu1 %v2027_v30  ;;  %v1860_v28 = vsel %vm1219_vm0, 1.0, %v2092_v27 }
  0x5e   : > { %792 = vmatmul.mubr.bf16.gmra.mrb[12].mxu0 %v1996_v31  ;;  %920 = vmatmul.mubr.bf16.gmra.mrb[12].mxu1 %v2029_v32  ;;  %v1157_v32 = vadd.s32 %v2286_v19, %v1092_v23 }
  0x5f   : > { %799 = vmatprep.mubr.bf16.mxu0 %v1997_v33  ;;  %927 = vmatprep.mubr.bf16.mxu1 %v2033_v34 }
  0x60   : > { %vm1221_vm2 = vcmp.lt.s32.totalorder %v1157_v32, 1024 }
  0x66   : > { %800 = vmatmul.mubr.bf16.gmra.mrb[16].mxu0 %v1999_v35  ;;  %928 = vmatmul.mubr.bf16.gmra.mrb[16].mxu1 %v2035_v36  ;;  %v1861_v36 = vsel %vm1220_vm1, 1.0, %v2092_v27 }
  0x67   : > { %807 = vmatprep.mubr.bf16.mxu0 %v2000_v37  ;;  %935 = vmatprep.mubr.bf16.mxu1 %v2039_v38 }
  0x6e   : > { %808 = vmatmul.mubr.bf16.gmra.mrb[20].mxu0 %v2002_v39  ;;  %936 = vmatmul.mubr.bf16.gmra.mrb[20].mxu1 %v2041_v40 }
  0x6f   : > { %815 = vmatprep.mubr.bf16.mxu0 %v2003_v41  ;;  %943 = vmatprep.mubr.bf16.mxu1 %v2045_v42  ;;  %v1158_v41 = vadd.s32 %v2286_v19, %v1093_v25 }
  0x71   : > { %vm1222_vm3 = vcmp.lt.s32.totalorder %v1158_v41, 1024 }
  0x76   : > { %816 = vmatmul.mubr.bf16.gmra.mrb[24].mxu0 %v2005_v43  ;;  %944 = vmatmul.mubr.bf16.gmra.mrb[24].mxu1 %v2047_v44  ;;  %v1094_v44 = vadd.s32 32, %v2284_v18 }
  0x77   : > { %823 = vmatprep.mubr.bf16.mxu0 %v2006_v45  ;;  %951 = vmatprep.mubr.bf16.mxu1 %v2051_v46 }
  0x7e   : > { %824 = vmatmul.mubr.bf16.gmra.mrb[28].mxu0 %v2008_v47  ;;  %952 = vmatmul.mubr.bf16.gmra.mrb[28].mxu1 %v2053_v48  ;;  %v1095_v47 = vadd.s32 40, %v2284_v18 }
  0x7f   : > { %831 = vmatprep.mubr.bf16.mxu0 %v2012_v49  ;;  %959 = vmatprep.mubr.bf16.mxu1 %v2057_v50 }
  0x86   : > { %832 = vmatmul.mubr.bf16.gmra.mrb[32].mxu0 %v2014_v51  ;;  %960 = vmatmul.mubr.bf16.gmra.mrb[32].mxu1 %v2059_v52  ;;  %v1862_v51 = vsel %vm1221_vm2, 1.0, %v2092_v27  ;;  %v1159_v52 = vadd.s32 %v2286_v19, %v1094_v44 }
  0x87   : > { %839 = vmatprep.mubr.bf16.mxu0 %v2018_v53  ;;  %967 = vmatprep.mubr.bf16.mxu1 %v2060_v54 }
  0x88   : > { %vm1223_vm4 = vcmp.lt.s32.totalorder %v1159_v52, 1024 }
  0x8e   : > { %840 = vmatmul.mubr.bf16.gmra.mrb[36].mxu0 %v2020_v55  ;;  %968 = vmatmul.mubr.bf16.gmra.mrb[36].mxu1 %v2062_v56 }
  0x8f   : > { %847 = vmatprep.mubr.bf16.mxu0 %v2024_v57  ;;  %975 = vmatprep.mubr.bf16.mxu1 %v2063_v58 }
  0x96   : > { %848 = vmatmul.mubr.bf16.gmra.mrb[40].mxu0 %v2026_v59  ;;  %976 = vmatmul.mubr.bf16.gmra.mrb[40].mxu1 %v2065_v60  ;;  %v1863_v60 = vsel %vm1222_vm3, 1.0, %v2092_v27 }
  0x97   : > { %855 = vmatprep.mubr.bf16.mxu0 %v2030_v61  ;;  %983 = vmatprep.mubr.bf16.mxu1 %v2066_v62  ;;  %v1160_v61 = vadd.s32 %v2286_v19, %v1095_v47 }
  0x99   : > { %vm1224_vm5 = vcmp.lt.s32.totalorder %v1160_v61, 1024 }
  0x9a   : > { %v1865_v25 = vsel %vm1224_vm5, 1.0, %v2092_v27 }
  0x9e   : > { %856 = vmatmul.mubr.bf16.gmra.mrb[44].mxu0 %v2032_v63  ;;  %984 = vmatmul.mubr.bf16.gmra.mrb[44].mxu1 %v2068_v0 }
  0x9f   : > { %863 = vmatprep.mubr.bf16.mxu0 %v2036_v1  ;;  %991 = vmatprep.mubr.bf16.mxu1 %v2069_v2 }
  0xa6   : > { %864 = vmatmul.mubr.bf16.gmra.mrb[48].mxu0 %v2038_v3  ;;  %992 = vmatmul.mubr.bf16.gmra.mrb[48].mxu1 %v2071_v4 }
  0xa7   : > { %871 = vmatprep.mubr.bf16.mxu0 %v2042_v5  ;;  %999 = vmatprep.mubr.bf16.mxu1 %v2072_v6 }
  0xae   : > { %872 = vmatmul.mubr.bf16.gmra.mrb[52].mxu0 %v2044_v7  ;;  %1000 = vmatmul.mubr.bf16.gmra.mrb[52].mxu1 %v2074_v8  ;;  %v1096_v7 = vadd.s32 48, %v2284_v18 }
  0xaf   : > { %879 = vmatprep.mubr.bf16.mxu0 %v2048_v9  ;;  %1007 = vmatprep.mubr.bf16.mxu1 %v2075_v10 }
  0xb0   : > { %v1161_v20 = vadd.s32 %v2286_v19, %v1096_v7  ;;  %v1101_v7 = vadd.s32 88, %v2284_v18 }
  0xb2   : > { %vm1225_vm6 = vcmp.lt.s32.totalorder %v1161_v20, 1024 }
  0xb6   : > { %880 = vmatmul.mubr.bf16.gmra.mrb[56].mxu0 %v2050_v11  ;;  %1008 = vmatmul.mubr.bf16.gmra.mrb[56].mxu1 %v2077_v12  ;;  %v1097_v11 = vadd.s32 56, %v2284_v18 }
  0xb7   : > { %887 = vmatprep.mubr.bf16.mxu0 %v2054_v13  ;;  %1015 = vmatprep.mubr.bf16.mxu1 %v2078_v14  ;;  %v1864_v13 = vsel %vm1223_vm4, 1.0, %v2092_v27 }
  0xbe   : > { %888 = vmatmul.mubr.bf16.gmra.mrb[60].mxu0 %v2056_v15  ;;  %1016 = vmatmul.mubr.bf16.gmra.mrb[60].mxu1 %v2080_v16 }
 0x119   : > { %v769_v26 = vpop.f32.mrb[0].mxu0  ;;  %v897_v29 = vpop.f32.mrb[0].mxu1 }
 0x11a   : > { %v770_v30 = vadd.f32 %v2296_v24, %v769_v26  ;;  %v771_v31 = vpop.f32.mrb[1].mxu0  ;;  %v2310_v33 = vadd.f32 %v2296_v24, %v897_v29  ;;  %v899_v34 = vpop.f32.mrb[1].mxu1 }
 0x11b   : > { %v772_v35 = vpop.f32.mrb[2].mxu0  ;;  %v900_v37 = vpop.f32.mrb[2].mxu1  ;;  %v1162_v31 = vadd.s32 %v2286_v19, %v1097_v11 }
 0x11c   : > { %1024 = vst [vmem:[%s2304_s11] sm:$0xff] %v770_v30  ;;  %v1411_v38 = vmul.f32 %v1860_v28, %v770_v30  ;;  %v773_v39 = vadd.f32 %v2296_v24, %v772_v35  ;;  %v774_v40 = vpop.f32.mrb[3].mxu0  ;;  %1056 = vst [vmem:[%s2304_s11 + $0x100] sm:$0xff] %v2310_v33  ;;  %v2319_v42 = vadd.f32 %v2296_v24, %v900_v37  ;;  %v902_v43 = vpop.f32.mrb[3].mxu1  ;;  %v1098_v35 = vadd.s32 64, %v2284_v18 }
 0x11d   : > { %vm1226_vm7 = vcmp.lt.s32.totalorder %v1162_v31, 1024  ;;  %v1102_v31 = vadd.s32 96, %v2284_v18 }
 0x11e   : > { %v1544_v45 = vmul.f32 %v1411_v38, %v770_v30  ;;  %1025 = vst [vmem:[%s2304_s11 + $0x8] sm:$0xff] %v773_v39  ;;  %v1412_v46 = vmul.f32 %v1861_v36, %v773_v39  ;;  %1057 = vst [vmem:[%s2304_s11 + $0x108] sm:$0xff] %v2319_v42 }
 0x120   : > { %v1475_v48 = vadd.f32 %v1412_v46, %v1411_v38  ;;  %v1545_v49 = vmul.f32 %v1412_v46, %v773_v39  ;;  %v1099_v39 = vadd.s32 72, %v2284_v18  ;;  %v1163_v46 = vadd.s32 %v2286_v19, %v1098_v35 }
 0x121   : > { %v777_v50 = vpop.f32.mrb[4].mxu0  ;;  %v905_v53 = vpop.f32.mrb[4].mxu1 }
 0x122   : > { %v1608_v54 = vadd.f32 %v1545_v49, %v1544_v45  ;;  %v778_v55 = vadd.f32 %v2296_v24, %v777_v50  ;;  %v779_v56 = vpop.f32.mrb[5].mxu0  ;;  %v2330_v57 = vadd.f32 %v2296_v24, %v905_v53  ;;  %v907_v58 = vpop.f32.mrb[5].mxu1  ;;  %v1866_v45 = vsel %vm1225_vm6, 1.0, %v2092_v27 }
 0x123   : > { %v780_v59 = vpop.f32.mrb[6].mxu0  ;;  %v908_v62 = vpop.f32.mrb[6].mxu1  ;;  %vm1227_vm8 = vcmp.lt.s32.totalorder %v1163_v46, 1024 }
 0x124   : > { %1026 = vst [vmem:[%s2304_s11 + $0x10] sm:$0xff] %v778_v55  ;;  %v1413_v63 = vmul.f32 %v1862_v51, %v778_v55  ;;  %v781_v0 = vadd.f32 %v2296_v24, %v780_v59  ;;  %v782_v1 = vpop.f32.mrb[7].mxu0  ;;  %1058 = vst [vmem:[%s2304_s11 + $0x110] sm:$0xff] %v2330_v57  ;;  %v2339_v2 = vadd.f32 %v2296_v24, %v908_v62  ;;  %v910_v3 = vpop.f32.mrb[7].mxu1 }
 0x125   : > { %v1100_v3 = vadd.s32 80, %v2284_v18 }
 0x126   : > { %v1476_v4 = vadd.f32 %v1475_v48, %v1413_v63  ;;  %v1546_v5 = vmul.f32 %v1413_v63, %v778_v55  ;;  %1027 = vst [vmem:[%s2304_s11 + $0x18] sm:$0xff] %v781_v0  ;;  %v1414_v6 = vmul.f32 %v1863_v60, %v781_v0  ;;  %1059 = vst [vmem:[%s2304_s11 + $0x118] sm:$0xff] %v2339_v2 }
 0x127   : > { %v1164_v55 = vadd.s32 %v2286_v19, %v1099_v39 }
 0x128   : > { %v1609_v8 = vadd.f32 %v1608_v54, %v1546_v5  ;;  %v1477_v9 = vadd.f32 %v1476_v4, %v1414_v6  ;;  %v1547_v10 = vmul.f32 %v1414_v6, %v781_v0  ;;  %v1867_v54 = vsel %vm1226_vm7, 1.0, %v2092_v27 }
 0x129   : > { %v785_v12 = vpop.f32.mrb[8].mxu0  ;;  %v913_v14 = vpop.f32.mrb[8].mxu1  ;;  %vm1228_vm9 = vcmp.lt.s32.totalorder %v1164_v55, 1024 }
 0x12a   : > { %v1610_v15 = vadd.f32 %v1609_v8, %v1547_v10  ;;  %v786_v16 = vadd.f32 %v2296_v24, %v785_v12  ;;  %v787_v17 = vpop.f32.mrb[9].mxu0  ;;  %v2350_v21 = vadd.f32 %v2296_v24, %v913_v14  ;;  %v915_v22 = vpop.f32.mrb[9].mxu1  ;;  %v1165_v14 = vadd.s32 %v2286_v19, %v1100_v3 }
 0x12b   : > { %v788_v23 = vpop.f32.mrb[10].mxu0  ;;  %v916_v26 = vpop.f32.mrb[10].mxu1  ;;  %v1869_v20 = vsel %vm1228_vm9, 1.0, %v2092_v27  ;;  %v1104_v3 = vadd.s32 112, %v2284_v18 }
 0x12c   : > { %1028 = vst [vmem:[%s2304_s11 + $0x20] sm:$0xff] %v786_v16  ;;  %v1415_v28 = vmul.f32 %v1864_v13, %v786_v16  ;;  %v789_v29 = vadd.f32 %v2296_v24, %v788_v23  ;;  %v790_v30 = vpop.f32.mrb[11].mxu0  ;;  %1060 = vst [vmem:[%s2304_s11 + $0x120] sm:$0xff] %v2350_v21  ;;  %v2359_v32 = vadd.f32 %v2296_v24, %v916_v26  ;;  %v918_v34 = vpop.f32.mrb[11].mxu1  ;;  %vm1229_vm10 = vcmp.lt.s32.totalorder %v1165_v14, 1024 }
 0x12d   : > { %v1169_v14 = vadd.s32 %v2286_v19, %v1104_v3 }
 0x12e   : > { %v1478_v36 = vadd.f32 %v1477_v9, %v1415_v28  ;;  %v1548_v37 = vmul.f32 %v1415_v28, %v786_v16  ;;  %1029 = vst [vmem:[%s2304_s11 + $0x28] sm:$0xff] %v789_v29  ;;  %v1416_v38 = vmul.f32 %v1865_v25, %v789_v29  ;;  %1061 = vst [vmem:[%s2304_s11 + $0x128] sm:$0xff] %v2359_v32  ;;  %v1868_v9 = vsel %vm1227_vm8, 1.0, %v2092_v27 }
 0x12f   : > { %v1166_v28 = vadd.s32 %v2286_v19, %v1101_v7  ;;  %v1105_v7 = vadd.s32 120, %v2284_v18  ;;  %vm1233_vm14 = vcmp.lt.s32.totalorder %v1169_v14, 1024 }
 0x130   : > { %v1611_v40 = vadd.f32 %v1610_v15, %v1548_v37  ;;  %v1479_v41 = vadd.f32 %v1478_v36, %v1416_v38  ;;  %v1549_v43 = vmul.f32 %v1416_v38, %v789_v29  ;;  %v1103_v37 = vadd.s32 104, %v2284_v18 }
 0x131   : > { %v793_v44 = vpop.f32.mrb[12].mxu0  ;;  %v921_v47 = vpop.f32.mrb[12].mxu1  ;;  %vm1230_vm11 = vcmp.lt.s32.totalorder %v1166_v28, 1024 }
 0x132   : > { %v1612_v48 = vadd.f32 %v1611_v40, %v1549_v43  ;;  %v794_v49 = vadd.f32 %v2296_v24, %v793_v44  ;;  %v795_v50 = vpop.f32.mrb[13].mxu0  ;;  %v2370_v51 = vadd.f32 %v2296_v24, %v921_v47  ;;  %v923_v52 = vpop.f32.mrb[13].mxu1  ;;  %v1870_v43 = vsel %vm1229_vm10, 1.0, %v2092_v27 }
 0x133   : > { %v796_v53 = vpop.f32.mrb[14].mxu0  ;;  %v924_v56 = vpop.f32.mrb[14].mxu1  ;;  %v1167_v44 = vadd.s32 %v2286_v19, %v1102_v31 }
 0x134   : > { %1030 = vst [vmem:[%s2304_s11 + $0x30] sm:$0xff] %v794_v49  ;;  %v1417_v58 = vmul.f32 %v1866_v45, %v794_v49  ;;  %v797_v59 = vadd.f32 %v2296_v24, %v796_v53  ;;  %v798_v60 = vpop.f32.mrb[15].mxu0  ;;  %1062 = vst [vmem:[%s2304_s11 + $0x130] sm:$0xff] %v2370_v51  ;;  %v2379_v61 = vadd.f32 %v2296_v24, %v924_v56  ;;  %v926_v62 = vpop.f32.mrb[15].mxu1  ;;  %v1871_v53 = vsel %vm1230_vm11, 1.0, %v2092_v27 }
 0x135   : > { %vm1231_vm12 = vcmp.lt.s32.totalorder %v1167_v44, 1024 }
 0x136   : > { %v1480_v63 = vadd.f32 %v1479_v41, %v1417_v58  ;;  %v1550_v0 = vmul.f32 %v1417_v58, %v794_v49  ;;  %1031 = vst [vmem:[%s2304_s11 + $0x38] sm:$0xff] %v797_v59  ;;  %v1418_v1 = vmul.f32 %v1867_v54, %v797_v59  ;;  %1063 = vst [vmem:[%s2304_s11 + $0x138] sm:$0xff] %v2379_v61 }
 0x137   : > { %v1168_v54 = vadd.s32 %v2286_v19, %v1103_v37 }
 0x138   : > { %v1613_v4 = vadd.f32 %v1612_v48, %v1550_v0  ;;  %v1481_v5 = vadd.f32 %v1480_v63, %v1418_v1  ;;  %v1551_v6 = vmul.f32 %v1418_v1, %v797_v59 }
 0x139   : > { %v801_v8 = vpop.f32.mrb[16].mxu0  ;;  %v929_v10 = vpop.f32.mrb[16].mxu1  ;;  %vm1232_vm13 = vcmp.lt.s32.totalorder %v1168_v54, 1024 }
 0x13a   : > { %v1614_v11 = vadd.f32 %v1613_v4, %v1551_v6  ;;  %v802_v12 = vadd.f32 %v2296_v24, %v801_v8  ;;  %v803_v13 = vpop.f32.mrb[17].mxu0  ;;  %v2390_v15 = vadd.f32 %v2296_v24, %v929_v10  ;;  %v931_v16 = vpop.f32.mrb[17].mxu1 }
 0x13b   : > { %v804_v17 = vpop.f32.mrb[18].mxu0  ;;  %v932_v22 = vpop.f32.mrb[18].mxu1 }
 0x13c   : > { %1032 = vst [vmem:[%s2304_s11 + $0x40] sm:$0xff] %v802_v12  ;;  %v1419_v23 = vmul.f32 %v1868_v9, %v802_v12  ;;  %v805_v25 = vadd.f32 %v2296_v24, %v804_v17  ;;  %v806_v26 = vpop.f32.mrb[19].mxu0  ;;  %1064 = vst [vmem:[%s2304_s11 + $0x140] sm:$0xff] %v2390_v15  ;;  %v2399_v29 = vadd.f32 %v2296_v24, %v932_v22  ;;  %v934_v30 = vpop.f32.mrb[19].mxu1  ;;  %v1872_v9 = vsel %vm1231_vm12, 1.0, %v2092_v27 }
 0x13d   : > { %v1873_v22 = vsel %vm1232_vm13, 1.0, %v2092_v27  ;;  %v1170_v30 = vadd.s32 %v2286_v19, %v1105_v7  ;;  %v1108_v7 = vadd.s32 144, %v2284_v18 }
 0x13e   : > { %v1482_v34 = vadd.f32 %v1481_v5, %v1419_v23  ;;  %v1552_v35 = vmul.f32 %v1419_v23, %v802_v12  ;;  %1033 = vst [vmem:[%s2304_s11 + $0x48] sm:$0xff] %v805_v25  ;;  %v1420_v36 = vmul.f32 %v1869_v20, %v805_v25  ;;  %1065 = vst [vmem:[%s2304_s11 + $0x148] sm:$0xff] %v2399_v29 }
 0x13f   : > { %vm1234_vm15 = vcmp.lt.s32.totalorder %v1170_v30, 1024 }
 0x140   : > { %v1615_v38 = vadd.f32 %v1614_v11, %v1552_v35  ;;  %v1483_v39 = vadd.f32 %v1482_v34, %v1420_v36  ;;  %v1553_v40 = vmul.f32 %v1420_v36, %v805_v25  ;;  %v1106_v35 = vadd.s32 128, %v2284_v18 }
 0x141   : > { %v809_v41 = vpop.f32.mrb[20].mxu0  ;;  %v937_v45 = vpop.f32.mrb[20].mxu1 }
 0x142   : > { %v1616_v46 = vadd.f32 %v1615_v38, %v1553_v40  ;;  %v810_v47 = vadd.f32 %v2296_v24, %v809_v41  ;;  %v811_v48 = vpop.f32.mrb[21].mxu0  ;;  %v2410_v49 = vadd.f32 %v2296_v24, %v937_v45  ;;  %v939_v50 = vpop.f32.mrb[21].mxu1  ;;  %v1874_v45 = vsel %vm1233_vm14, 1.0, %v2092_v27 }
 0x143   : > { %v812_v52 = vpop.f32.mrb[22].mxu0  ;;  %v940_v55 = vpop.f32.mrb[22].mxu1 }
 0x144   : > { %1034 = vst [vmem:[%s2304_s11 + $0x50] sm:$0xff] %v810_v47  ;;  %v1421_v56 = vmul.f32 %v1870_v43, %v810_v47  ;;  %v813_v58 = vadd.f32 %v2296_v24, %v812_v52  ;;  %v814_v59 = vpop.f32.mrb[23].mxu0  ;;  %1066 = vst [vmem:[%s2304_s11 + $0x150] sm:$0xff] %v2410_v49  ;;  %v2419_v60 = vadd.f32 %v2296_v24, %v940_v55  ;;  %v942_v62 = vpop.f32.mrb[23].mxu1 }
 0x146   : > { %v1484_v63 = vadd.f32 %v1483_v39, %v1421_v56  ;;  %v1554_v0 = vmul.f32 %v1421_v56, %v810_v47  ;;  %1035 = vst [vmem:[%s2304_s11 + $0x58] sm:$0xff] %v813_v58  ;;  %v1422_v1 = vmul.f32 %v1871_v53, %v813_v58  ;;  %1067 = vst [vmem:[%s2304_s11 + $0x158] sm:$0xff] %v2419_v60  ;;  %v1107_v39 = vadd.s32 136, %v2284_v18 }
 0x147   : > { %v1875_v56 = vsel %vm1234_vm15, 1.0, %v2092_v27 }
 0x148   : > { %v1617_v4 = vadd.f32 %v1616_v46, %v1554_v0  ;;  %v1485_v5 = vadd.f32 %v1484_v63, %v1422_v1  ;;  %v1555_v6 = vmul.f32 %v1422_v1, %v813_v58  ;;  %v1171_v46 = vadd.s32 %v2286_v19, %v1106_v35 }
 0x149   : > { %v817_v8 = vpop.f32.mrb[24].mxu0  ;;  %v945_v10 = vpop.f32.mrb[24].mxu1  ;;  %v1172_v58 = vadd.s32 %v2286_v19, %v1107_v39 }
 0x14a   : > { %v1618_v11 = vadd.f32 %v1617_v4, %v1555_v6  ;;  %v818_v12 = vadd.f32 %v2296_v24, %v817_v8  ;;  %v819_v13 = vpop.f32.mrb[25].mxu0  ;;  %v2430_v16 = vadd.f32 %v2296_v24, %v945_v10  ;;  %v947_v17 = vpop.f32.mrb[25].mxu1  ;;  %vm1235_vm0 = vcmp.lt.s32.totalorder %v1171_v46, 1024 }
 0x14b   : > { %v820_v20 = vpop.f32.mrb[26].mxu0  ;;  %v948_v23 = vpop.f32.mrb[26].mxu1  ;;  %vm1236_vm1 = vcmp.lt.s32.totalorder %v1172_v58, 1024  ;;  %v1876_v13 = vsel %vm1235_vm0, 1.0, %v2092_v27  ;;  %v1111_v46 = vadd.s32 168, %v2284_v18 }
 0x14c   : > { %1036 = vst [vmem:[%s2304_s11 + $0x60] sm:$0xff] %v818_v12  ;;  %v1423_v25 = vmul.f32 %v1872_v9, %v818_v12  ;;  %v821_v26 = vadd.f32 %v2296_v24, %v820_v20  ;;  %v822_v28 = vpop.f32.mrb[27].mxu0  ;;  %1068 = vst [vmem:[%s2304_s11 + $0x160] sm:$0xff] %v2430_v16  ;;  %v2439_v31 = vadd.f32 %v2296_v24, %v948_v23  ;;  %v950_v34 = vpop.f32.mrb[27].mxu1  ;;  %v1877_v30 = vsel %vm1236_vm1, 1.0, %v2092_v27 }
 0x14d   : > { %v1173_v23 = vadd.s32 %v2286_v19, %v1108_v7 }
 0x14e   : > { %v1486_v36 = vadd.f32 %v1485_v5, %v1423_v25  ;;  %v1556_v37 = vmul.f32 %v1423_v25, %v818_v12  ;;  %1037 = vst [vmem:[%s2304_s11 + $0x68] sm:$0xff] %v821_v26  ;;  %v1424_v38 = vmul.f32 %v1873_v22, %v821_v26  ;;  %1069 = vst [vmem:[%s2304_s11 + $0x168] sm:$0xff] %v2439_v31 }
 0x14f   : > { %vm1237_vm2 = vcmp.lt.s32.totalorder %v1173_v23, 1024 }
 0x150   : > { %v1619_v40 = vadd.f32 %v1618_v11, %v1556_v37  ;;  %v1487_v41 = vadd.f32 %v1486_v36, %v1424_v38  ;;  %v1557_v43 = vmul.f32 %v1424_v38, %v821_v26  ;;  %v1109_v11 = vadd.s32 152, %v2284_v18 }
 0x151   : > { %v825_v44 = vpop.f32.mrb[28].mxu0  ;;  %v953_v47 = vpop.f32.mrb[28].mxu1 }
 0x152   : > { %v1620_v48 = vadd.f32 %v1619_v40, %v1557_v43  ;;  %v826_v50 = vadd.f32 %v2296_v24, %v825_v44  ;;  %v827_v52 = vpop.f32.mrb[29].mxu0  ;;  %v2450_v53 = vadd.f32 %v2296_v24, %v953_v47  ;;  %v955_v54 = vpop.f32.mrb[29].mxu1  ;;  %v1174_v38 = vadd.s32 %v2286_v19, %v1109_v11 }
 0x153   : > { %v828_v55 = vpop.f32.mrb[30].mxu0  ;;  %v956_v59 = vpop.f32.mrb[30].mxu1  ;;  %v1878_v54 = vsel %vm1237_vm2, 1.0, %v2092_v27 }
 0x154   : > { %1038 = vst [vmem:[%s2304_s11 + $0x70] sm:$0xff] %v826_v50  ;;  %v1425_v62 = vmul.f32 %v1874_v45, %v826_v50  ;;  %v829_v63 = vadd.f32 %v2296_v24, %v828_v55  ;;  %v830_v0 = vpop.f32.mrb[31].mxu0  ;;  %1070 = vst [vmem:[%s2304_s11 + $0x170] sm:$0xff] %v2450_v53  ;;  %v2459_v1 = vadd.f32 %v2296_v24, %v956_v59  ;;  %v958_v3 = vpop.f32.mrb[31].mxu1  ;;  %vm1238_vm3 = vcmp.lt.s32.totalorder %v1174_v38, 1024 }
 0x156   : > { %v1488_v4 = vadd.f32 %v1487_v41, %v1425_v62  ;;  %v1558_v5 = vmul.f32 %v1425_v62, %v826_v50  ;;  %1039 = vst [vmem:[%s2304_s11 + $0x78] sm:$0xff] %v829_v63  ;;  %v1426_v6 = vmul.f32 %v1875_v56, %v829_v63  ;;  %1071 = vst [vmem:[%s2304_s11 + $0x178] sm:$0xff] %v2459_v1  ;;  %v1110_v41 = vadd.s32 160, %v2284_v18 }
 0x158   : > { %v1621_v8 = vadd.f32 %v1620_v48, %v1558_v5  ;;  %v1489_v9 = vadd.f32 %v1488_v4, %v1426_v6  ;;  %v1559_v10 = vmul.f32 %v1426_v6, %v829_v63  ;;  %v1175_v55 = vadd.s32 %v2286_v19, %v1110_v41 }
 0x159   : > { %v833_v12 = vpop.f32.mrb[32].mxu0  ;;  %v961_v14 = vpop.f32.mrb[32].mxu1  ;;  %v1879_v4 = vsel %vm1238_vm3, 1.0, %v2092_v27  ;;  %v1176_v5 = vadd.s32 %v2286_v19, %v1111_v46 }
 0x15a   : > { %v1622_v17 = vadd.f32 %v1621_v8, %v1559_v10  ;;  %v834_v20 = vadd.f32 %v2296_v24, %v833_v12  ;;  %v835_v22 = vpop.f32.mrb[33].mxu0  ;;  %v2470_v25 = vadd.f32 %v2296_v24, %v961_v14  ;;  %v963_v26 = vpop.f32.mrb[33].mxu1  ;;  %vm1239_vm4 = vcmp.lt.s32.totalorder %v1175_v55, 1024 }
 0x15b   : > { %v836_v28 = vpop.f32.mrb[34].mxu0  ;;  %v964_v34 = vpop.f32.mrb[34].mxu1  ;;  %vm1240_vm5 = vcmp.lt.s32.totalorder %v1176_v5, 1024  ;;  %v1113_v26 = vadd.s32 184, %v2284_v18  ;;  %v1114_v55 = vadd.s32 192, %v2284_v18 }
 0x15c   : > { %1040 = vst [vmem:[%s2304_s11 + $0x80] sm:$0xff] %v834_v20  ;;  %v1427_v35 = vmul.f32 %v1876_v13, %v834_v20  ;;  %v837_v36 = vadd.f32 %v2296_v24, %v836_v28  ;;  %v838_v37 = vpop.f32.mrb[35].mxu0  ;;  %1072 = vst [vmem:[%s2304_s11 + $0x180] sm:$0xff] %v2470_v25  ;;  %v2479_v39 = vadd.f32 %v2296_v24, %v964_v34  ;;  %v966_v40 = vpop.f32.mrb[35].mxu1 }
 0x15e   : > { %v1490_v43 = vadd.f32 %v1489_v9, %v1427_v35  ;;  %v1560_v44 = vmul.f32 %v1427_v35, %v834_v20  ;;  %1041 = vst [vmem:[%s2304_s11 + $0x88] sm:$0xff] %v837_v36  ;;  %v1428_v45 = vmul.f32 %v1877_v30, %v837_v36  ;;  %1073 = vst [vmem:[%s2304_s11 + $0x188] sm:$0xff] %v2479_v39  ;;  %v1880_v30 = vsel %vm1239_vm4, 1.0, %v2092_v27 }
 0x160   : > { %v1623_v47 = vadd.f32 %v1622_v17, %v1560_v44  ;;  %v1491_v48 = vadd.f32 %v1490_v43, %v1428_v45  ;;  %v1561_v50 = vmul.f32 %v1428_v45, %v837_v36  ;;  %v1112_v17 = vadd.s32 176, %v2284_v18 }
 0x161   : > { %v841_v52 = vpop.f32.mrb[36].mxu0  ;;  %v969_v56 = vpop.f32.mrb[36].mxu1  ;;  %v1881_v44 = vsel %vm1240_vm5, 1.0, %v2092_v27 }
 0x162   : > { %v1624_v58 = vadd.f32 %v1623_v47, %v1561_v50  ;;  %v842_v59 = vadd.f32 %v2296_v24, %v841_v52  ;;  %v843_v62 = vpop.f32.mrb[37].mxu0  ;;  %v2490_v63 = vadd.f32 %v2296_v24, %v969_v56  ;;  %v971_v0 = vpop.f32.mrb[37].mxu1  ;;  %v1177_v38 = vadd.s32 %v2286_v19, %v1112_v17 }
 0x163   : > { %v844_v3 = vpop.f32.mrb[38].mxu0  ;;  %v972_v6 = vpop.f32.mrb[38].mxu1  ;;  %v1178_v50 = vadd.s32 %v2286_v19, %v1113_v26  ;;  %v1115_v62 = vadd.s32 200, %v2284_v18 }
 0x164   : > { %1042 = vst [vmem:[%s2304_s11 + $0x90] sm:$0xff] %v842_v59  ;;  %v1429_v7 = vmul.f32 %v1878_v54, %v842_v59  ;;  %v845_v8 = vadd.f32 %v2296_v24, %v844_v3  ;;  %v846_v9 = vpop.f32.mrb[39].mxu0  ;;  %1074 = vst [vmem:[%s2304_s11 + $0x190] sm:$0xff] %v2490_v63  ;;  %v2499_v10 = vadd.f32 %v2296_v24, %v972_v6  ;;  %v974_v11 = vpop.f32.mrb[39].mxu1  ;;  %vm1241_vm6 = vcmp.lt.s32.totalorder %v1177_v38, 1024 }
 0x165   : > { %vm1242_vm7 = vcmp.lt.s32.totalorder %v1178_v50, 1024  ;;  %v1882_v6 = vsel %vm1241_vm6, 1.0, %v2092_v27 }
 0x166   : > { %v1492_v12 = vadd.f32 %v1491_v48, %v1429_v7  ;;  %v1562_v13 = vmul.f32 %v1429_v7, %v842_v59  ;;  %1043 = vst [vmem:[%s2304_s11 + $0x98] sm:$0xff] %v845_v8  ;;  %v1430_v14 = vmul.f32 %v1879_v4, %v845_v8  ;;  %1075 = vst [vmem:[%s2304_s11 + $0x198] sm:$0xff] %v2499_v10 }
 0x167   : > { %v1179_v7 = vadd.s32 %v2286_v19, %v1114_v55 }
 0x168   : > { %v1625_v20 = vadd.f32 %v1624_v58, %v1562_v13  ;;  %v1493_v22 = vadd.f32 %v1492_v12, %v1430_v14  ;;  %v1563_v23 = vmul.f32 %v1430_v14, %v845_v8 }
 0x169   : > { %v849_v28 = vpop.f32.mrb[40].mxu0  ;;  %v977_v34 = vpop.f32.mrb[40].mxu1  ;;  %vm1243_vm8 = vcmp.lt.s32.totalorder %v1179_v7, 1024 }
 0x16a   : > { %v1626_v35 = vadd.f32 %v1625_v20, %v1563_v23  ;;  %v850_v36 = vadd.f32 %v2296_v24, %v849_v28  ;;  %v851_v37 = vpop.f32.mrb[41].mxu0  ;;  %v2510_v40 = vadd.f32 %v2296_v24, %v977_v34  ;;  %v979_v41 = vpop.f32.mrb[41].mxu1  ;;  %v1883_v20 = vsel %vm1242_vm7, 1.0, %v2092_v27 }
 0x16b   : > { %v852_v43 = vpop.f32.mrb[42].mxu0  ;;  %v980_v45 = vpop.f32.mrb[42].mxu1  ;;  %v1116_v41 = vadd.s32 208, %v2284_v18 }
 0x16c   : > { %1044 = vst [vmem:[%s2304_s11 + $0xa0] sm:$0xff] %v850_v36  ;;  %v1431_v46 = vmul.f32 %v1880_v30, %v850_v36  ;;  %v853_v47 = vadd.f32 %v2296_v24, %v852_v43  ;;  %v854_v48 = vpop.f32.mrb[43].mxu0  ;;  %1076 = vst [vmem:[%s2304_s11 + $0x1a0] sm:$0xff] %v2510_v40  ;;  %v2519_v52 = vadd.f32 %v2296_v24, %v980_v45  ;;  %v982_v54 = vpop.f32.mrb[43].mxu1 }
 0x16d   : > { %v1884_v48 = vsel %vm1243_vm8, 1.0, %v2092_v27 }
 0x16e   : > { %v1494_v56 = vadd.f32 %v1493_v22, %v1431_v46  ;;  %v1564_v58 = vmul.f32 %v1431_v46, %v850_v36  ;;  %1045 = vst [vmem:[%s2304_s11 + $0xa8] sm:$0xff] %v853_v47  ;;  %v1432_v59 = vmul.f32 %v1881_v44, %v853_v47  ;;  %1077 = vst [vmem:[%s2304_s11 + $0x1a8] sm:$0xff] %v2519_v52  ;;  %v1117_v46 = vadd.s32 216, %v2284_v18 }
 0x16f   : > { %v1180_v22 = vadd.s32 %v2286_v19, %v1115_v62 }
 0x170   : > { %v1627_v0 = vadd.f32 %v1626_v35, %v1564_v58  ;;  %v1495_v3 = vadd.f32 %v1494_v56, %v1432_v59  ;;  %v1565_v4 = vmul.f32 %v1432_v59, %v853_v47  ;;  %v1181_v58 = vadd.s32 %v2286_v19, %v1116_v41 }
 0x171   : > { %v857_v5 = vpop.f32.mrb[44].mxu0  ;;  %v985_v8 = vpop.f32.mrb[44].mxu1  ;;  %vm1244_vm9 = vcmp.lt.s32.totalorder %v1180_v22, 1024  ;;  %v1119_v22 = vadd.s32 232, %v2284_v18 }
 0x172   : > { %v1628_v9 = vadd.f32 %v1627_v0, %v1565_v4  ;;  %v858_v11 = vadd.f32 %v2296_v24, %v857_v5  ;;  %v859_v12 = vpop.f32.mrb[45].mxu0  ;;  %v2530_v13 = vadd.f32 %v2296_v24, %v985_v8  ;;  %v987_v14 = vpop.f32.mrb[45].mxu1  ;;  %v1182_v8 = vadd.s32 %v2286_v19, %v1117_v46 }
 0x173   : > { %v860_v17 = vpop.f32.mrb[46].mxu0  ;;  %v988_v23 = vpop.f32.mrb[46].mxu1  ;;  %v1118_v12 = vadd.s32 224, %v2284_v18  ;;  %vm1245_vm10 = vcmp.lt.s32.totalorder %v1181_v58, 1024 }
 0x174   : > { %1046 = vst [vmem:[%s2304_s11 + $0xb0] sm:$0xff] %v858_v11  ;;  %v1433_v26 = vmul.f32 %v1882_v6, %v858_v11  ;;  %v861_v28 = vadd.f32 %v2296_v24, %v860_v17  ;;  %v862_v30 = vpop.f32.mrb[47].mxu0  ;;  %1078 = vst [vmem:[%s2304_s11 + $0x1b0] sm:$0xff] %v2530_v13  ;;  %v2539_v34 = vadd.f32 %v2296_v24, %v988_v23  ;;  %v990_v35 = vpop.f32.mrb[47].mxu1  ;;  %vm1246_vm11 = vcmp.lt.s32.totalorder %v1182_v8, 1024 }
 0x175   : > { %v1886_v35 = vsel %vm1245_vm10, 1.0, %v2092_v27 }
 0x176   : > { %v1496_v36 = vadd.f32 %v1495_v3, %v1433_v26  ;;  %v1566_v37 = vmul.f32 %v1433_v26, %v858_v11  ;;  %1047 = vst [vmem:[%s2304_s11 + $0xb8] sm:$0xff] %v861_v28  ;;  %v1434_v38 = vmul.f32 %v1883_v20, %v861_v28  ;;  %1079 = vst [vmem:[%s2304_s11 + $0x1b8] sm:$0xff] %v2539_v34  ;;  %v1885_v3 = vsel %vm1244_vm9, 1.0, %v2092_v27 }
 0x178   : > { %v1629_v43 = vadd.f32 %v1628_v9, %v1566_v37  ;;  %v1497_v44 = vadd.f32 %v1496_v36, %v1434_v38  ;;  %v1567_v45 = vmul.f32 %v1434_v38, %v861_v28  ;;  %v1183_v36 = vadd.s32 %v2286_v19, %v1118_v12 }
 0x179   : > { %v865_v47 = vpop.f32.mrb[48].mxu0  ;;  %v993_v50 = vpop.f32.mrb[48].mxu1  ;;  %v1121_v12 = vadd.s32 248, %v2284_v18 }
 0x17a   : > { %v1630_v54 = vadd.f32 %v1629_v43, %v1567_v45  ;;  %v866_v55 = vadd.f32 %v2296_v24, %v865_v47  ;;  %v867_v56 = vpop.f32.mrb[49].mxu0  ;;  %v2550_v59 = vadd.f32 %v2296_v24, %v993_v50  ;;  %v995_v62 = vpop.f32.mrb[49].mxu1  ;;  %v1887_v47 = vsel %vm1246_vm11, 1.0, %v2092_v27 }
 0x17b   : > { %v868_v0 = vpop.f32.mrb[50].mxu0  ;;  %v996_v4 = vpop.f32.mrb[50].mxu1  ;;  %vm1247_vm12 = vcmp.lt.s32.totalorder %v1183_v36, 1024 }
 0x17c   : > { %1048 = vst [vmem:[%s2304_s11 + $0xc0] sm:$0xff] %v866_v55  ;;  %v1435_v5 = vmul.f32 %v1884_v48, %v866_v55  ;;  %v869_v6 = vadd.f32 %v2296_v24, %v868_v0  ;;  %v870_v7 = vpop.f32.mrb[51].mxu0  ;;  %1080 = vst [vmem:[%s2304_s11 + $0x1c0] sm:$0xff] %v2550_v59  ;;  %v2559_v9 = vadd.f32 %v2296_v24, %v996_v4  ;;  %v998_v11 = vpop.f32.mrb[51].mxu1 }
 0x17d   : > { %v1184_v48 = vadd.s32 %v2286_v19, %v1119_v22 }
 0x17e   : > { %v1498_v14 = vadd.f32 %v1497_v44, %v1435_v5  ;;  %v1568_v17 = vmul.f32 %v1435_v5, %v866_v55  ;;  %1049 = vst [vmem:[%s2304_s11 + $0xc8] sm:$0xff] %v869_v6  ;;  %v1436_v20 = vmul.f32 %v1885_v3, %v869_v6  ;;  %1081 = vst [vmem:[%s2304_s11 + $0x1c8] sm:$0xff] %v2559_v9  ;;  %v1120_v5 = vadd.s32 240, %v2284_v18 }
 0x17f   : > { %vm1248_vm13 = vcmp.lt.s32.totalorder %v1184_v48, 1024  ;;  %v1125_v48 = vadd.s32 280, %v2284_v18 }
 0x180   : > { %v1631_v23 = vadd.f32 %v1630_v54, %v1568_v17  ;;  %v1499_v26 = vadd.f32 %v1498_v14, %v1436_v20  ;;  %v1569_v28 = vmul.f32 %v1436_v20, %v869_v6  ;;  %v1122_v6 = vadd.s32 256, %v2284_v18 }
 0x181   : > { %v873_v30 = vpop.f32.mrb[52].mxu0  ;;  %v1001_v37 = vpop.f32.mrb[52].mxu1  ;;  %v1123_v14 = vadd.s32 264, %v2284_v18  ;;  %v1888_v20 = vsel %vm1247_vm12, 1.0, %v2092_v27 }
 0x182   : > { %v1632_v38 = vadd.f32 %v1631_v23, %v1569_v28  ;;  %v874_v41 = vadd.f32 %v2296_v24, %v873_v30  ;;  %v875_v43 = vpop.f32.mrb[53].mxu0  ;;  %v2570_v44 = vadd.f32 %v2296_v24, %v1001_v37  ;;  %v1003_v45 = vpop.f32.mrb[53].mxu1  ;;  %v1185_v30 = vadd.s32 %v2286_v19, %v1120_v5 }
 0x183   : > { %v876_v46 = vpop.f32.mrb[54].mxu0  ;;  %v1004_v50 = vpop.f32.mrb[54].mxu1  ;;  %v1187_v37 = vadd.s32 %v2286_v19, %v1122_v6  ;;  %v1889_v43 = vsel %vm1248_vm13, 1.0, %v2092_v27  ;;  %v1126_v6 = vadd.s32 288, %v2284_v18 }
 0x184   : > { %1050 = vst [vmem:[%s2304_s11 + $0xd0] sm:$0xff] %v874_v41  ;;  %v1437_v54 = vmul.f32 %v1886_v35, %v874_v41  ;;  %v877_v55 = vadd.f32 %v2296_v24, %v876_v46  ;;  %v878_v56 = vpop.f32.mrb[55].mxu0  ;;  %1082 = vst [vmem:[%s2304_s11 + $0x1d0] sm:$0xff] %v2570_v44  ;;  %v2579_v58 = vadd.f32 %v2296_v24, %v1004_v50  ;;  %v1006_v62 = vpop.f32.mrb[55].mxu1  ;;  %vm1249_vm14 = vcmp.lt.s32.totalorder %v1185_v30, 1024 }
 0x185   : > { %v1188_v62 = vadd.s32 %v2286_v19, %v1123_v14  ;;  %vm1251_vm15 = vcmp.lt.s32.totalorder %v1187_v37, 1024  ;;  %v1190_v14 = vadd.s32 %v2286_v19, %v1125_v48 }
 0x186   : > { %v1500_v0 = vadd.f32 %v1499_v26, %v1437_v54  ;;  %v1570_v3 = vmul.f32 %v1437_v54, %v874_v41  ;;  %1051 = vst [vmem:[%s2304_s11 + $0xd8] sm:$0xff] %v877_v55  ;;  %v1438_v4 = vmul.f32 %v1887_v47, %v877_v55  ;;  %1083 = vst [vmem:[%s2304_s11 + $0x1d8] sm:$0xff] %v2579_v58 }
 0x187   : > { %v1186_v54 = vadd.s32 %v2286_v19, %v1121_v12  ;;  %vm1252_vm1 = vcmp.lt.s32.totalorder %v1188_v62, 1024  ;;  %vm1254_vm3 = vcmp.lt.s32.totalorder %v1190_v14, 1024  ;;  %v1132_v14 = vadd.s32 336, %v2284_v18 }
 0x188   : > { %v1633_v7 = vadd.f32 %v1632_v38, %v1570_v3  ;;  %v1501_v8 = vadd.f32 %v1500_v0, %v1438_v4  ;;  %v1571_v11 = vmul.f32 %v1438_v4, %v877_v55  ;;  %v1124_v38 = vadd.s32 272, %v2284_v18 }
 0x189   : > { %v881_v17 = vpop.f32.mrb[56].mxu0  ;;  %v1009_v22 = vpop.f32.mrb[56].mxu1  ;;  %vm1250_vm0 = vcmp.lt.s32.totalorder %v1186_v54, 1024 }
 0x18a   : > { %v1634_v23 = vadd.f32 %v1633_v7, %v1571_v11  ;;  %v882_v26 = vadd.f32 %v2296_v24, %v881_v17  ;;  %v883_v28 = vpop.f32.mrb[57].mxu0  ;;  %v2592_v35 = vadd.f32 %v2296_v24, %v1009_v22  ;;  %v1011_v36 = vpop.f32.mrb[57].mxu1  ;;  %v1189_v5 = vadd.s32 %v2286_v19, %v1124_v38 }
 0x18b   : > { %v884_v41 = vpop.f32.mrb[58].mxu0  ;;  %v1012_v45 = vpop.f32.mrb[58].mxu1  ;;  %v1127_v17 = vadd.s32 296, %v2284_v18  ;;  %v1892_v38 = vsel %vm1251_vm15, 1.0, %v2092_v27 }
 0x18c   : > { %1052 = vst [vmem:[%s2304_s11 + $0xe0] sm:$0xff] %v882_v26  ;;  %v1439_v46 = vmul.f32 %v1888_v20, %v882_v26  ;;  %v885_v47 = vadd.f32 %v2296_v24, %v884_v41  ;;  %v886_v50 = vpop.f32.mrb[59].mxu0  ;;  %1084 = vst [vmem:[%s2304_s11 + $0x1e0] sm:$0xff] %v2592_v35  ;;  %v2604_v55 = vadd.f32 %v2296_v24, %v1012_v45  ;;  %v1014_v56 = vpop.f32.mrb[59].mxu1  ;;  %v1890_v20 = vsel %vm1249_vm14, 1.0, %v2092_v27 }
 0x18d   : > { %v1191_v41 = vadd.s32 %v2286_v19, %v1126_v6  ;;  %vm1253_vm2 = vcmp.lt.s32.totalorder %v1189_v5, 1024  ;;  %v1192_v54 = vadd.s32 %v2286_v19, %v1127_v17  ;;  %v1443_v6 = vmul.f32 %v1892_v38, %v2310_v33 }
 0x18e   : > { %v1502_v0 = vadd.f32 %v1501_v8, %v1439_v46  ;;  %v1572_v3 = vmul.f32 %v1439_v46, %v882_v26  ;;  %1053 = vst [vmem:[%s2304_s11 + $0xe8] sm:$0xff] %v885_v47  ;;  %v1440_v4 = vmul.f32 %v1889_v43, %v885_v47  ;;  %1085 = vst [vmem:[%s2304_s11 + $0x1e8] sm:$0xff] %v2604_v55  ;;  %v1128_v43 = vadd.s32 304, %v2284_v18 }
 0x18f   : > { %v1891_v46 = vsel %vm1250_vm0, 1.0, %v2092_v27  ;;  %vm1255_vm4 = vcmp.lt.s32.totalorder %v1191_v41, 1024  ;;  %vm1256_vm5 = vcmp.lt.s32.totalorder %v1192_v54, 1024  ;;  %v1131_v5 = vadd.s32 328, %v2284_v18 }
 0x190   : > { %v1635_v7 = vadd.f32 %v1634_v23, %v1572_v3  ;;  %v1503_v11 = vadd.f32 %v1502_v0, %v1440_v4  ;;  %v1573_v12 = vmul.f32 %v1440_v4, %v885_v47  ;;  %v1893_v3 = vsel %vm1252_vm1, 1.0, %v2092_v27 }
 0x191   : > { %v889_v8 = vpop.f32.mrb[60].mxu0  ;;  %v1017_v22 = vpop.f32.mrb[60].mxu1  ;;  %v1129_v4 = vadd.s32 312, %v2284_v18  ;;  %v1193_v62 = vadd.s32 %v2286_v19, %v1128_v43  ;;  %v1444_v17 = vmul.f32 %v1893_v3, %v2319_v42  ;;  %v1896_v42 = vsel %vm1255_vm4, 1.0, %v2092_v27 }
 0x192   : > { %v1636_v26 = vadd.f32 %v1635_v7, %v1573_v12  ;;  %v890_v28 = vadd.f32 %v2296_v24, %v889_v8  ;;  %v891_v30 = vpop.f32.mrb[61].mxu0  ;;  %v2618_v23 = vadd.f32 %v2296_v24, %v1017_v22  ;;  %v1019_v36 = vpop.f32.mrb[61].mxu1  ;;  %v1897_v3 = vsel %vm1256_vm5, 1.0, %v2092_v27 }
 0x193   : > { %v892_v45 = vpop.f32.mrb[62].mxu0  ;;  %v1020_v47 = vpop.f32.mrb[62].mxu1  ;;  %v1194_v30 = vadd.s32 %v2286_v19, %v1129_v4  ;;  %v2081_v36 = vld [vmem:[%s2304_s11 + $0x100] sm:$0xff]  ;;  %vm1257_vm6 = vcmp.lt.s32.totalorder %v1193_v62, 1024  ;;  %v1196_v4 = vadd.s32 %v2286_v19, %v1131_v5  ;;  %v1133_v41 = vadd.s32 344, %v2284_v18 }
 0x194   : > { %1054 = vst [vmem:[%s2304_s11 + $0xf0] sm:$0xff] %v890_v28  ;;  %v1441_v50 = vmul.f32 %v1890_v20, %v890_v28  ;;  %v893_v56 = vadd.f32 %v2296_v24, %v892_v45  ;;  %v894_v48 = vpop.f32.mrb[63].mxu0  ;;  %1086 = vst [vmem:[%s2304_s11 + $0x1f0] sm:$0xff] %v2618_v23  ;;  %v2631_v37 = vadd.f32 %v2296_v24, %v1020_v47  ;;  %v1022_v0 = vpop.f32.mrb[63].mxu1  ;;  %v1894_v24 = vsel %vm1253_vm2, 1.0, %v2092_v27  ;;  %v2082_v47 = vld [vmem:[%s2304_s11 + $0x108] sm:$0xff] }
 0x195   : > { %v1130_v20 = vadd.s32 320, %v2284_v18  ;;  %v1576_v38 = vmul.f32 %v2081_v36, %v1443_v6  ;;  %v1445_v43 = vmul.f32 %v1894_v24, %v2330_v57  ;;  %vm1258_vm7 = vcmp.lt.s32.totalorder %v1194_v30, 1024 }
 0x196   : > { %v1504_v7 = vadd.f32 %v1503_v11, %v1441_v50  ;;  %v1574_v12 = vmul.f32 %v1441_v50, %v890_v28  ;;  %1055 = vst [vmem:[%s2304_s11 + $0xf8] sm:$0xff] %v893_v56  ;;  %v1442_v8 = vmul.f32 %v1891_v46, %v893_v56  ;;  %1087 = vst [vmem:[%s2304_s11 + $0x1f8] sm:$0xff] %v2631_v37  ;;  %v1895_v28 = vsel %vm1254_vm3, 1.0, %v2092_v27 }
 0x197   : > { %v1577_v50 = vmul.f32 %v2082_v47, %v1444_v17  ;;  %v1898_v24 = vsel %vm1257_vm6, 1.0, %v2092_v27  ;;  %v1134_v54 = vadd.s32 352, %v2284_v18  ;;  %vm1260_vm9 = vcmp.lt.s32.totalorder %v1196_v4, 1024 }
 0x198   : > { %v1637_v22 = vadd.f32 %v1636_v26, %v1574_v12  ;;  %v1505_v33 = vadd.f32 %v1504_v7, %v1442_v8  ;;  %v1575_v11 = vmul.f32 %v1442_v8, %v893_v56  ;;  %v1195_v26 = vadd.s32 %v2286_v19, %v1130_v20 }
 0x199   : > { %v1446_v56 = vmul.f32 %v1895_v28, %v2339_v2  ;;  %v1447_v7 = vmul.f32 %v1896_v42, %v2350_v21  ;;  %v1197_v20 = vadd.s32 %v2286_v19, %v1132_v14  ;;  %v1198_v28 = vadd.s32 %v2286_v19, %v1133_v41 }
 0x19a   : > { %v1506_v45 = vadd.f32 %v1505_v33, %v1443_v6  ;;  %v1638_v46 = vadd.f32 %v1637_v22, %v1575_v11  ;;  %v1578_v6 = vmul.f32 %v1445_v43, %v2330_v57  ;;  %vm1259_vm8 = vcmp.lt.s32.totalorder %v1195_v26, 1024 }
 0x19b   : > { %v1448_v22 = vmul.f32 %v1897_v3, %v2359_v32  ;;  %v1899_v57 = vsel %vm1258_vm7, 1.0, %v2092_v27  ;;  %v1135_v30 = vadd.s32 360, %v2284_v18  ;;  %v1580_v62 = vmul.f32 %v1447_v7, %v2350_v21 }
 0x19c   : > { %v1507_v48 = vadd.f32 %v1506_v45, %v1444_v17  ;;  %v1639_v0 = vadd.f32 %v1638_v46, %v1576_v38  ;;  %v1579_v17 = vmul.f32 %v1446_v56, %v2339_v2  ;;  %v1449_v5 = vmul.f32 %v1898_v24, %v2370_v51 }
 0x19d   : > { %vm1261_vm10 = vcmp.lt.s32.totalorder %v1197_v20, 1024  ;;  %v1199_v2 = vadd.s32 %v2286_v19, %v1134_v54  ;;  %v1136_v45 = vadd.s32 368, %v2284_v18  ;;  %v1581_v46 = vmul.f32 %v1448_v22, %v2359_v32 }
 0x19e   : > { %v1508_v12 = vadd.f32 %v1507_v48, %v1445_v43  ;;  %v1640_v8 = vadd.f32 %v1639_v0, %v1577_v50  ;;  %v1900_v43 = vsel %vm1259_vm8, 1.0, %v2092_v27  ;;  %v1450_v42 = vmul.f32 %v1899_v57, %v2379_v61 }
 0x19f   : > { %v1901_v47 = vsel %vm1260_vm9, 1.0, %v2092_v27  ;;  %vm1262_vm11 = vcmp.lt.s32.totalorder %v1198_v28, 1024  ;;  %v1200_v21 = vadd.s32 %v2286_v19, %v1135_v30  ;;  %v1137_v50 = vadd.s32 376, %v2284_v18 }
 0x1a0   : > { %v1509_v33 = vadd.f32 %v1508_v12, %v1446_v56  ;;  %v1641_v11 = vadd.f32 %v1640_v8, %v1578_v6  ;;  %v1582_v56 = vmul.f32 %v1449_v5, %v2370_v51  ;;  %v1451_v48 = vmul.f32 %v1900_v43, %v2390_v15 }
 0x1a1   : > { %v1902_v4 = vsel %vm1261_vm10, 1.0, %v2092_v27  ;;  %vm1263_vm12 = vcmp.lt.s32.totalorder %v1199_v2, 1024  ;;  %v1201_v32 = vadd.s32 %v2286_v19, %v1136_v45  ;;  %v1138_v41 = vadd.s32 384, %v2284_v18 }
 0x1a2   : > { %v1510_v36 = vadd.f32 %v1509_v33, %v1447_v7  ;;  %v1642_v38 = vadd.f32 %v1641_v11, %v1579_v17  ;;  %v1583_v6 = vmul.f32 %v1450_v42, %v2379_v61  ;;  %v1452_v7 = vmul.f32 %v1901_v47, %v2399_v29 }
 0x1a3   : > { %v1903_v24 = vsel %vm1262_vm11, 1.0, %v2092_v27  ;;  %vm1264_vm13 = vcmp.lt.s32.totalorder %v1200_v21, 1024  ;;  %v1202_v51 = vadd.s32 %v2286_v19, %v1137_v50  ;;  %v1139_v20 = vadd.s32 392, %v2284_v18 }
 0x1a4   : > { %v1511_v26 = vadd.f32 %v1510_v36, %v1448_v22  ;;  %v1643_v14 = vadd.f32 %v1642_v38, %v1580_v62  ;;  %v1584_v54 = vmul.f32 %v1451_v48, %v2390_v15  ;;  %v1453_v17 = vmul.f32 %v1902_v4, %v2410_v49 }
 0x1a5   : > { %v1904_v11 = vsel %vm1263_vm12, 1.0, %v2092_v27  ;;  %vm1265_vm14 = vcmp.lt.s32.totalorder %v1201_v32, 1024  ;;  %v1203_v61 = vadd.s32 %v2286_v19, %v1138_v41  ;;  %v1140_v57 = vadd.s32 400, %v2284_v18 }
 0x1a6   : > { %v1512_v0 = vadd.f32 %v1511_v26, %v1449_v5  ;;  %v1644_v3 = vadd.f32 %v1643_v14, %v1581_v46  ;;  %v1585_v28 = vmul.f32 %v1452_v7, %v2399_v29  ;;  %v1454_v30 = vmul.f32 %v1903_v24, %v2419_v60 }
 0x1a7   : > { %v1905_v36 = vsel %vm1264_vm13, 1.0, %v2092_v27  ;;  %vm1266_vm15 = vcmp.lt.s32.totalorder %v1202_v51, 1024  ;;  %v1204_v15 = vadd.s32 %v2286_v19, %v1139_v20  ;;  %v1141_v38 = vadd.s32 408, %v2284_v18 }
 0x1a8   : > { %v1513_v12 = vadd.f32 %v1512_v0, %v1450_v42  ;;  %v1645_v8 = vadd.f32 %v1644_v3, %v1582_v56  ;;  %v1586_v43 = vmul.f32 %v1453_v17, %v2410_v49  ;;  %v1455_v2 = vmul.f32 %v1904_v11, %v2430_v16 }
 0x1a9   : > { %v1906_v42 = vsel %vm1265_vm14, 1.0, %v2092_v27  ;;  %vm1267_vm0 = vcmp.lt.s32.totalorder %v1203_v61, 1024  ;;  %v1205_v29 = vadd.s32 %v2286_v19, %v1140_v57  ;;  %v1142_v26 = vadd.s32 416, %v2284_v18 }
 0x1aa   : > { %v1646_v22 = vadd.f32 %v1645_v8, %v1583_v6  ;;  %v1514_v33 = vadd.f32 %v1513_v12, %v1451_v48  ;;  %v1587_v14 = vmul.f32 %v1454_v30, %v2419_v60  ;;  %v1456_v47 = vmul.f32 %v1905_v36, %v2439_v31 }
 0x1ab   : > { %v1907_v56 = vsel %vm1266_vm15, 1.0, %v2092_v27  ;;  %vm1268_vm1 = vcmp.lt.s32.totalorder %v1204_v15, 1024  ;;  %v1206_v49 = vadd.s32 %v2286_v19, %v1141_v38  ;;  %v1143_v48 = vadd.s32 424, %v2284_v18 }
 0x1ac   : > { %v1515_v62 = vadd.f32 %v1514_v33, %v1452_v7  ;;  %v1647_v5 = vadd.f32 %v1646_v22, %v1584_v54  ;;  %v1588_v0 = vmul.f32 %v1455_v2, %v2430_v16  ;;  %v1457_v3 = vmul.f32 %v1906_v42, %v2450_v53 }
 0x1ad   : > { %v1908_v41 = vsel %vm1267_vm0, 1.0, %v2092_v27  ;;  %vm1269_vm2 = vcmp.lt.s32.totalorder %v1205_v29, 1024  ;;  %v1207_v60 = vadd.s32 %v2286_v19, %v1142_v26  ;;  %v1144_v6 = vadd.s32 432, %v2284_v18 }
 0x1ae   : > { %v1516_v45 = vadd.f32 %v1515_v62, %v1453_v17  ;;  %v1648_v46 = vadd.f32 %v1647_v5, %v1585_v28  ;;  %v1589_v7 = vmul.f32 %v1456_v47, %v2439_v31  ;;  %v1458_v12 = vmul.f32 %v1907_v56, %v2459_v1 }
 0x1af   : > { %v1909_v51 = vsel %vm1268_vm1, 1.0, %v2092_v27  ;;  %vm1270_vm3 = vcmp.lt.s32.totalorder %v1206_v49, 1024  ;;  %v1208_v16 = vadd.s32 %v2286_v19, %v1143_v48  ;;  %v1145_v20 = vadd.s32 440, %v2284_v18 }
 0x1b0   : > { %v1517_v21 = vadd.f32 %v1516_v45, %v1454_v30  ;;  %v1649_v50 = vadd.f32 %v1648_v46, %v1586_v43  ;;  %v1590_v54 = vmul.f32 %v1457_v3, %v2450_v53  ;;  %v1459_v17 = vmul.f32 %v1908_v41, %v2470_v25 }
 0x1b1   : > { %v1910_v11 = vsel %vm1269_vm2, 1.0, %v2092_v27  ;;  %vm1271_vm4 = vcmp.lt.s32.totalorder %v1207_v60, 1024  ;;  %v1209_v31 = vadd.s32 %v2286_v19, %v1144_v6  ;;  %v1146_v61 = vadd.s32 448, %v2284_v18 }
 0x1b2   : > { %v1518_v4 = vadd.f32 %v1517_v21, %v1455_v2  ;;  %v1650_v32 = vadd.f32 %v1649_v50, %v1587_v14  ;;  %v1591_v57 = vmul.f32 %v1458_v12, %v2459_v1  ;;  %v1460_v62 = vmul.f32 %v1909_v51, %v2479_v39 }
 0x1b3   : > { %v1911_v5 = vsel %vm1270_vm3, 1.0, %v2092_v27  ;;  %vm1272_vm5 = vcmp.lt.s32.totalorder %v1208_v16, 1024  ;;  %v1210_v53 = vadd.s32 %v2286_v19, %v1145_v20  ;;  %v1147_v36 = vadd.s32 456, %v2284_v18 }
 0x1b4   : > { %v1519_v8 = vadd.f32 %v1518_v4, %v1456_v47  ;;  %v1651_v24 = vadd.f32 %v1650_v32, %v1588_v0  ;;  %v1592_v38 = vmul.f32 %v1459_v17, %v2470_v25  ;;  %v1461_v2 = vmul.f32 %v1910_v11, %v2490_v63 }
 0x1b5   : > { %v1912_v45 = vsel %vm1271_vm4, 1.0, %v2092_v27  ;;  %vm1273_vm6 = vcmp.lt.s32.totalorder %v1209_v31, 1024  ;;  %v1211_v1 = vadd.s32 %v2286_v19, %v1146_v61  ;;  %v1148_v46 = vadd.s32 464, %v2284_v18 }
 0x1b6   : > { %v1520_v22 = vadd.f32 %v1519_v8, %v1457_v3  ;;  %v1652_v33 = vadd.f32 %v1651_v24, %v1589_v7  ;;  %v1593_v26 = vmul.f32 %v1460_v62, %v2479_v39  ;;  %v1462_v14 = vmul.f32 %v1911_v5, %v2499_v10 }
 0x1b7   : > { %v1913_v47 = vsel %vm1272_vm5, 1.0, %v2092_v27  ;;  %vm1274_vm7 = vcmp.lt.s32.totalorder %v1210_v53, 1024  ;;  %v1212_v25 = vadd.s32 %v2286_v19, %v1147_v36  ;;  %v1149_v21 = vadd.s32 472, %v2284_v18 }
 0x1b8   : > { %v1521_v28 = vadd.f32 %v1520_v22, %v1458_v12  ;;  %v1653_v30 = vadd.f32 %v1652_v33, %v1590_v54  ;;  %v1594_v49 = vmul.f32 %v1461_v2, %v2490_v63  ;;  %v1463_v48 = vmul.f32 %v1912_v45, %v2510_v40 }
 0x1b9   : > { %v1914_v0 = vsel %vm1273_vm6, 1.0, %v2092_v27  ;;  %vm1275_vm8 = vcmp.lt.s32.totalorder %v1211_v1, 1024  ;;  %v1213_v39 = vadd.s32 %v2286_v19, %v1148_v46  ;;  %v1150_v3 = vadd.s32 480, %v2284_v18 }
 0x1ba   : > { %v1522_v15 = vadd.f32 %v1521_v28, %v1459_v17  ;;  %v1654_v43 = vadd.f32 %v1653_v30, %v1591_v57  ;;  %v1595_v41 = vmul.f32 %v1462_v14, %v2499_v10  ;;  %v1464_v60 = vmul.f32 %v1913_v47, %v2519_v52 }
 0x1bb   : > { %v1915_v6 = vsel %vm1274_vm7, 1.0, %v2092_v27  ;;  %vm1276_vm9 = vcmp.lt.s32.totalorder %v1212_v25, 1024  ;;  %v1214_v63 = vadd.s32 %v2286_v19, %v1149_v21  ;;  %v1151_v7 = vadd.s32 488, %v2284_v18 }
 0x1bc   : > { %v1655_v42 = vadd.f32 %v1654_v43, %v1592_v38  ;;  %v1523_v29 = vadd.f32 %v1522_v15, %v1460_v62  ;;  %v1596_v24 = vmul.f32 %v1463_v48, %v2510_v40  ;;  %v1465_v51 = vmul.f32 %v1914_v0, %v2530_v13 }
 0x1bd   : > { %v1916_v16 = vsel %vm1275_vm8, 1.0, %v2092_v27  ;;  %vm1277_vm10 = vcmp.lt.s32.totalorder %v1213_v39, 1024  ;;  %v1215_v10 = vadd.s32 %v2286_v19, %v1150_v3  ;;  %v1152_v20 = vadd.s32 496, %v2284_v18 }
 0x1be   : > { %v1656_v50 = vadd.f32 %v1655_v42, %v1593_v26  ;;  %v1524_v56 = vadd.f32 %v1523_v29, %v1461_v2  ;;  %v1597_v22 = vmul.f32 %v1464_v60, %v2519_v52  ;;  %v1466_v33 = vmul.f32 %v1915_v6, %v2539_v34 }
 0x1bf   : > { %v1917_v11 = vsel %vm1276_vm9, 1.0, %v2092_v27  ;;  %vm1278_vm11 = vcmp.lt.s32.totalorder %v1214_v63, 1024  ;;  %v1216_v40 = vadd.s32 %v2286_v19, %v1151_v7  ;;  %v1153_v31 = vadd.s32 504, %v2284_v18 }
 0x1c0   : > { %v1657_v4 = vadd.f32 %v1656_v50, %v1594_v49  ;;  %v1525_v32 = vadd.f32 %v1524_v56, %v1462_v14  ;;  %v1598_v28 = vmul.f32 %v1465_v51, %v2530_v13  ;;  %v1467_v30 = vmul.f32 %v1916_v16, %v2550_v59 }
 0x1c1   : > { %v1918_v62 = vsel %vm1277_vm10, 1.0, %v2092_v27  ;;  %vm1279_vm12 = vcmp.lt.s32.totalorder %v1215_v10, 1024  ;;  %v1217_v52 = vadd.s32 %v2286_v19, %v1152_v20  ;;  %v1599_v36 = vmul.f32 %v1466_v33, %v2539_v34 }
 0x1c2   : > { %v1658_v12 = vadd.f32 %v1657_v4, %v1595_v41  ;;  %v1526_v8 = vadd.f32 %v1525_v32, %v1463_v48  ;;  %v1468_v15 = vmul.f32 %v1917_v11, %v2559_v9  ;;  %v1919_v38 = vsel %vm1278_vm11, 1.0, %v2092_v27 }
 0x1c3   : > { %vm1280_vm13 = vcmp.lt.s32.totalorder %v1216_v40, 1024  ;;  %v1218_v18 = vadd.s32 %v2286_v19, %v1153_v31  ;;  %v1600_v2 = vmul.f32 %v1467_v30, %v2550_v59  ;;  %v1469_v45 = vmul.f32 %v1918_v62, %v2570_v44 }
 0x1c4   : > { %v1659_v54 = vadd.f32 %v1658_v12, %v1596_v24  ;;  %v1527_v17 = vadd.f32 %v1526_v8, %v1464_v60  ;;  %v1920_v1 = vsel %vm1279_vm12, 1.0, %v2092_v27  ;;  %vm1281_vm14 = vcmp.lt.s32.totalorder %v1217_v52, 1024 }
 0x1c5   : > { %v1601_v34 = vmul.f32 %v1468_v15, %v2559_v9  ;;  %v1470_v29 = vmul.f32 %v1919_v38, %v2579_v58  ;;  %v1921_v26 = vsel %vm1280_vm13, 1.0, %v2092_v27  ;;  %vm1282_vm15 = vcmp.lt.s32.totalorder %v1218_v18, 1024 }
 0x1c6   : > { %v1660_v61 = vadd.f32 %v1659_v54, %v1597_v22  ;;  %v1528_v57 = vadd.f32 %v1527_v17, %v1465_v51  ;;  %v1602_v47 = vmul.f32 %v1469_v45, %v2570_v44  ;;  %v1471_v59 = vmul.f32 %v1920_v1, %v2592_v35 }
 0x1c7   : > { %v1922_v25 = vsel %vm1281_vm14, 1.0, %v2092_v27  ;;  %v1603_v56 = vmul.f32 %v1470_v29, %v2579_v58  ;;  %v1472_v49 = vmul.f32 %v1921_v26, %v2604_v55  ;;  %v1923_v9 = vsel %vm1282_vm15, 1.0, %v2092_v27 }
 0x1c8   : > { %v1661_v5 = vadd.f32 %v1660_v61, %v1598_v28  ;;  %v1529_v53 = vadd.f32 %v1528_v57, %v1466_v33  ;;  %v1604_v39 = vmul.f32 %v1471_v59, %v2592_v35  ;;  %v1473_v3 = vmul.f32 %v1922_v25, %v2618_v23 }
 0x1c9   : > { %v1605_v32 = vmul.f32 %v1472_v49, %v2604_v55  ;;  %v1474_v41 = vmul.f32 %v1923_v9, %v2631_v37  ;;  %vm1677_vm0 = vcmask 1040384  }
 0x1ca   : > { %v1662_v43 = vadd.f32 %v1661_v5, %v1599_v36  ;;  %v1530_v13 = vadd.f32 %v1529_v53, %v1467_v30  ;;  %v1606_v6 = vmul.f32 %v1473_v3, %v2618_v23 }
 0x1cb   : > { %v1607_v7 = vmul.f32 %v1474_v41, %v2631_v37 }
 0x1cc   : > { %v1663_v46 = vadd.f32 %v1662_v43, %v1600_v2  ;;  %v1531_v42 = vadd.f32 %v1530_v13, %v1468_v15 }
 0x1ce   : > { %v1664_v14 = vadd.f32 %v1663_v46, %v1601_v34  ;;  %v1532_v19 = vadd.f32 %v1531_v42, %v1469_v45 }
 0x1d0   : > { %v1665_v21 = vadd.f32 %v1664_v14, %v1602_v47  ;;  %v1533_v50 = vadd.f32 %v1532_v19, %v1470_v29 }
 0x1d2   : > { %v1666_v48 = vadd.f32 %v1665_v21, %v1603_v56  ;;  %v1534_v0 = vadd.f32 %v1533_v50, %v1471_v59 }
 0x1d4   : > { %v1667_v44 = vadd.f32 %v1666_v48, %v1604_v39  ;;  %v1535_v4 = vadd.f32 %v1534_v0, %v1472_v49 }
 0x1d6   : > { %v1668_v60 = vadd.f32 %v1667_v44, %v1605_v32  ;;  %v1536_v58 = vadd.f32 %v1535_v4, %v1473_v3 }
 0x1d8   : > { %v1669_v63 = vadd.f32 %v1668_v60, %v1606_v6  ;;  %v1537_v27 = vadd.f32 %v1536_v58, %v1474_v41 }
 0x1da   : > { %v1538_v12 = vrot.slane %v1537_v27, 4  ;;  %v1670_v8 = vadd.f32 %v1669_v63, %v1607_v7 }
 0x1dc   : > { %v1539_v35 = vadd.f32 %v1538_v12, %v1537_v27  ;;  %v1671_v24 = vrot.slane %v1670_v8, 4 }
 0x1de   : > { %v1540_v51 = vrot.slane %v1539_v35, 2  ;;  %v1672_v16 = vadd.f32 %v1671_v24, %v1670_v8 }
 0x1e0   : > { %v1541_v10 = vadd.f32 %v1540_v51, %v1539_v35  ;;  %v1673_v55 = vrot.slane %v1672_v16, 2 }
 0x1e2   : > { %v1542_v20 = vrot.slane %v1541_v10, 1  ;;  %v1674_v54 = vadd.f32 %v1673_v55, %v1672_v16 }
 0x1e4   : > { %v1675_v17 = vrot.slane %v1674_v54, 1  ;;  %v1543_v23 = vadd.f32 %v1542_v20, %v1541_v10 }
 0x1e6   : > { %v1676_v37 = vadd.f32 %v1675_v17, %v1674_v54 }
 0x1e8   : > { %v1678_v22 = vsel %vm1677_vm0, %v1543_v23, %v1676_v37 }
 0x1e9   : > { %1679 = vst [vmem:[%s214_s13] sm:$0x3] %v1678_v22 }
 0x1ea PF: > { %s15_s15 = sadd.s32 1, %s2089_s15  }
 0x1eb   : > { %p12_p5 = scmp.ge.s32.totalorder %s15_s15, 4  }
 0x1ed   :  { %14 = sbr.rel (!%p12_p5) target bundleno = 1 (0x1), region = 74 }

</bundles_post_ra>
